<compile_context>
chip_gen: v7x
topology: tpu7x:2x2x1
jax: 0.10.0
libtpu: 0.0.40
codegen_flags: <defaults>
</compile_context>

<pallas_src>
import functools

import jax
import jax.numpy as jnp
import numpy as np
from jax.experimental import pallas as pl
from jax.experimental.pallas import tpu as pltpu


def _round_up(x, m):
    return ((x + m - 1) // m) * m


def _inception_kernel(xa_ref, xb_ref, wbig_ref, sc_ref, sh_ref, wfb_ref, wfx_ref,
                      bias_ref, o_ref, *, wp, nvalid, bf16_taps):
    # xa_ref  : (1, TH*Wp, Cin)       bf16  body rows of the padded-plane row window
    # xb_ref  : (1, 4*Wp, Cin)        bf16  bottom-halo rows of the window
    # wbig_ref: (25*Cin, 3*Cout_p)    bf16  fused 1x1/3x3/5x5 branch weights
    # sc_ref  : (1, 3*Cout_p)         f32   folded BN scale (per branch/channel)
    # sh_ref  : (1, 3*Cout_p)         f32   folded BN shift
    # wfb_ref : (3*Cout_p, Cout_p)    bf16  filter-conv weights (branch part)
    # wfx_ref : (Cin, Cout_p)         bf16  filter-conv weights (identity part)
    # bias_ref: (1, Cout_p)           f32   filter-conv bias
    # o_ref   : (1, 1, TH*Wp, Cout_p) bf16  valid rows only (lane-dense Cout_p)
    x_tile = jnp.concatenate([xa_ref[0], xb_ref[0]], axis=0)      # (pt, Cin) bf16
    if not bf16_taps:
        x_tile = x_tile.astype(jnp.float32)    # conservative fallback path
    pt = x_tile.shape[0]

    # --- im2col: 25 tap planes as direct rolls of the flattened window (XLU only) ---
    # Roll wrap-around only contaminates rows/columns the wrapper strips (last row's
    # last 4 padded columns), verified for the trimmed nvalid-row compute.
    taps = []
    for dy in range(5):
        for dx in range(5):
            k = dy * wp + dx
            taps.append(x_tile if k == 0 else pltpu.roll(x_tile, pt - k, axis=0))
    patch = jnp.concatenate(taps, axis=-1)[:nvalid, :]            # (nvalid, 25*Cin)
    x_center = taps[2 * 5 + 2][:nvalid, :]                        # identity branch

    # --- all three conv branches as ONE MXU matmul (K = 25*Cin, N = 3*Cout_p) ---
    z = jnp.dot(patch.astype(jnp.bfloat16), wbig_ref[...],
                preferred_element_type=jnp.float32)               # (nvalid, 3*Cout_p)

    # folded BatchNorm + ReLU in f32
    br = jnp.maximum(z * sc_ref[...] + sh_ref[...], 0.0)

    # --- filter 1x1 conv over concat([b1, b3, b5, x]) = branch + identity matmuls ---
    out = (jnp.dot(br.astype(jnp.bfloat16), wfb_ref[...],
                   preferred_element_type=jnp.float32)
           + jnp.dot(x_center.astype(jnp.bfloat16), wfx_ref[...],
                     preferred_element_type=jnp.float32)
           + bias_ref[...])
    o_ref[0, 0, :, :] = out.astype(o_ref.dtype)                   # lane-dense bf16 store


def _prep_weights(params, cin, cout, cout_p):
    """Fuse/zero-pad the branch + filter weights into kernel-friendly layouts."""
    w1, w3, w5, scale, shift, wf, bf = params
    cb = 3 * cout_p

    # fused branch weight: (5, 5, Cin, 3 branches, Cout_p) -> (25*Cin, 3*Cout_p)
    wbig = jnp.zeros((5, 5, cin, 3, cout_p), jnp.float32)
    wbig = wbig.at[2, 2, :, 0, :cout].set(w1)          # 1x1 branch (center tap)
    wbig = wbig.at[1:4, 1:4, :, 1, :cout].set(w3)      # 3x3 branch (centered)
    wbig = wbig.at[:, :, :, 2, :cout].set(w5)          # 5x5 branch
    wbig = wbig.reshape(25 * cin, cb).astype(jnp.bfloat16)

    sc = jnp.zeros((3, cout_p), jnp.float32).at[:, :cout].set(scale).reshape(1, cb)
    sh = jnp.zeros((3, cout_p), jnp.float32).at[:, :cout].set(shift).reshape(1, cb)

    # filter conv, split into branch part and identity part (concat order x1,x3,x5,x)
    wfb = jnp.zeros((3, cout_p, cout_p), jnp.float32)
    wfb = wfb.at[:, :cout, :cout].set(wf[:3 * cout].reshape(3, cout, cout))
    wfb = wfb.reshape(cb, cout_p).astype(jnp.bfloat16)
    wfx = jnp.zeros((cin, cout_p), jnp.float32).at[:, :cout].set(wf[3 * cout:])
    wfx = wfx.astype(jnp.bfloat16)
    bfp = jnp.zeros((1, cout_p), jnp.float32).at[:, :cout].set(bf)
    return wbig, sc, sh, wfb, wfx, bfp


def _tpu_config():
    """Per-generation row-tile target and scoped-VMEM limit."""
    try:
        kind = jax.devices()[0].device_kind.lower()
    except Exception:  # pragma: no cover
        kind = ""
    if "v7" in kind:
        return 128, 48 << 20      # 64 MiB physical VMEM per TC -> smaller tiles
    if "v6" in kind or "v5" in kind:
        return 256, 100 << 20     # 128 MiB physical VMEM
    return 128, None              # unknown generation: keep default scoped limit


def _choose_row_tile(H, W, cin, cout_p, rows_target, vmem_cap):
    wp = _round_up(W, 2) + 4
    # rough per-row working-set bytes: dbl-buffered bf16 input window, bf16 patch,
    # f32 z/br, dbl-buffered bf16 output
    per_row = wp * (2 * 2 * cin + 2 * 25 * cin + 4 * 4 * cout_p + 2 * 2 * cout_p)
    budget = (vmem_cap if vmem_cap is not None else 32 << 20) // 2
    th = min(rows_target, max(4, budget // max(per_row, 1)))
    h4 = _round_up(H, 4)
    th = min(th, h4)
    if h4 >= 8:                    # keep T >= 2 so both v7x TensorCores get row tiles
        th = min(th, _round_up(h4 // 2, 4))
    return max(4, (th // 4) * 4)


def inception_pallas(x_nchw, params, row_tile=None):
    """x_nchw: (N, Cin, H, W) float32. Returns (N, Cout, H, W) float32."""
    N, Cin, H, W = x_nchw.shape
    Cout = params[0].shape[-1]
    Cout_p = _round_up(Cout, 128)             # lane-dense output channels
    Cb = 3 * Cout_p

    rows_target, vmem_cap = _tpu_config()
    TH = row_tile if row_tile is not None else _choose_row_tile(
        H, W, Cin, Cout_p, rows_target, vmem_cap)
    TH = max(4, (TH // 4) * 4)                # halo spec needs TH % 4 == 0
    Hv = _round_up(H, TH)                     # rows actually computed (then stripped)
    T = Hv // TH
    Wv = _round_up(W, 2)                      # keep row windows 8-sublane aligned
    Wp = Wv + 4
    nvalid = TH * Wp                          # valid rows per tile
    halo = 4 * Wp                             # bottom-halo rows per tile
    tb = TH // 4                              # body block size in units of halo blocks

    x = jnp.transpose(x_nchw, (0, 2, 3, 1))                        # NHWC
    x_pad = jnp.pad(x, ((0, 0), (2, 2 + Hv - H), (2, 2 + Wv - W), (0, 0)))
    x_flat = x_pad.reshape(N, (Hv + 4) * Wp, Cin).astype(jnp.bfloat16)

    wbig, sc, sh, wfb, wfx, bfp = _prep_weights(params, Cin, Cout, Cout_p)

    def build(bf16_taps, single_buf_weights):
        kernel = functools.partial(_inception_kernel, wp=Wp, nvalid=nvalid,
                                   bf16_taps=bf16_taps)
        # grid-invariant constants: request single buffering (no re-fetch across grid)
        wkw = dict(pipeline_mode=pl.Buffered(1)) if single_buf_weights else {}
        in_specs = [
            pl.BlockSpec((1, nvalid, Cin), lambda n, t: (n, t, 0)),           # body
            pl.BlockSpec((1, halo, Cin), lambda n, t: (n, (t + 1) * tb, 0)),  # halo
            pl.BlockSpec((25 * Cin, Cb), lambda n, t: (0, 0), **wkw),
            pl.BlockSpec((1, Cb), lambda n, t: (0, 0), **wkw),
            pl.BlockSpec((1, Cb), lambda n, t: (0, 0), **wkw),
            pl.BlockSpec((Cb, Cout_p), lambda n, t: (0, 0), **wkw),
            pl.BlockSpec((Cin, Cout_p), lambda n, t: (0, 0), **wkw),
            pl.BlockSpec((1, Cout_p), lambda n, t: (0, 0), **wkw),
        ]
        return pl.pallas_call(
            kernel,
            out_shape=jax.ShapeDtypeStruct((N, T, nvalid, Cout_p), jnp.bfloat16),
            grid=(N, T),
            in_specs=in_specs,
            out_specs=pl.BlockSpec((1, 1, nvalid, Cout_p), lambda n, t: (n, t, 0, 0)),
            compiler_params=pltpu.CompilerParams(
                dimension_semantics=("parallel", "parallel"),
                vmem_limit_bytes=vmem_cap),
        )

    # Preferred config first; degrade gracefully on jax/Mosaic builds that reject
    # single-buffered pipeline_mode or packed-dtype sublane rolls.
    attempts = ((True, True), (True, False), (False, False))
    out = None
    last_err = None
    for bf16_taps, single_buf in attempts:
        try:
            out = build(bf16_taps, single_buf)(x_flat, x_flat, wbig, sc, sh,
                                               wfb, wfx, bfp)
            break
        except Exception as e:  # pragma: no cover - compatibility fallback
            last_err = e
    if out is None:
        raise last_err

    # strip padded rows / cols / channels, back to NCHW f32
    out = out.reshape(N, Hv, Wp, Cout_p)[:, :H, :W, :Cout].astype(jnp.float32)
    return jnp.transpose(out, (0, 3, 1, 2))


def make_params(key, in_channels, out_channels, eps=1e-4):
    ks = jax.random.split(key, 12)
    w1 = jax.random.normal(ks[0], (in_channels, out_channels), jnp.float32) * 0.1
    w3 = jax.random.normal(ks[1], (3, 3, in_channels, out_channels), jnp.float32) * 0.1
    w5 = jax.random.normal(ks[2], (5, 5, in_channels, out_channels), jnp.float32) * 0.1
    # BatchNorm params (inference mode), one row per branch [1x1, 3x3, 5x5]
    gamma = 1.0 + 0.1 * jax.random.normal(ks[3], (3, out_channels), jnp.float32)
    beta = 0.1 * jax.random.normal(ks[4], (3, out_channels), jnp.float32)
    mean = 0.1 * jax.random.normal(ks[5], (3, out_channels), jnp.float32)
    var = jax.random.uniform(ks[6], (3, out_channels), jnp.float32, 0.5, 1.5)
    scale = gamma / jnp.sqrt(var + eps)
    shift = beta - mean * scale
    # filter 1x1 conv (with bias); input channels = 3*out + in, concat order (x1,x3,x5,x)
    wf = jax.random.normal(ks[7], (3 * out_channels + in_channels, out_channels),
                           jnp.float32) * 0.1
    bf = 0.1 * jax.random.normal(ks[8], (1, out_channels), jnp.float32)
    return (w1, w3, w5, scale, shift, wf, bf)


def reference_forward(x_nchw, params):
    """Pure-JAX reference (lax.conv). Operands are bf16-rounded to match the kernel's
    bf16-operand / f32-accumulation arithmetic."""
    w1, w3, w5, scale, shift, wf, bf = params
    Cin = x_nchw.shape[1]
    Cout = w1.shape[-1]
    q = lambda a: a.astype(jnp.bfloat16).astype(jnp.float32)
    x = q(jnp.transpose(x_nchw, (0, 2, 3, 1)))   # NHWC

    def conv(inp, w, pad):
        return jax.lax.conv_general_dilated(
            inp, w, (1, 1), [(pad, pad), (pad, pad)],
            dimension_numbers=('NHWC', 'HWIO', 'NHWC'),
            precision=jax.lax.Precision.HIGHEST)

    b1 = jnp.maximum(conv(x, q(w1).reshape(1, 1, Cin, Cout), 0) * scale[0] + shift[0], 0.0)
    b3 = jnp.maximum(conv(x, q(w3), 1) * scale[1] + shift[1], 0.0)
    b5 = jnp.maximum(conv(x, q(w5), 2) * scale[2] + shift[2], 0.0)
    cat = jnp.concatenate([q(b1), q(b3), q(b5), x], axis=-1)
    out = conv(cat, q(wf).reshape(1, 1, 3 * Cout + Cin, Cout), 0) + bf[0]
    return jnp.transpose(out, (0, 3, 1, 2))


if __name__ == "__main__":
    key = jax.random.PRNGKey(0)
    k_x, k_p = jax.random.split(key)

    N, Cin, Cout, H, W = 2, 4, 8, 16, 16
    x = jax.random.normal(k_x, (N, Cin, H, W), jnp.float32)
    params = make_params(k_p, Cin, Cout)

    out = inception_pallas(x, params)
    out = jax.block_until_ready(out)

    ref = reference_forward(x, params)
    np.testing.assert_allclose(np.asarray(out), np.asarray(ref), rtol=1e-2, atol=1e-2)

    print("KERNEL_OK")
</pallas_src>

<mosaic_0001>
module attributes {stable_mosaic.version = 11 : i64} {
  func.func @_inception_kernel(%arg0: i32, %arg1: i32, %arg2: memref<1x160x4xbf16, #tpu.memory_space<vmem>>, %arg3: memref<1x80x4xbf16, #tpu.memory_space<vmem>>, %arg4: memref<100x384xbf16, #tpu.memory_space<vmem>>, %arg5: memref<1x384xf32, #tpu.memory_space<vmem>>, %arg6: memref<1x384xf32, #tpu.memory_space<vmem>>, %arg7: memref<384x128xbf16, #tpu.memory_space<vmem>>, %arg8: memref<4x128xbf16, #tpu.memory_space<vmem>>, %arg9: memref<1x128xf32, #tpu.memory_space<vmem>>, %arg10: memref<1x1x160x128xbf16, #tpu.memory_space<vmem>>) attributes {dimension_semantics = [#tpu.dimension_semantics<parallel>, #tpu.dimension_semantics<parallel>], iteration_bounds = array<i64: 2, 2>, scalar_prefetch = 0 : i64, scratch_operands = 0 : i64, tpu.core_type = #tpu.core_type<tc>, window_params = [{transform_indices = @transform_0, window_bounds = array<i64: 1, 160, 4>}, {transform_indices = @transform_1, window_bounds = array<i64: 1, 80, 4>}, {pipeline_mode = #tpu.pipeline_mode<synchronous>, transform_indices = @transform_2, window_bounds = array<i64: 100, 384>}, {pipeline_mode = #tpu.pipeline_mode<synchronous>, transform_indices = @transform_3, window_bounds = array<i64: 1, 384>}, {pipeline_mode = #tpu.pipeline_mode<synchronous>, transform_indices = @transform_4, window_bounds = array<i64: 1, 384>}, {pipeline_mode = #tpu.pipeline_mode<synchronous>, transform_indices = @transform_5, window_bounds = array<i64: 384, 128>}, {pipeline_mode = #tpu.pipeline_mode<synchronous>, transform_indices = @transform_6, window_bounds = array<i64: 4, 128>}, {pipeline_mode = #tpu.pipeline_mode<synchronous>, transform_indices = @transform_7, window_bounds = array<i64: 1, 128>}, {transform_indices = @transform_8, window_bounds = array<i64: 1, 1, 160, 128>}]} {
    %c0 = arith.constant 0 : index
    %c0_0 = arith.constant 0 : index
    %c0_1 = arith.constant 0 : index
    %0 = vector.load %arg2[%c0, %c0_0, %c0_1] : memref<1x160x4xbf16, #tpu.memory_space<vmem>>, vector<1x160x4xbf16>
    %1 = vector.shape_cast %0 : vector<1x160x4xbf16> to vector<160x4xbf16>
    %c0_2 = arith.constant 0 : index
    %c0_3 = arith.constant 0 : index
    %c0_4 = arith.constant 0 : index
    %2 = vector.load %arg3[%c0_2, %c0_3, %c0_4] : memref<1x80x4xbf16, #tpu.memory_space<vmem>>, vector<1x80x4xbf16>
    %3 = vector.shape_cast %2 : vector<1x80x4xbf16> to vector<80x4xbf16>
    %4 = tpu.concatenate %1, %3 in 0 : vector<160x4xbf16>, vector<80x4xbf16> -> vector<240x4xbf16>
    %c239_i32 = arith.constant 239 : i32
    %5 = tpu.dynamic_rotate %4 by %c239_i32 dim 0 : vector<240x4xbf16>, i32 -> vector<240x4xbf16>
    %c238_i32 = arith.constant 238 : i32
    %6 = tpu.dynamic_rotate %4 by %c238_i32 dim 0 : vector<240x4xbf16>, i32 -> vector<240x4xbf16>
    %c237_i32 = arith.constant 237 : i32
    %7 = tpu.dynamic_rotate %4 by %c237_i32 dim 0 : vector<240x4xbf16>, i32 -> vector<240x4xbf16>
    %c236_i32 = arith.constant 236 : i32
    %8 = tpu.dynamic_rotate %4 by %c236_i32 dim 0 : vector<240x4xbf16>, i32 -> vector<240x4xbf16>
    %c220_i32 = arith.constant 220 : i32
    %9 = tpu.dynamic_rotate %4 by %c220_i32 dim 0 : vector<240x4xbf16>, i32 -> vector<240x4xbf16>
    %c219_i32 = arith.constant 219 : i32
    %10 = tpu.dynamic_rotate %4 by %c219_i32 dim 0 : vector<240x4xbf16>, i32 -> vector<240x4xbf16>
    %c218_i32 = arith.constant 218 : i32
    %11 = tpu.dynamic_rotate %4 by %c218_i32 dim 0 : vector<240x4xbf16>, i32 -> vector<240x4xbf16>
    %c217_i32 = arith.constant 217 : i32
    %12 = tpu.dynamic_rotate %4 by %c217_i32 dim 0 : vector<240x4xbf16>, i32 -> vector<240x4xbf16>
    %c216_i32 = arith.constant 216 : i32
    %13 = tpu.dynamic_rotate %4 by %c216_i32 dim 0 : vector<240x4xbf16>, i32 -> vector<240x4xbf16>
    %c200_i32 = arith.constant 200 : i32
    %14 = tpu.dynamic_rotate %4 by %c200_i32 dim 0 : vector<240x4xbf16>, i32 -> vector<240x4xbf16>
    %c199_i32 = arith.constant 199 : i32
    %15 = tpu.dynamic_rotate %4 by %c199_i32 dim 0 : vector<240x4xbf16>, i32 -> vector<240x4xbf16>
    %c198_i32 = arith.constant 198 : i32
    %16 = tpu.dynamic_rotate %4 by %c198_i32 dim 0 : vector<240x4xbf16>, i32 -> vector<240x4xbf16>
    %c197_i32 = arith.constant 197 : i32
    %17 = tpu.dynamic_rotate %4 by %c197_i32 dim 0 : vector<240x4xbf16>, i32 -> vector<240x4xbf16>
    %c196_i32 = arith.constant 196 : i32
    %18 = tpu.dynamic_rotate %4 by %c196_i32 dim 0 : vector<240x4xbf16>, i32 -> vector<240x4xbf16>
    %c180_i32 = arith.constant 180 : i32
    %19 = tpu.dynamic_rotate %4 by %c180_i32 dim 0 : vector<240x4xbf16>, i32 -> vector<240x4xbf16>
    %c179_i32 = arith.constant 179 : i32
    %20 = tpu.dynamic_rotate %4 by %c179_i32 dim 0 : vector<240x4xbf16>, i32 -> vector<240x4xbf16>
    %c178_i32 = arith.constant 178 : i32
    %21 = tpu.dynamic_rotate %4 by %c178_i32 dim 0 : vector<240x4xbf16>, i32 -> vector<240x4xbf16>
    %c177_i32 = arith.constant 177 : i32
    %22 = tpu.dynamic_rotate %4 by %c177_i32 dim 0 : vector<240x4xbf16>, i32 -> vector<240x4xbf16>
    %c176_i32 = arith.constant 176 : i32
    %23 = tpu.dynamic_rotate %4 by %c176_i32 dim 0 : vector<240x4xbf16>, i32 -> vector<240x4xbf16>
    %c160_i32 = arith.constant 160 : i32
    %24 = tpu.dynamic_rotate %4 by %c160_i32 dim 0 : vector<240x4xbf16>, i32 -> vector<240x4xbf16>
    %c159_i32 = arith.constant 159 : i32
    %25 = tpu.dynamic_rotate %4 by %c159_i32 dim 0 : vector<240x4xbf16>, i32 -> vector<240x4xbf16>
    %c158_i32 = arith.constant 158 : i32
    %26 = tpu.dynamic_rotate %4 by %c158_i32 dim 0 : vector<240x4xbf16>, i32 -> vector<240x4xbf16>
    %c157_i32 = arith.constant 157 : i32
    %27 = tpu.dynamic_rotate %4 by %c157_i32 dim 0 : vector<240x4xbf16>, i32 -> vector<240x4xbf16>
    %c156_i32 = arith.constant 156 : i32
    %28 = tpu.dynamic_rotate %4 by %c156_i32 dim 0 : vector<240x4xbf16>, i32 -> vector<240x4xbf16>
    %29 = tpu.concatenate %4, %5, %6, %7, %8, %9, %10, %11, %12, %13, %14, %15, %16, %17, %18, %19 in 1 : vector<240x4xbf16>, vector<240x4xbf16>, vector<240x4xbf16>, vector<240x4xbf16>, vector<240x4xbf16>, vector<240x4xbf16>, vector<240x4xbf16>, vector<240x4xbf16>, vector<240x4xbf16>, vector<240x4xbf16>, vector<240x4xbf16>, vector<240x4xbf16>, vector<240x4xbf16>, vector<240x4xbf16>, vector<240x4xbf16>, vector<240x4xbf16> -> vector<240x64xbf16>
    %30 = tpu.concatenate %20, %21, %22, %23, %24, %25, %26, %27, %28 in 1 : vector<240x4xbf16>, vector<240x4xbf16>, vector<240x4xbf16>, vector<240x4xbf16>, vector<240x4xbf16>, vector<240x4xbf16>, vector<240x4xbf16>, vector<240x4xbf16>, vector<240x4xbf16> -> vector<240x36xbf16>
    %31 = tpu.concatenate %29, %30 in 1 : vector<240x64xbf16>, vector<240x36xbf16> -> vector<240x100xbf16>
    %32 = vector.extract_strided_slice %31 {offsets = [0, 0], sizes = [160, 100], strides = [1, 1]} : vector<240x100xbf16> to vector<160x100xbf16>
    %33 = vector.extract_strided_slice %16 {offsets = [0, 0], sizes = [160, 4], strides = [1, 1]} : vector<240x4xbf16> to vector<160x4xbf16>
    %c0_5 = arith.constant 0 : index
    %c0_6 = arith.constant 0 : index
    %34 = vector.load %arg4[%c0_5, %c0_6] : memref<100x384xbf16, #tpu.memory_space<vmem>>, vector<100x384xbf16>
    %cst = arith.constant dense<0.000000e+00> : vector<160x384xf32>
    %35 = tpu.matmul %32, %34, %cst {dimension_numbers = #tpu.dot_dimension_numbers<[1], [0], [0], [1], [0, 0, 1, 1], [], []>} : vector<160x100xbf16>, vector<100x384xbf16>, vector<160x384xf32> -> vector<160x384xf32>
    %c0_7 = arith.constant 0 : index
    %c0_8 = arith.constant 0 : index
    %36 = vector.load %arg5[%c0_7, %c0_8] : memref<1x384xf32, #tpu.memory_space<vmem>>, vector<1x384xf32>
    %37 = vector.broadcast %36 : vector<1x384xf32> to vector<160x384xf32>
    %38 = arith.mulf %35, %37 : vector<160x384xf32>
    %c0_9 = arith.constant 0 : index
    %c0_10 = arith.constant 0 : index
    %39 = vector.load %arg6[%c0_9, %c0_10] : memref<1x384xf32, #tpu.memory_space<vmem>>, vector<1x384xf32>
    %40 = vector.broadcast %39 : vector<1x384xf32> to vector<160x384xf32>
    %41 = arith.addf %38, %40 : vector<160x384xf32>
    %cst_11 = arith.constant 0.000000e+00 : f32
    %42 = vector.broadcast %cst_11 : f32 to vector<160x384xf32>
    %43 = arith.maximumf %41, %42 : vector<160x384xf32>
    %44 = arith.truncf %43 : vector<160x384xf32> to vector<160x384xbf16>
    %c0_12 = arith.constant 0 : index
    %c0_13 = arith.constant 0 : index
    %45 = vector.load %arg7[%c0_12, %c0_13] : memref<384x128xbf16, #tpu.memory_space<vmem>>, vector<384x128xbf16>
    %cst_14 = arith.constant dense<0.000000e+00> : vector<160x128xf32>
    %46 = tpu.matmul %44, %45, %cst_14 {dimension_numbers = #tpu.dot_dimension_numbers<[1], [0], [0], [1], [0, 0, 1, 1], [], []>} : vector<160x384xbf16>, vector<384x128xbf16>, vector<160x128xf32> -> vector<160x128xf32>
    %c0_15 = arith.constant 0 : index
    %c0_16 = arith.constant 0 : index
    %47 = vector.load %arg8[%c0_15, %c0_16] : memref<4x128xbf16, #tpu.memory_space<vmem>>, vector<4x128xbf16>
    %cst_17 = arith.constant dense<0.000000e+00> : vector<160x128xf32>
    %48 = tpu.matmul %33, %47, %cst_17 {dimension_numbers = #tpu.dot_dimension_numbers<[1], [0], [0], [1], [0, 0, 1, 1], [], []>} : vector<160x4xbf16>, vector<4x128xbf16>, vector<160x128xf32> -> vector<160x128xf32>
    %49 = arith.addf %46, %48 : vector<160x128xf32>
    %c0_18 = arith.constant 0 : index
    %c0_19 = arith.constant 0 : index
    %50 = vector.load %arg9[%c0_18, %c0_19] : memref<1x128xf32, #tpu.memory_space<vmem>>, vector<1x128xf32>
    %51 = vector.broadcast %50 : vector<1x128xf32> to vector<160x128xf32>
    %52 = arith.addf %49, %51 : vector<160x128xf32>
    %53 = arith.truncf %52 : vector<160x128xf32> to vector<160x128xbf16>
    %c0_20 = arith.constant 0 : index
    %c0_21 = arith.constant 0 : index
    %c0_22 = arith.constant 0 : index
    %c0_23 = arith.constant 0 : index
    %54 = vector.load %arg10[%c0_20, %c0_21, %c0_22, %c0_23] : memref<1x1x160x128xbf16, #tpu.memory_space<vmem>>, vector<1x1x160x128xbf16>
    %55 = vector.shape_cast %54 : vector<1x1x160x128xbf16> to vector<160x128xbf16>
    %56 = vector.shape_cast %53 : vector<160x128xbf16> to vector<1x1x160x128xbf16>
    tpu.vector_store %arg10[%c0_20, %c0_21, %c0_22, %c0_23], %56 {strides = array<i32>} : memref<1x1x160x128xbf16, #tpu.memory_space<vmem>>, vector<1x1x160x128xbf16>,
    return
  }
  func.func @transform_0(%arg0: i32, %arg1: i32) -> (i32, i32, i32) {
    %c0_i32 = arith.constant 0 : i32
    %c0_i32_0 = arith.constant 0 : i32
    return %arg0, %arg1, %c0_i32 : i32, i32, i32
  }
  func.func @transform_1(%arg0: i32, %arg1: i32) -> (i32, i32, i32) {
    %c1_i32 = arith.constant 1 : i32
    %0 = arith.addi %arg1, %c1_i32 : i32
    %c2_i32 = arith.constant 2 : i32
    %1 = arith.muli %0, %c2_i32 : i32
    %c0_i32 = arith.constant 0 : i32
    %c0_i32_0 = arith.constant 0 : i32
    return %arg0, %1, %c0_i32 : i32, i32, i32
  }
  func.func @transform_2(%arg0: i32, %arg1: i32) -> (i32, i32) {
    %c0_i32 = arith.constant 0 : i32
    %c0_i32_0 = arith.constant 0 : i32
    %c0_i32_1 = arith.constant 0 : i32
    return %c0_i32, %c0_i32_0 : i32, i32
  }
  func.func @transform_3(%arg0: i32, %arg1: i32) -> (i32, i32) {
    %c0_i32 = arith.constant 0 : i32
    %c0_i32_0 = arith.constant 0 : i32
    %c0_i32_1 = arith.constant 0 : i32
    return %c0_i32, %c0_i32_0 : i32, i32
  }
  func.func @transform_4(%arg0: i32, %arg1: i32) -> (i32, i32) {
    %c0_i32 = arith.constant 0 : i32
    %c0_i32_0 = arith.constant 0 : i32
    %c0_i32_1 = arith.constant 0 : i32
    return %c0_i32, %c0_i32_0 : i32, i32
  }
  func.func @transform_5(%arg0: i32, %arg1: i32) -> (i32, i32) {
    %c0_i32 = arith.constant 0 : i32
    %c0_i32_0 = arith.constant 0 : i32
    %c0_i32_1 = arith.constant 0 : i32
    return %c0_i32, %c0_i32_0 : i32, i32
  }
  func.func @transform_6(%arg0: i32, %arg1: i32) -> (i32, i32) {
    %c0_i32 = arith.constant 0 : i32
    %c0_i32_0 = arith.constant 0 : i32
    %c0_i32_1 = arith.constant 0 : i32
    return %c0_i32, %c0_i32_0 : i32, i32
  }
  func.func @transform_7(%arg0: i32, %arg1: i32) -> (i32, i32) {
    %c0_i32 = arith.constant 0 : i32
    %c0_i32_0 = arith.constant 0 : i32
    %c0_i32_1 = arith.constant 0 : i32
    return %c0_i32, %c0_i32_0 : i32, i32
  }
  func.func @transform_8(%arg0: i32, %arg1: i32) -> (i32, i32, i32, i32) {
    %c0_i32 = arith.constant 0 : i32
    %c0_i32_0 = arith.constant 0 : i32
    %c0_i32_1 = arith.constant 0 : i32
    return %arg0, %arg1, %c0_i32, %c0_i32_0 : i32, i32, i32, i32
  }
}

module attributes {stable_mosaic.version = 11 : i64} {
  func.func @_inception_kernel(%arg0: i32, %arg1: i32, %arg2: memref<1x160x4xbf16, #tpu.memory_space<vmem>>, %arg3: memref<1x80x4xbf16, #tpu.memory_space<vmem>>, %arg4: memref<100x384xbf16, #tpu.memory_space<vmem>>, %arg5: memref<1x384xf32, #tpu.memory_space<vmem>>, %arg6: memref<1x384xf32, #tpu.memory_space<vmem>>, %arg7: memref<384x128xbf16, #tpu.memory_space<vmem>>, %arg8: memref<4x128xbf16, #tpu.memory_space<vmem>>, %arg9: memref<1x128xf32, #tpu.memory_space<vmem>>, %arg10: memref<1x1x160x128xbf16, #tpu.memory_space<vmem>>) attributes {dimension_semantics = [#tpu.dimension_semantics<parallel>, #tpu.dimension_semantics<parallel>], iteration_bounds = array<i64: 2, 2>, scalar_prefetch = 0 : i64, scratch_operands = 0 : i64, tpu.core_type = #tpu.core_type<tc>, window_params = [{transform_indices = @transform_0, window_bounds = array<i64: 1, 160, 4>}, {transform_indices = @transform_1, window_bounds = array<i64: 1, 80, 4>}, {pipeline_mode = #tpu.pipeline_mode<synchronous>, transform_indices = @transform_2, window_bounds = array<i64: 100, 384>}, {pipeline_mode = #tpu.pipeline_mode<synchronous>, transform_indices = @transform_3, window_bounds = array<i64: 1, 384>}, {pipeline_mode = #tpu.pipeline_mode<synchronous>, transform_indices = @transform_4, window_bounds = array<i64: 1, 384>}, {pipeline_mode = #tpu.pipeline_mode<synchronous>, transform_indices = @transform_5, window_bounds = array<i64: 384, 128>}, {pipeline_mode = #tpu.pipeline_mode<synchronous>, transform_indices = @transform_6, window_bounds = array<i64: 4, 128>}, {pipeline_mode = #tpu.pipeline_mode<synchronous>, transform_indices = @transform_7, window_bounds = array<i64: 1, 128>}, {transform_indices = @transform_8, window_bounds = array<i64: 1, 1, 160, 128>}]} {
    %c0 = arith.constant 0 : index
    %c0_0 = arith.constant 0 : index
    %c0_1 = arith.constant 0 : index
    %0 = vector.load %arg2[%c0, %c0_0, %c0_1] : memref<1x160x4xbf16, #tpu.memory_space<vmem>>, vector<1x160x4xbf16>
    %1 = vector.shape_cast %0 : vector<1x160x4xbf16> to vector<160x4xbf16>
    %c0_2 = arith.constant 0 : index
    %c0_3 = arith.constant 0 : index
    %c0_4 = arith.constant 0 : index
    %2 = vector.load %arg3[%c0_2, %c0_3, %c0_4] : memref<1x80x4xbf16, #tpu.memory_space<vmem>>, vector<1x80x4xbf16>
    %3 = vector.shape_cast %2 : vector<1x80x4xbf16> to vector<80x4xbf16>
    %4 = tpu.concatenate %1, %3 in 0 : vector<160x4xbf16>, vector<80x4xbf16> -> vector<240x4xbf16>
    %c239_i32 = arith.constant 239 : i32
    %5 = tpu.dynamic_rotate %4 by %c239_i32 dim 0 : vector<240x4xbf16>, i32 -> vector<240x4xbf16>
    %c238_i32 = arith.constant 238 : i32
    %6 = tpu.dynamic_rotate %4 by %c238_i32 dim 0 : vector<240x4xbf16>, i32 -> vector<240x4xbf16>
    %c237_i32 = arith.constant 237 : i32
    %7 = tpu.dynamic_rotate %4 by %c237_i32 dim 0 : vector<240x4xbf16>, i32 -> vector<240x4xbf16>
    %c236_i32 = arith.constant 236 : i32
    %8 = tpu.dynamic_rotate %4 by %c236_i32 dim 0 : vector<240x4xbf16>, i32 -> vector<240x4xbf16>
    %c220_i32 = arith.constant 220 : i32
    %9 = tpu.dynamic_rotate %4 by %c220_i32 dim 0 : vector<240x4xbf16>, i32 -> vector<240x4xbf16>
    %c219_i32 = arith.constant 219 : i32
    %10 = tpu.dynamic_rotate %4 by %c219_i32 dim 0 : vector<240x4xbf16>, i32 -> vector<240x4xbf16>
    %c218_i32 = arith.constant 218 : i32
    %11 = tpu.dynamic_rotate %4 by %c218_i32 dim 0 : vector<240x4xbf16>, i32 -> vector<240x4xbf16>
    %c217_i32 = arith.constant 217 : i32
    %12 = tpu.dynamic_rotate %4 by %c217_i32 dim 0 : vector<240x4xbf16>, i32 -> vector<240x4xbf16>
    %c216_i32 = arith.constant 216 : i32
    %13 = tpu.dynamic_rotate %4 by %c216_i32 dim 0 : vector<240x4xbf16>, i32 -> vector<240x4xbf16>
    %c200_i32 = arith.constant 200 : i32
    %14 = tpu.dynamic_rotate %4 by %c200_i32 dim 0 : vector<240x4xbf16>, i32 -> vector<240x4xbf16>
    %c199_i32 = arith.constant 199 : i32
    %15 = tpu.dynamic_rotate %4 by %c199_i32 dim 0 : vector<240x4xbf16>, i32 -> vector<240x4xbf16>
    %c198_i32 = arith.constant 198 : i32
    %16 = tpu.dynamic_rotate %4 by %c198_i32 dim 0 : vector<240x4xbf16>, i32 -> vector<240x4xbf16>
    %c197_i32 = arith.constant 197 : i32
    %17 = tpu.dynamic_rotate %4 by %c197_i32 dim 0 : vector<240x4xbf16>, i32 -> vector<240x4xbf16>
    %c196_i32 = arith.constant 196 : i32
    %18 = tpu.dynamic_rotate %4 by %c196_i32 dim 0 : vector<240x4xbf16>, i32 -> vector<240x4xbf16>
    %c180_i32 = arith.constant 180 : i32
    %19 = tpu.dynamic_rotate %4 by %c180_i32 dim 0 : vector<240x4xbf16>, i32 -> vector<240x4xbf16>
    %c179_i32 = arith.constant 179 : i32
    %20 = tpu.dynamic_rotate %4 by %c179_i32 dim 0 : vector<240x4xbf16>, i32 -> vector<240x4xbf16>
    %c178_i32 = arith.constant 178 : i32
    %21 = tpu.dynamic_rotate %4 by %c178_i32 dim 0 : vector<240x4xbf16>, i32 -> vector<240x4xbf16>
    %c177_i32 = arith.constant 177 : i32
    %22 = tpu.dynamic_rotate %4 by %c177_i32 dim 0 : vector<240x4xbf16>, i32 -> vector<240x4xbf16>
    %c176_i32 = arith.constant 176 : i32
    %23 = tpu.dynamic_rotate %4 by %c176_i32 dim 0 : vector<240x4xbf16>, i32 -> vector<240x4xbf16>
    %c160_i32 = arith.constant 160 : i32
    %24 = tpu.dynamic_rotate %4 by %c160_i32 dim 0 : vector<240x4xbf16>, i32 -> vector<240x4xbf16>
    %c159_i32 = arith.constant 159 : i32
    %25 = tpu.dynamic_rotate %4 by %c159_i32 dim 0 : vector<240x4xbf16>, i32 -> vector<240x4xbf16>
    %c158_i32 = arith.constant 158 : i32
    %26 = tpu.dynamic_rotate %4 by %c158_i32 dim 0 : vector<240x4xbf16>, i32 -> vector<240x4xbf16>
    %c157_i32 = arith.constant 157 : i32
    %27 = tpu.dynamic_rotate %4 by %c157_i32 dim 0 : vector<240x4xbf16>, i32 -> vector<240x4xbf16>
    %c156_i32 = arith.constant 156 : i32
    %28 = tpu.dynamic_rotate %4 by %c156_i32 dim 0 : vector<240x4xbf16>, i32 -> vector<240x4xbf16>
    %29 = tpu.concatenate %4, %5, %6, %7, %8, %9, %10, %11, %12, %13, %14, %15, %16, %17, %18, %19 in 1 : vector<240x4xbf16>, vector<240x4xbf16>, vector<240x4xbf16>, vector<240x4xbf16>, vector<240x4xbf16>, vector<240x4xbf16>, vector<240x4xbf16>, vector<240x4xbf16>, vector<240x4xbf16>, vector<240x4xbf16>, vector<240x4xbf16>, vector<240x4xbf16>, vector<240x4xbf16>, vector<240x4xbf16>, vector<240x4xbf16>, vector<240x4xbf16> -> vector<240x64xbf16>
    %30 = tpu.concatenate %20, %21, %22, %23, %24, %25, %26, %27, %28 in 1 : vector<240x4xbf16>, vector<240x4xbf16>, vector<240x4xbf16>, vector<240x4xbf16>, vector<240x4xbf16>, vector<240x4xbf16>, vector<240x4xbf16>, vector<240x4xbf16>, vector<240x4xbf16> -> vector<240x36xbf16>
    %31 = tpu.concatenate %29, %30 in 1 : vector<240x64xbf16>, vector<240x36xbf16> -> vector<240x100xbf16>
    %32 = vector.extract_strided_slice %31 {offsets = [0, 0], sizes = [160, 100], strides = [1, 1]} : vector<240x100xbf16> to vector<160x100xbf16>
    %33 = vector.extract_strided_slice %16 {offsets = [0, 0], sizes = [160, 4], strides = [1, 1]} : vector<240x4xbf16> to vector<160x4xbf16>
    %c0_5 = arith.constant 0 : index
    %c0_6 = arith.constant 0 : index
    %34 = vector.load %arg4[%c0_5, %c0_6] : memref<100x384xbf16, #tpu.memory_space<vmem>>, vector<100x384xbf16>
    %cst = arith.constant dense<0.000000e+00> : vector<160x384xf32>
    %35 = tpu.matmul %32, %34, %cst {dimension_numbers = #tpu.dot_dimension_numbers<[1], [0], [0], [1], [0, 0, 1, 1], [], []>} : vector<160x100xbf16>, vector<100x384xbf16>, vector<160x384xf32> -> vector<160x384xf32>
    %c0_7 = arith.constant 0 : index
    %c0_8 = arith.constant 0 : index
    %36 = vector.load %arg5[%c0_7, %c0_8] : memref<1x384xf32, #tpu.memory_space<vmem>>, vector<1x384xf32>
    %37 = vector.broadcast %36 : vector<1x384xf32> to vector<160x384xf32>
    %38 = arith.mulf %35, %37 : vector<160x384xf32>
    %c0_9 = arith.constant 0 : index
    %c0_10 = arith.constant 0 : index
    %39 = vector.load %arg6[%c0_9, %c0_10] : memref<1x384xf32, #tpu.memory_space<vmem>>, vector<1x384xf32>
    %40 = vector.broadcast %39 : vector<1x384xf32> to vector<160x384xf32>
    %41 = arith.addf %38, %40 : vector<160x384xf32>
    %cst_11 = arith.constant 0.000000e+00 : f32
    %42 = vector.broadcast %cst_11 : f32 to vector<160x384xf32>
    %43 = arith.maximumf %41, %42 : vector<160x384xf32>
    %44 = arith.truncf %43 : vector<160x384xf32> to vector<160x384xbf16>
    %c0_12 = arith.constant 0 : index
    %c0_13 = arith.constant 0 : index
    %45 = vector.load %arg7[%c0_12, %c0_13] : memref<384x128xbf16, #tpu.memory_space<vmem>>, vector<384x128xbf16>
    %cst_14 = arith.constant dense<0.000000e+00> : vector<160x128xf32>
    %46 = tpu.matmul %44, %45, %cst_14 {dimension_numbers = #tpu.dot_dimension_numbers<[1], [0], [0], [1], [0, 0, 1, 1], [], []>} : vector<160x384xbf16>, vector<384x128xbf16>, vector<160x128xf32> -> vector<160x128xf32>
    %c0_15 = arith.constant 0 : index
    %c0_16 = arith.constant 0 : index
    %47 = vector.load %arg8[%c0_15, %c0_16] : memref<4x128xbf16, #tpu.memory_space<vmem>>, vector<4x128xbf16>
    %cst_17 = arith.constant dense<0.000000e+00> : vector<160x128xf32>
    %48 = tpu.matmul %33, %47, %cst_17 {dimension_numbers = #tpu.dot_dimension_numbers<[1], [0], [0], [1], [0, 0, 1, 1], [], []>} : vector<160x4xbf16>, vector<4x128xbf16>, vector<160x128xf32> -> vector<160x128xf32>
    %49 = arith.addf %46, %48 : vector<160x128xf32>
    %c0_18 = arith.constant 0 : index
    %c0_19 = arith.constant 0 : index
    %50 = vector.load %arg9[%c0_18, %c0_19] : memref<1x128xf32, #tpu.memory_space<vmem>>, vector<1x128xf32>
    %51 = vector.broadcast %50 : vector<1x128xf32> to vector<160x128xf32>
    %52 = arith.addf %49, %51 : vector<160x128xf32>
    %53 = arith.truncf %52 : vector<160x128xf32> to vector<160x128xbf16>
    %c0_20 = arith.constant 0 : index
    %c0_21 = arith.constant 0 : index
    %c0_22 = arith.constant 0 : index
    %c0_23 = arith.constant 0 : index
    %54 = vector.load %arg10[%c0_20, %c0_21, %c0_22, %c0_23] : memref<1x1x160x128xbf16, #tpu.memory_space<vmem>>, vector<1x1x160x128xbf16>
    %55 = vector.shape_cast %54 : vector<1x1x160x128xbf16> to vector<160x128xbf16>
    %56 = vector.shape_cast %53 : vector<160x128xbf16> to vector<1x1x160x128xbf16>
    tpu.vector_store %arg10[%c0_20, %c0_21, %c0_22, %c0_23], %56 {strides = array<i32>} : memref<1x1x160x128xbf16, #tpu.memory_space<vmem>>, vector<1x1x160x128xbf16>,
    return
  }
  func.func @transform_0(%arg0: i32, %arg1: i32) -> (i32, i32, i32) {
    %c0_i32 = arith.constant 0 : i32
    %c0_i32_0 = arith.constant 0 : i32
    return %arg0, %arg1, %c0_i32 : i32, i32, i32
  }
  func.func @transform_1(%arg0: i32, %arg1: i32) -> (i32, i32, i32) {
    %c1_i32 = arith.constant 1 : i32
    %0 = arith.addi %arg1, %c1_i32 : i32
    %c2_i32 = arith.constant 2 : i32
    %1 = arith.muli %0, %c2_i32 : i32
    %c0_i32 = arith.constant 0 : i32
    %c0_i32_0 = arith.constant 0 : i32
    return %arg0, %1, %c0_i32 : i32, i32, i32
  }
  func.func @transform_2(%arg0: i32, %arg1: i32) -> (i32, i32) {
    %c0_i32 = arith.constant 0 : i32
    %c0_i32_0 = arith.constant 0 : i32
    %c0_i32_1 = arith.constant 0 : i32
    return %c0_i32, %c0_i32_0 : i32, i32
  }
  func.func @transform_3(%arg0: i32, %arg1: i32) -> (i32, i32) {
    %c0_i32 = arith.constant 0 : i32
    %c0_i32_0 = arith.constant 0 : i32
    %c0_i32_1 = arith.constant 0 : i32
    return %c0_i32, %c0_i32_0 : i32, i32
  }
  func.func @transform_4(%arg0: i32, %arg1: i32) -> (i32, i32) {
    %c0_i32 = arith.constant 0 : i32
    %c0_i32_0 = arith.constant 0 : i32
    %c0_i32_1 = arith.constant 0 : i32
    return %c0_i32, %c0_i32_0 : i32, i32
  }
  func.func @transform_5(%arg0: i32, %arg1: i32) -> (i32, i32) {
    %c0_i32 = arith.constant 0 : i32
    %c0_i32_0 = arith.constant 0 : i32
    %c0_i32_1 = arith.constant 0 : i32
    return %c0_i32, %c0_i32_0 : i32, i32
  }
  func.func @transform_6(%arg0: i32, %arg1: i32) -> (i32, i32) {
    %c0_i32 = arith.constant 0 : i32
    %c0_i32_0 = arith.constant 0 : i32
    %c0_i32_1 = arith.constant 0 : i32
    return %c0_i32, %c0_i32_0 : i32, i32
  }
  func.func @transform_7(%arg0: i32, %arg1: i32) -> (i32, i32) {
    %c0_i32 = arith.constant 0 : i32
    %c0_i32_0 = arith.constant 0 : i32
    %c0_i32_1 = arith.constant 0 : i32
    return %c0_i32, %c0_i32_0 : i32, i32
  }
  func.func @transform_8(%arg0: i32, %arg1: i32) -> (i32, i32, i32, i32) {
    %c0_i32 = arith.constant 0 : i32
    %c0_i32_0 = arith.constant 0 : i32
    %c0_i32_1 = arith.constant 0 : i32
    return %arg0, %arg1, %c0_i32, %c0_i32_0 : i32, i32, i32, i32
  }
}

module attributes {stable_mosaic.version = 11 : i64} {
  func.func @_inception_kernel(%arg0: i32, %arg1: i32, %arg2: memref<1x160x4xbf16, #tpu.memory_space<vmem>>, %arg3: memref<1x80x4xbf16, #tpu.memory_space<vmem>>, %arg4: memref<100x384xbf16, #tpu.memory_space<vmem>>, %arg5: memref<1x384xf32, #tpu.memory_space<vmem>>, %arg6: memref<1x384xf32, #tpu.memory_space<vmem>>, %arg7: memref<384x128xbf16, #tpu.memory_space<vmem>>, %arg8: memref<4x128xbf16, #tpu.memory_space<vmem>>, %arg9: memref<1x128xf32, #tpu.memory_space<vmem>>, %arg10: memref<1x1x160x128xbf16, #tpu.memory_space<vmem>>) attributes {dimension_semantics = [#tpu.dimension_semantics<parallel>, #tpu.dimension_semantics<parallel>], iteration_bounds = array<i64: 2, 2>, scalar_prefetch = 0 : i64, scratch_operands = 0 : i64, tpu.core_type = #tpu.core_type<tc>, window_params = [{transform_indices = @transform_0, window_bounds = array<i64: 1, 160, 4>}, {transform_indices = @transform_1, window_bounds = array<i64: 1, 80, 4>}, {pipeline_mode = #tpu.pipeline_mode<synchronous>, transform_indices = @transform_2, window_bounds = array<i64: 100, 384>}, {pipeline_mode = #tpu.pipeline_mode<synchronous>, transform_indices = @transform_3, window_bounds = array<i64: 1, 384>}, {pipeline_mode = #tpu.pipeline_mode<synchronous>, transform_indices = @transform_4, window_bounds = array<i64: 1, 384>}, {pipeline_mode = #tpu.pipeline_mode<synchronous>, transform_indices = @transform_5, window_bounds = array<i64: 384, 128>}, {pipeline_mode = #tpu.pipeline_mode<synchronous>, transform_indices = @transform_6, window_bounds = array<i64: 4, 128>}, {pipeline_mode = #tpu.pipeline_mode<synchronous>, transform_indices = @transform_7, window_bounds = array<i64: 1, 128>}, {transform_indices = @transform_8, window_bounds = array<i64: 1, 1, 160, 128>}]} {
    %c0 = arith.constant 0 : index
    %c0_0 = arith.constant 0 : index
    %c0_1 = arith.constant 0 : index
    %0 = vector.load %arg2[%c0, %c0_0, %c0_1] : memref<1x160x4xbf16, #tpu.memory_space<vmem>>, vector<1x160x4xbf16>
    %1 = vector.shape_cast %0 : vector<1x160x4xbf16> to vector<160x4xbf16>
    %c0_2 = arith.constant 0 : index
    %c0_3 = arith.constant 0 : index
    %c0_4 = arith.constant 0 : index
    %2 = vector.load %arg3[%c0_2, %c0_3, %c0_4] : memref<1x80x4xbf16, #tpu.memory_space<vmem>>, vector<1x80x4xbf16>
    %3 = vector.shape_cast %2 : vector<1x80x4xbf16> to vector<80x4xbf16>
    %4 = tpu.concatenate %1, %3 in 0 : vector<160x4xbf16>, vector<80x4xbf16> -> vector<240x4xbf16>
    %5 = arith.extf %4 : vector<240x4xbf16> to vector<240x4xf32>
    %c239_i32 = arith.constant 239 : i32
    %6 = tpu.dynamic_rotate %5 by %c239_i32 dim 0 : vector<240x4xf32>, i32 -> vector<240x4xf32>
    %c238_i32 = arith.constant 238 : i32
    %7 = tpu.dynamic_rotate %5 by %c238_i32 dim 0 : vector<240x4xf32>, i32 -> vector<240x4xf32>
    %c237_i32 = arith.constant 237 : i32
    %8 = tpu.dynamic_rotate %5 by %c237_i32 dim 0 : vector<240x4xf32>, i32 -> vector<240x4xf32>
    %c236_i32 = arith.constant 236 : i32
    %9 = tpu.dynamic_rotate %5 by %c236_i32 dim 0 : vector<240x4xf32>, i32 -> vector<240x4xf32>
    %c220_i32 = arith.constant 220 : i32
    %10 = tpu.dynamic_rotate %5 by %c220_i32 dim 0 : vector<240x4xf32>, i32 -> vector<240x4xf32>
    %c219_i32 = arith.constant 219 : i32
    %11 = tpu.dynamic_rotate %5 by %c219_i32 dim 0 : vector<240x4xf32>, i32 -> vector<240x4xf32>
    %c218_i32 = arith.constant 218 : i32
    %12 = tpu.dynamic_rotate %5 by %c218_i32 dim 0 : vector<240x4xf32>, i32 -> vector<240x4xf32>
    %c217_i32 = arith.constant 217 : i32
    %13 = tpu.dynamic_rotate %5 by %c217_i32 dim 0 : vector<240x4xf32>, i32 -> vector<240x4xf32>
    %c216_i32 = arith.constant 216 : i32
    %14 = tpu.dynamic_rotate %5 by %c216_i32 dim 0 : vector<240x4xf32>, i32 -> vector<240x4xf32>
    %c200_i32 = arith.constant 200 : i32
    %15 = tpu.dynamic_rotate %5 by %c200_i32 dim 0 : vector<240x4xf32>, i32 -> vector<240x4xf32>
    %c199_i32 = arith.constant 199 : i32
    %16 = tpu.dynamic_rotate %5 by %c199_i32 dim 0 : vector<240x4xf32>, i32 -> vector<240x4xf32>
    %c198_i32 = arith.constant 198 : i32
    %17 = tpu.dynamic_rotate %5 by %c198_i32 dim 0 : vector<240x4xf32>, i32 -> vector<240x4xf32>
    %c197_i32 = arith.constant 197 : i32
    %18 = tpu.dynamic_rotate %5 by %c197_i32 dim 0 : vector<240x4xf32>, i32 -> vector<240x4xf32>
    %c196_i32 = arith.constant 196 : i32
    %19 = tpu.dynamic_rotate %5 by %c196_i32 dim 0 : vector<240x4xf32>, i32 -> vector<240x4xf32>
    %c180_i32 = arith.constant 180 : i32
    %20 = tpu.dynamic_rotate %5 by %c180_i32 dim 0 : vector<240x4xf32>, i32 -> vector<240x4xf32>
    %c179_i32 = arith.constant 179 : i32
    %21 = tpu.dynamic_rotate %5 by %c179_i32 dim 0 : vector<240x4xf32>, i32 -> vector<240x4xf32>
    %c178_i32 = arith.constant 178 : i32
    %22 = tpu.dynamic_rotate %5 by %c178_i32 dim 0 : vector<240x4xf32>, i32 -> vector<240x4xf32>
    %c177_i32 = arith.constant 177 : i32
    %23 = tpu.dynamic_rotate %5 by %c177_i32 dim 0 : vector<240x4xf32>, i32 -> vector<240x4xf32>
    %c176_i32 = arith.constant 176 : i32
    %24 = tpu.dynamic_rotate %5 by %c176_i32 dim 0 : vector<240x4xf32>, i32 -> vector<240x4xf32>
    %c160_i32 = arith.constant 160 : i32
    %25 = tpu.dynamic_rotate %5 by %c160_i32 dim 0 : vector<240x4xf32>, i32 -> vector<240x4xf32>
    %c159_i32 = arith.constant 159 : i32
    %26 = tpu.dynamic_rotate %5 by %c159_i32 dim 0 : vector<240x4xf32>, i32 -> vector<240x4xf32>
    %c158_i32 = arith.constant 158 : i32
    %27 = tpu.dynamic_rotate %5 by %c158_i32 dim 0 : vector<240x4xf32>, i32 -> vector<240x4xf32>
    %c157_i32 = arith.constant 157 : i32
    %28 = tpu.dynamic_rotate %5 by %c157_i32 dim 0 : vector<240x4xf32>, i32 -> vector<240x4xf32>
    %c156_i32 = arith.constant 156 : i32
    %29 = tpu.dynamic_rotate %5 by %c156_i32 dim 0 : vector<240x4xf32>, i32 -> vector<240x4xf32>
    %30 = tpu.concatenate %5, %6, %7, %8, %9, %10, %11, %12, %13, %14, %15, %16, %17, %18, %19, %20 in 1 : vector<240x4xf32>, vector<240x4xf32>, vector<240x4xf32>, vector<240x4xf32>, vector<240x4xf32>, vector<240x4xf32>, vector<240x4xf32>, vector<240x4xf32>, vector<240x4xf32>, vector<240x4xf32>, vector<240x4xf32>, vector<240x4xf32>, vector<240x4xf32>, vector<240x4xf32>, vector<240x4xf32>, vector<240x4xf32> -> vector<240x64xf32>
    %31 = tpu.concatenate %21, %22, %23, %24, %25, %26, %27, %28, %29 in 1 : vector<240x4xf32>, vector<240x4xf32>, vector<240x4xf32>, vector<240x4xf32>, vector<240x4xf32>, vector<240x4xf32>, vector<240x4xf32>, vector<240x4xf32>, vector<240x4xf32> -> vector<240x36xf32>
    %32 = tpu.concatenate %30, %31 in 1 : vector<240x64xf32>, vector<240x36xf32> -> vector<240x100xf32>
    %33 = vector.extract_strided_slice %32 {offsets = [0, 0], sizes = [160, 100], strides = [1, 1]} : vector<240x100xf32> to vector<160x100xf32>
    %34 = vector.extract_strided_slice %17 {offsets = [0, 0], sizes = [160, 4], strides = [1, 1]} : vector<240x4xf32> to vector<160x4xf32>
    %35 = arith.truncf %33 : vector<160x100xf32> to vector<160x100xbf16>
    %c0_5 = arith.constant 0 : index
    %c0_6 = arith.constant 0 : index
    %36 = vector.load %arg4[%c0_5, %c0_6] : memref<100x384xbf16, #tpu.memory_space<vmem>>, vector<100x384xbf16>
    %cst = arith.constant dense<0.000000e+00> : vector<160x384xf32>
    %37 = tpu.matmul %35, %36, %cst {dimension_numbers = #tpu.dot_dimension_numbers<[1], [0], [0], [1], [0, 0, 1, 1], [], []>} : vector<160x100xbf16>, vector<100x384xbf16>, vector<160x384xf32> -> vector<160x384xf32>
    %c0_7 = arith.constant 0 : index
    %c0_8 = arith.constant 0 : index
    %38 = vector.load %arg5[%c0_7, %c0_8] : memref<1x384xf32, #tpu.memory_space<vmem>>, vector<1x384xf32>
    %39 = vector.broadcast %38 : vector<1x384xf32> to vector<160x384xf32>
    %40 = arith.mulf %37, %39 : vector<160x384xf32>
    %c0_9 = arith.constant 0 : index
    %c0_10 = arith.constant 0 : index
    %41 = vector.load %arg6[%c0_9, %c0_10] : memref<1x384xf32, #tpu.memory_space<vmem>>, vector<1x384xf32>
    %42 = vector.broadcast %41 : vector<1x384xf32> to vector<160x384xf32>
    %43 = arith.addf %40, %42 : vector<160x384xf32>
    %cst_11 = arith.constant 0.000000e+00 : f32
    %44 = vector.broadcast %cst_11 : f32 to vector<160x384xf32>
    %45 = arith.maximumf %43, %44 : vector<160x384xf32>
    %46 = arith.truncf %45 : vector<160x384xf32> to vector<160x384xbf16>
    %c0_12 = arith.constant 0 : index
    %c0_13 = arith.constant 0 : index
    %47 = vector.load %arg7[%c0_12, %c0_13] : memref<384x128xbf16, #tpu.memory_space<vmem>>, vector<384x128xbf16>
    %cst_14 = arith.constant dense<0.000000e+00> : vector<160x128xf32>
    %48 = tpu.matmul %46, %47, %cst_14 {dimension_numbers = #tpu.dot_dimension_numbers<[1], [0], [0], [1], [0, 0, 1, 1], [], []>} : vector<160x384xbf16>, vector<384x128xbf16>, vector<160x128xf32> -> vector<160x128xf32>
    %49 = arith.truncf %34 : vector<160x4xf32> to vector<160x4xbf16>
    %c0_15 = arith.constant 0 : index
    %c0_16 = arith.constant 0 : index
    %50 = vector.load %arg8[%c0_15, %c0_16] : memref<4x128xbf16, #tpu.memory_space<vmem>>, vector<4x128xbf16>
    %cst_17 = arith.constant dense<0.000000e+00> : vector<160x128xf32>
    %51 = tpu.matmul %49, %50, %cst_17 {dimension_numbers = #tpu.dot_dimension_numbers<[1], [0], [0], [1], [0, 0, 1, 1], [], []>} : vector<160x4xbf16>, vector<4x128xbf16>, vector<160x128xf32> -> vector<160x128xf32>
    %52 = arith.addf %48, %51 : vector<160x128xf32>
    %c0_18 = arith.constant 0 : index
    %c0_19 = arith.constant 0 : index
    %53 = vector.load %arg9[%c0_18, %c0_19] : memref<1x128xf32, #tpu.memory_space<vmem>>, vector<1x128xf32>
    %54 = vector.broadcast %53 : vector<1x128xf32> to vector<160x128xf32>
    %55 = arith.addf %52, %54 : vector<160x128xf32>
    %56 = arith.truncf %55 : vector<160x128xf32> to vector<160x128xbf16>
    %c0_20 = arith.constant 0 : index
    %c0_21 = arith.constant 0 : index
    %c0_22 = arith.constant 0 : index
    %c0_23 = arith.constant 0 : index
    %57 = vector.load %arg10[%c0_20, %c0_21, %c0_22, %c0_23] : memref<1x1x160x128xbf16, #tpu.memory_space<vmem>>, vector<1x1x160x128xbf16>
    %58 = vector.shape_cast %57 : vector<1x1x160x128xbf16> to vector<160x128xbf16>
    %59 = vector.shape_cast %56 : vector<160x128xbf16> to vector<1x1x160x128xbf16>
    tpu.vector_store %arg10[%c0_20, %c0_21, %c0_22, %c0_23], %59 {strides = array<i32>} : memref<1x1x160x128xbf16, #tpu.memory_space<vmem>>, vector<1x1x160x128xbf16>,
    return
  }
  func.func @transform_0(%arg0: i32, %arg1: i32) -> (i32, i32, i32) {
    %c0_i32 = arith.constant 0 : i32
    %c0_i32_0 = arith.constant 0 : i32
    return %arg0, %arg1, %c0_i32 : i32, i32, i32
  }
  func.func @transform_1(%arg0: i32, %arg1: i32) -> (i32, i32, i32) {
    %c1_i32 = arith.constant 1 : i32
    %0 = arith.addi %arg1, %c1_i32 : i32
    %c2_i32 = arith.constant 2 : i32
    %1 = arith.muli %0, %c2_i32 : i32
    %c0_i32 = arith.constant 0 : i32
    %c0_i32_0 = arith.constant 0 : i32
    return %arg0, %1, %c0_i32 : i32, i32, i32
  }
  func.func @transform_2(%arg0: i32, %arg1: i32) -> (i32, i32) {
    %c0_i32 = arith.constant 0 : i32
    %c0_i32_0 = arith.constant 0 : i32
    %c0_i32_1 = arith.constant 0 : i32
    return %c0_i32, %c0_i32_0 : i32, i32
  }
  func.func @transform_3(%arg0: i32, %arg1: i32) -> (i32, i32) {
    %c0_i32 = arith.constant 0 : i32
    %c0_i32_0 = arith.constant 0 : i32
    %c0_i32_1 = arith.constant 0 : i32
    return %c0_i32, %c0_i32_0 : i32, i32
  }
  func.func @transform_4(%arg0: i32, %arg1: i32) -> (i32, i32) {
    %c0_i32 = arith.constant 0 : i32
    %c0_i32_0 = arith.constant 0 : i32
    %c0_i32_1 = arith.constant 0 : i32
    return %c0_i32, %c0_i32_0 : i32, i32
  }
  func.func @transform_5(%arg0: i32, %arg1: i32) -> (i32, i32) {
    %c0_i32 = arith.constant 0 : i32
    %c0_i32_0 = arith.constant 0 : i32
    %c0_i32_1 = arith.constant 0 : i32
    return %c0_i32, %c0_i32_0 : i32, i32
  }
  func.func @transform_6(%arg0: i32, %arg1: i32) -> (i32, i32) {
    %c0_i32 = arith.constant 0 : i32
    %c0_i32_0 = arith.constant 0 : i32
    %c0_i32_1 = arith.constant 0 : i32
    return %c0_i32, %c0_i32_0 : i32, i32
  }
  func.func @transform_7(%arg0: i32, %arg1: i32) -> (i32, i32) {
    %c0_i32 = arith.constant 0 : i32
    %c0_i32_0 = arith.constant 0 : i32
    %c0_i32_1 = arith.constant 0 : i32
    return %c0_i32, %c0_i32_0 : i32, i32
  }
  func.func @transform_8(%arg0: i32, %arg1: i32) -> (i32, i32, i32, i32) {
    %c0_i32 = arith.constant 0 : i32
    %c0_i32_0 = arith.constant 0 : i32
    %c0_i32_1 = arith.constant 0 : i32
    return %arg0, %arg1, %c0_i32, %c0_i32_0 : i32, i32, i32, i32
  }
}

</mosaic_0001>

<bundles_post_ra>
// kernel: tpu_custom_call.1
= control target key start
LH: loop header
LB: loop body
LE: loop exit
PB: predicated region body
PF: predicated region fallthrough
CT: control target
= control target key end

     0   :  { %s10156_s0 = inlined_call_operand.vmem [shape: bf16[2,400,4], index: 0, kind: input, shape index: {}]   ;;  %s10157_s1 = inlined_call_operand.vmem [shape: bf16[2,400,4], index: 1, kind: input, shape index: {}]   ;;  %s10158_s2 = inlined_call_operand.vmem [shape: bf16[100,384], index: 2, kind: input, shape index: {}]   ;;  %s10159_s3 = inlined_call_operand.vmem [shape: f32[1,384], index: 3, kind: input, shape index: {}]   ;;  %s10160_s4 = inlined_call_operand.vmem [shape: f32[1,384], index: 4, kind: input, shape index: {}]   ;;  %s10161_s5 = inlined_call_operand.vmem [shape: bf16[384,128], index: 5, kind: input, shape index: {}]   ;;  %s10162_s6 = inlined_call_operand.vmem [shape: bf16[4,128], index: 6, kind: input, shape index: {}]   ;;  %s10163_s7 = inlined_call_operand.vmem [shape: f32[1,128], index: 7, kind: input, shape index: {}]   ;;  %s10164_s8 = inlined_call_operand.hbm [shape: bf16[2,2,160,128], index: 8, kind: output, shape index: {}]  }
   0x1   :  { %10479 = sst [smem:[#allocation192_spill]] %s10156_s0 }
   0x2   :  { %13 = vsyncpa [#allocation3], 0 }
   0x3   :  { %15 = vsyncpa [#allocation3 + $0x1], 0  ;;  %s6603_s27 = smov 0   ;;  %s6605_s28 = smov 0  }
   0x4   :  { %s6607_s29 = smov 0   ;;  %s6609_s30 = smov 0  }
   0x5   :  { %s6611_s9 = smov 0   ;;  %s6613_s10 = smov 0  }
   0x6   :  { %s6615_s11 = smov 0   ;;  %s6617_s12 = smov 0  }
   0x7 LB: > { %s4619_s13 = sadd.s32 4294967295, %s6538_s12   ;;  %s4620_s14 = sadd.s32 4294967294, %s6538_s12   ;;  %s6538_s12 = sphi %s6617_s12, %s21_s12   ;;  %s6534_s11 = sphi %s6615_s11, %s11119_s11   ;;  %s6530_s10 = sphi %s6613_s10, %s11118_s10   ;;  %s6526_s9 = sphi %s6611_s9, %s11117_s9   ;;  %s6522_s30 = sphi %s6609_s30, %s11116_s30   ;;  %s6518_s29 = sphi %s6607_s29, %s11115_s29   ;;  %s6514_s28 = sphi %s6605_s28, %s11114_s28   ;;  %s6510_s27 = sphi %s6603_s27, %s11113_s27  }
   0x8   : > { %s30_s15 = sadd.s32 1, %s6530_s10  ;;  %s33_s16 = sadd.s32 1, %s6534_s11 }
   0x9   : > { %p31_p0 = scmp.ge.s32.totalorder %s30_s15, 2  ;;  %p238_p1 = scmp.ne.s32.totalorder %s6518_s29, %s6514_s28 }
   0xa   : > { %p239_p2 = scmp.eq.s32.totalorder %s4619_s13, 3  ;;  %p244_p5 = scmp.ne.s32.totalorder %s6514_s28, %s6510_s27 }
   0xb   : > { %s11121_s15 = smov (%p31_p0, %s30_s15), 0  ;;  %s11123_s16 = smov (!%p31_p0, %s33_s16), %s6534_s11 }
   0xc   : > { %10480 = sst [smem:[#allocation5_spill]] %s11121_s15  ;;  %s224_s17 = ssub.s32 %s6530_s10, %s11121_s15 }
   0xd   : > { %p6654_p3 = por %p239_p2, %p238_p1  ;;  %p35_p4 = scmp.ge.s32.totalorder %s11123_s16, 2 }
   0xe   : > { %p245_p6 = scmp.eq.s32.totalorder %s4620_s14, 3  ;;  %p4625_p7 = scmp.ge.s32.totalorder %s6538_s12, 1 }
   0xf   : > { %s11125_s16 = smov (%p35_p4, %s11123_s16), 0  ;;  %p319_p9 = scmp.lt.s32.totalorder %s6538_s12, 5 }
  0x10   : > { %10482 = sst [smem:[#allocation6_spill]] %s11125_s16  ;;  %p6663_p8 = por %p245_p6, %p244_p5 }
  0x11   : > { %s223_s20 = ssub.s32 %s6534_s11, %s11125_s16  ;;  %s228_s21 = sadd.s32 1, %s6518_s29 }
  0x12   : > { %s225_s22 = sor.u32 %s224_s17, %s223_s20  ;;  %p320_p10 = pnand %p4625_p7, %p319_p9 }
  0x13   : > { %p226_p11 = scmp.eq.s32.totalorder %s225_s22, 0 }
  0x14   : > { %323 = sbr.rel (%p320_p10) target bundleno = 1109 (0x455), region = 52 }
  0x15   : > { %s6672_s23 = scalar_select %p226_p11, %s6518_s29, %s228_s21  }
  0x1b   : > { %s6675_s24 = smul.u32 20, %s6522_s30  ;;  %p377_p12 = scmp.lt.s32.totalorder %s6526_s9, 1  ;;  %v576_v0 = vlaneseq  ;;  %vm10471_vm7 = vcmask 31744   ;;  %vm10472_vm8 = vcmask 64512   ;;  %vm2083_vm9 = vcmask 97280  }
  0x1c   : > { %s390_s25 = sadd.s32 1, %s6522_s30  ;;  %s10484_s0 = sld [smem:[#allocation192_spill]]  ;;  %vm2104_vm10 = vcmask 130048   ;;  %vm10478_vm11 = vcmask 162816   ;;  %vm2146_vm12 = vcmask 195584   ;;  %vm10470_vm13 = vcmask 1041408  }
  0x1d   : > { %s378_s26 = scalar_select %p377_p12, %s6526_s9, 1  ;;  %v6687_v1 = vshrl.u32 %v576_v0, 7  ;;  %vm2167_vm14 = vcmask 228352   ;;  %vm2188_vm15 = vcmask 261120  }
  0x1e   : > { %p379_p13 = scmp.lt.s32.totalorder %s6675_s24, 49  ;;  %s4628_s13 = smul.u32 20, %s390_s25 }
  0x1f   : > { %s5087_s14 = smul.u32 50, %s378_s26  ;;  %10485 = vst [vmem:[#allocation7_spill] sm:$0xff] %v6687_v1  ;;  %vm578_vm0 = vcmp.lt.s32.totalorder %v6687_v1, 7  ;;  %s10370_s25 = smov 4   ;;  %vm620_vm1 = vcmp.lt.s32.totalorder %v6687_v1, 6  ;;  %vm662_vm2 = vcmp.lt.s32.totalorder %v6687_v1, 5 }
  0x20   : > { %s380_s17 = scalar_select %p379_p13, %s6675_s24, 49  ;;  %vm704_vm3 = vcmp.lt.s32.totalorder %v6687_v1, 4  ;;  %vm792_vm4 = vcmp.lt.s32.totalorder %v6687_v1, 2  ;;  %vm10477_vm5 = vcmp.lt.s32.totalorder %v6687_v1, 3  ;;  %vm834_vm6 = vcmp.lt.s32.totalorder %v6687_v1, 1 }
  0x21   : > { %p395_p0 = scmp.lt.s32.totalorder %s4628_s13, 49  ;;  %s10411_s22 = smov 24  }
  0x22   : > { %s382_s20 = sadd.s32 %s5087_s14, %s380_s17  ;;  %s10430_s17 = smov 12  }
  0x23   : > { %s4626_s21 = sshll.u32 %s382_s20, 2  ;;  %s11127_s13 = smov (!%p395_p0, %s4628_s13), 49 }
  0x24   : > { %s6685_s15 = scalar_lea.vmem %s10484_s0, %s4626_s21  ;;  %s6703_s30 = sadd.s32 %s5087_s14, %s11127_s13 }
  0x25   : > { %v6378_v2 = vld [vmem:[%s6685_s15 + $0x10] sm:$0xff]   ;;  %v6379_v3 = vld [vmem:[%s6685_s15 + $0x18] sm:$0xff]   ;;  %v6380_v8 = vld [vmem:[%s6685_s15] sm:$0xff]   ;;  %s4629_s16 = sshll.u32 %s6703_s30, 2  ;;  %s10385_s20 = smov 16  }
  0x26   : > { %v6691_v4 = vunpack.c.h.bf16 %v6378_v2  ;;  %v6693_v5 = vunpack.c.l.bf16 %v6379_v3  ;;  %v6695_v6 = vunpack.c.h.bf16 %v6379_v3  ;;  %v6697_v7 = vunpack.c.l.bf16 %v6378_v2  ;;  %v6381_v9 = vld [vmem:[%s6685_s15 + $0x8] sm:$0xff]   ;;  %v6382_v10 = vld [vmem:[%s6685_s15 + $0x20] sm:$0xff]   ;;  %v6384_v24 = vld [vmem:[%s6685_s15 + $0x30] sm:$0xff]   ;;  %s6758_s14 = scalar_lea.vmem %s10157_s1, %s4629_s16  ;;  %s10398_s21 = smov 20  }
  0x27   : > { %v6709_v15 = vunpack.c.l.bf16 %v6380_v8  ;;  %v6711_v16 = vunpack.c.h.bf16 %v6380_v8  ;;  %v6713_v17 = vunpack.c.l.bf16 %v6381_v9  ;;  %v6715_v18 = vunpack.c.h.bf16 %v6381_v9  ;;  %v6383_v23 = vld [vmem:[%s6685_s15 + $0x28] sm:$0xff]   ;;  %v6385_v33 = vld [vmem:[%s6685_s15 + $0x38] sm:$0xff]   ;;  %v6386_v38 = vld [vmem:[%s6685_s15 + $0x40] sm:$0xff]   ;;  %s10372_s30 = smov 28   ;;  %s10458_s16 = smov 32  }
  0x28   : > { %10486 = vst [vmem:[#allocation8_spill] sm:$0xff] %v6691_v4  ;;  %10487 = vst [vmem:[#allocation9_spill] sm:$0xff] %v6693_v5  ;;  %v560_v11 = vrot.slane %v6691_v4, 1  ;;  %v561_v12 = vrot.slane %v6693_v5, 1  ;;  %v562_v13 = vrot.slane %v6695_v6, 1  ;;  %v559_v14 = vrot.slane %v6697_v7, 1 }
  0x29   : > { %10488 = vst [vmem:[#allocation10_spill] sm:$0xff] %v6695_v6  ;;  %10489 = vst [vmem:[#allocation11_spill] sm:$0xff] %v6709_v15  ;;  %v6727_v22 = vunpack.c.l.bf16 %v6382_v10  ;;  %v10168_v27 = vrot.slane %v6709_v15, 1  ;;  %v556_v28 = vrot.slane %v6711_v16, 1  ;;  %v557_v29 = vrot.slane %v6713_v17, 1  ;;  %v6387_v43 = vld [vmem:[%s6685_s15 + $0x48] sm:$0xff]  }
  0x2a   : > { %10490 = vst [vmem:[#allocation12_spill] sm:$0xff] %v6711_v16  ;;  %10491 = vst [vmem:[#allocation13_spill] sm:$0xff] %v6713_v17  ;;  %v6719_v19 = vsel %vm578_vm0, %v561_v12, %v562_v13  ;;  %v6723_v20 = vsel %vm578_vm0, %v560_v11, %v561_v12  ;;  %v594_v21 = vsel %vm578_vm0, %v559_v14, %v560_v11  ;;  %v558_v31 = vrot.slane %v6715_v18, 1  ;;  %v6781_v52 = vld [vmem:[%s6758_s14] sm:$0xff]   ;;  %s10422_s15 = smov 8   ;;  %s10437_s26 = smov 36  }
  0x2b   : > { %10492 = vst [vmem:[#allocation14_spill] sm:$0xff] %v6719_v19  ;;  %10493 = vst [vmem:[#allocation15_spill] sm:$0xff] %v6723_v20  ;;  %v5188_v26 = vpack.i.bf16 %v6723_v20, %v594_v21  ;;  %v563_v30 = vrot.slane %v6727_v22, 1  ;;  %v6740_v32 = vunpack.c.l.bf16 %v6383_v23  ;;  %v598_v34 = vsel %vm578_vm0, %v10168_v27, %v556_v28  ;;  %s10749_s13 = smov 28   ;;  %s10792_s0 = smov 64  }
  0x2c   : > { %10494 = vst [vmem:[#allocation16_spill] sm:$0xff] %v6727_v22  ;;  %v6748_v35 = vunpack.c.h.bf16 %v6383_v23  ;;  %v6750_v36 = vunpack.c.l.bf16 %v6384_v24  ;;  %v6752_v37 = vunpack.c.h.bf16 %v6382_v10  ;;  %v597_v39 = vsel %vm578_vm0, %v556_v28, %v557_v29 }
  0x2d   : > { %5189 = vrot.lane.b32.xlu1 %v5188_v26, %s10370_s25  ;;  %v6764_v40 = vsel %vm578_vm0, %v562_v13, %v563_v30  ;;  %v595_v41 = vsel %vm578_vm0, %v558_v31, %v559_v14  ;;  %v596_v42 = vsel %vm578_vm0, %v557_v29, %v558_v31  ;;  %v5178_v44 = vpack.i.bf16 %v597_v39, %v598_v34 }
  0x2e   : > { %10495 = vst [vmem:[#allocation17_spill] sm:$0xff] %v6750_v36  ;;  %10496 = vst [vmem:[#allocation18_spill] sm:$0xff] %v6752_v37  ;;  %v5193_v45 = vpack.i.bf16 %v6764_v40, %v6719_v19  ;;  %v5183_v46 = vpack.i.bf16 %v595_v41, %v596_v42  ;;  %v565_v47 = vrot.slane %v6740_v32, 1  ;;  %v566_v48 = vrot.slane %v6748_v35, 1 }
  0x2f   : > { %10497 = vst [vmem:[#allocation19_spill] sm:$0xff] %v6764_v40  ;;  %v567_v49 = vrot.slane %v6750_v36, 1  ;;  %v564_v50 = vrot.slane %v6752_v37, 1  ;;  %v6778_v51 = vunpack.c.l.bf16 %v6385_v33  ;;  %5179 = vrot.lane.b32.xlu0 %v5178_v44, %s10370_s25  ;;  %v6785_v53 = vunpack.c.h.bf16 %v6385_v33 }
  0x30   : > { %v6787_v54 = vunpack.c.l.bf16 %v6386_v38  ;;  %v6789_v55 = vunpack.c.h.bf16 %v6384_v24  ;;  %v6791_v56 = vunpack.c.l.bf16 %v6387_v43  ;;  %v6799_v58 = vsel %vm578_vm0, %v565_v47, %v566_v48 }
  0x31   : > { %10498 = vst [vmem:[#allocation20_spill] sm:$0xff] %v6778_v51  ;;  %5194 = vrot.lane.b32.xlu1 %v5193_v45, %s10370_s25  ;;  %10499 = vst [vmem:[#allocation21_spill] sm:$0xff] %v6785_v53  ;;  %v6795_v57 = vsel %vm578_vm0, %v566_v48, %v567_v49  ;;  %v6803_v59 = vsel %vm578_vm0, %v564_v50, %v565_v47  ;;  %v6807_v60 = vsel %vm578_vm0, %v563_v30, %v564_v50 }
  0x32   : > { %10500 = vst [vmem:[#allocation22_spill] sm:$0xff] %v6787_v54  ;;  %10501 = vst [vmem:[#allocation23_spill] sm:$0xff] %v6789_v55  ;;  %v6811_v61 = vpack.i.bf16 %v6795_v57, %v6799_v58  ;;  %v5198_v62 = vpack.i.bf16 %v6803_v59, %v6807_v60  ;;  %v569_v0 = vrot.slane %v6778_v51, 1  ;;  %v570_v2 = vrot.slane %v6785_v53, 1 }
  0x33   : > { %10502 = vst [vmem:[#allocation24_spill] sm:$0xff] %v6791_v56  ;;  %10503 = vst [vmem:[#allocation25_spill] sm:$0xff] %v6795_v57  ;;  %v571_v3 = vrot.slane %v6787_v54, 1  ;;  %v568_v8 = vrot.slane %v6789_v55, 1  ;;  %5184 = vrot.lane.b32.xlu0 %v5183_v46, %s10370_s25  ;;  %v6824_v9 = vunpack.c.h.bf16 %v6387_v43  ;;  %v6827_v10 = vunpack.c.l.bf16 %v6781_v52 }
  0x34   : > { %10504 = vst [vmem:[#allocation26_spill] sm:$0xff] %v6799_v58  ;;  %10505 = vst [vmem:[#allocation27_spill] sm:$0xff] %v6803_v59  ;;  %v573_v11 = vrot.slane %v6791_v56, 1  ;;  %v6830_v12 = vunpack.c.h.bf16 %v6386_v38  ;;  %v6838_v14 = vsel %vm578_vm0, %v569_v0, %v570_v2  ;;  %v601_v31 = vrot.slane %v6713_v17, 2 }
  0x35   : > { %10506 = vst [vmem:[#allocation28_spill] sm:$0xff] %v6807_v60  ;;  %5204 = vrot.lane.b32.xlu1 %v6811_v61, %s10370_s25  ;;  %10507 = vst [vmem:[#allocation29_spill] sm:$0xff] %v6824_v9  ;;  %v6834_v13 = vsel %vm578_vm0, %v570_v2, %v571_v3  ;;  %v6842_v21 = vsel %vm578_vm0, %v568_v8, %v569_v0  ;;  %v6846_v23 = vsel %vm578_vm0, %v567_v49, %v568_v8 }
  0x36   : > { %10508 = vst [vmem:[#allocation30_spill] sm:$0xff] %v6827_v10  ;;  %10509 = vst [vmem:[#allocation31_spill] sm:$0xff] %v6830_v12  ;;  %v6850_v24 = vpack.i.bf16 %v6834_v13, %v6838_v14  ;;  %v6854_v26 = vpack.i.bf16 %v6842_v21, %v6846_v23  ;;  %v574_v28 = vrot.slane %v6824_v9, 1  ;;  %v10169_v29 = vrot.slane %v6827_v10, 1 }
  0x37   : > { %10510 = vst [vmem:[#allocation32_spill] sm:$0xff] %v6834_v13  ;;  %10511 = vst [vmem:[#allocation33_spill] sm:$0xff] %v6838_v14  ;;  %v572_v30 = vrot.slane %v6830_v12, 1  ;;  %v602_v33 = vrot.slane %v6715_v18, 2  ;;  %v603_v34 = vrot.slane %v6697_v7, 2  ;;  %5199 = vrot.lane.b32.xlu0 %v5198_v62, %s10370_s25  ;;  %v10167_v41 = vrot.slane %v6709_v15, 2 }
  0x38   : > { %10512 = vst [vmem:[#allocation34_spill] sm:$0xff] %v6842_v21  ;;  %10513 = vst [vmem:[#allocation35_spill] sm:$0xff] %v6846_v23  ;;  %v6869_v38 = vsel %vm578_vm0, %v574_v28, %v10169_v29  ;;  %v6873_v39 = vsel %vm578_vm0, %v573_v11, %v574_v28  ;;  %v600_v42 = vrot.slane %v6711_v16, 2  ;;  %v605_v0 = vrot.slane %v6693_v5, 2 }
  0x39   : > { %10514 = vst [vmem:[#allocation36_spill] sm:$0xff] %v6850_v24  ;;  %5214 = vrot.lane.b32.xlu1 %v6850_v24, %s10370_s25  ;;  %10515 = vst [vmem:[#allocation37_spill] sm:$0xff] %v6869_v38  ;;  %v6879_v43 = vpack.i.bf16 %v6869_v38, %v6873_v39  ;;  %v6883_v44 = vsel %vm578_vm0, %v572_v30, %v573_v11  ;;  %v6887_v45 = vsel %vm578_vm0, %v571_v3, %v572_v30 }
  0x3a   : > { %10516 = vst [vmem:[#allocation38_spill] sm:$0xff] %v6873_v39  ;;  %10518 = vst [vmem:[#allocation40_spill] sm:$0xff] %v6883_v44  ;;  %v637_v46 = vsel %vm620_vm1, %v602_v33, %v603_v34  ;;  %v6893_v47 = vpack.i.bf16 %v6883_v44, %v6887_v45  ;;  %v638_v48 = vsel %vm620_vm1, %v601_v31, %v602_v33  ;;  %v606_v2 = vrot.slane %v6695_v6, 2 }
  0x3b   : > { %10517 = vst [vmem:[#allocation39_spill] sm:$0xff] %v6879_v43  ;;  %10519 = vst [vmem:[#allocation41_spill] sm:$0xff] %v6887_v45  ;;  %v639_v49 = vsel %vm620_vm1, %v600_v42, %v601_v31  ;;  %v5233_v50 = vpack.i.bf16 %v637_v46, %v638_v48  ;;  %v640_v62 = vsel %vm620_vm1, %v10167_v41, %v600_v42  ;;  %5209 = vrot.lane.b32.xlu0 %v6854_v26, %s10370_s25 }
  0x3c   : > { %10520 = vst [vmem:[#allocation42_spill] sm:$0xff] %v6893_v47  ;;  %v607_v3 = vrot.slane %v6727_v22, 2  ;;  %v604_v8 = vrot.slane %v6691_v4, 2  ;;  %v609_v11 = vrot.slane %v6740_v32, 2  ;;  %v610_v28 = vrot.slane %v6748_v35, 2 }
  0x3d   : > { %5229 = vrot.lane.b32.xlu1 %v6879_v43, %s10370_s25  ;;  %v6915_v30 = vsel %vm620_vm1, %v605_v0, %v606_v2  ;;  %v611_v31 = vrot.slane %v6750_v36, 2  ;;  %v608_v33 = vrot.slane %v6752_v37, 2  ;;  %v613_v42 = vrot.slane %v6778_v51, 2 }
  0x3e   : > { %10521 = vst [vmem:[#allocation43_spill] sm:$0xff] %v6915_v30  ;;  %v6922_v46 = vsel %vm620_vm1, %v606_v2, %v607_v3  ;;  %v5223_v48 = vpack.i.bf16 %v639_v49, %v640_v62  ;;  %v614_v27 = vrot.slane %v6785_v53, 2  ;;  %v615_v63 = vrot.slane %v6787_v54, 2 }
  0x3f   : > { %10522 = vst [vmem:[#allocation44_spill] sm:$0xff] %v6922_v46  ;;  %5219 = vrot.lane.b32.xlu0 %v6893_v47, %s10370_s25  ;;  %v5243_v41 = vpack.i.bf16 %v6922_v46, %v6915_v30  ;;  %v6933_v25 = vsel %vm620_vm1, %v604_v8, %v605_v0  ;;  %v636_v2 = vsel %vm620_vm1, %v603_v34, %v604_v8  ;;  %v612_v0 = vrot.slane %v6789_v55, 2 }
  0x40   : > { %10523 = vst [vmem:[#allocation45_spill] sm:$0xff] %v6933_v25  ;;  %v6939_v29 = vsel %vm620_vm1, %v610_v28, %v611_v31  ;;  %v6943_v49 = vsel %vm620_vm1, %v609_v11, %v610_v28  ;;  %v6951_v62 = vsel %vm620_vm1, %v607_v3, %v608_v33  ;;  %v6956_v34 = vsel %vm620_vm1, %v614_v27, %v615_v63 }
  0x41   : > { %5234 = vrot.lane.b32.xlu1 %v5233_v50, %s10422_s15  ;;  %10524 = vst [vmem:[#allocation46_spill] sm:$0xff] %v6939_v29  ;;  %10525 = vst [vmem:[#allocation47_spill] sm:$0xff] %v6943_v49  ;;  %v6947_v50 = vsel %vm620_vm1, %v608_v33, %v609_v11  ;;  %v6960_v8 = vsel %vm620_vm1, %v613_v42, %v614_v27  ;;  %v617_v28 = vrot.slane %v6791_v56, 2  ;;  %v618_v33 = vrot.slane %v6824_v9, 2 }
  0x42   : > { %10526 = vst [vmem:[#allocation48_spill] sm:$0xff] %v6947_v50  ;;  %10527 = vst [vmem:[#allocation49_spill] sm:$0xff] %v6951_v62  ;;  %v5238_v11 = vpack.i.bf16 %v6933_v25, %v636_v2  ;;  %v6968_v3 = vpack.i.bf16 %v6939_v29, %v6943_v49  ;;  %v5248_v27 = vpack.i.bf16 %v6947_v50, %v6951_v62  ;;  %v616_v39 = vrot.slane %v6830_v12, 2 }
  0x43   : > { %10528 = vst [vmem:[#allocation50_spill] sm:$0xff] %v6956_v34  ;;  %10529 = vst [vmem:[#allocation51_spill] sm:$0xff] %v6960_v8  ;;  %5224 = vrot.lane.b32.xlu0 %v5223_v48, %s10422_s15  ;;  %v6977_v48 = vpack.i.bf16 %v6956_v34, %v6960_v8  ;;  %v6985_v2 = vsel %vm620_vm1, %v611_v31, %v612_v0  ;;  %v643_v38 = vrot.slane %v6713_v17, 3  ;;  %v644_v44 = vrot.slane %v6715_v18, 3 }
  0x44   : > { %10532 = vst [vmem:[#allocation54_spill] sm:$0xff] %v6985_v2  ;;  %v647_v45 = vrot.slane %v6693_v5, 3  ;;  %v648_v13 = vrot.slane %v6695_v6, 3  ;;  %v645_v34 = vrot.slane %v6697_v7, 3  ;;  %v646_v8 = vrot.slane %v6691_v4, 3 }
  0x45   : > { %5244 = vrot.lane.b32.xlu1 %v5243_v41, %s10422_s15  ;;  %10530 = vst [vmem:[#allocation52_spill] sm:$0xff] %v6977_v48  ;;  %v6981_v41 = vsel %vm620_vm1, %v612_v0, %v613_v42  ;;  %v10533_v42 = vrot.slane %v6827_v10, 2  ;;  %v7003_v0 = vsel %vm620_vm1, %v617_v28, %v618_v33  ;;  %v649_v14 = vrot.slane %v6727_v22, 3 }
  0x46   : > { %10531 = vst [vmem:[#allocation53_spill] sm:$0xff] %v6981_v41  ;;  %10535 = vst [vmem:[#allocation56_spill] sm:$0xff] %v7003_v0  ;;  %v7014_v21 = vsel %vm662_vm2, %v647_v45, %v648_v13  ;;  %v652_v23 = vrot.slane %v6748_v35, 3  ;;  %v680_v57 = vsel %vm662_vm2, %v643_v38, %v644_v44  ;;  %v696_v40 = vrot.slane %v6789_v55, 4 }
  0x47   : > { %5239 = vrot.lane.b32.xlu0 %v5238_v11, %s10422_s15  ;;  %v6999_v31 = vsel %vm620_vm1, %v618_v33, %v10533_v42  ;;  %v7009_v11 = vpack.i.bf16 %v6981_v41, %v6985_v2  ;;  %10537 = vst [vmem:[#allocation58_spill] sm:$0xff] %v7014_v21  ;;  %v7018_v42 = vsel %vm662_vm2, %v646_v8, %v647_v45  ;;  %v651_v33 = vrot.slane %v6740_v32, 3 }
  0x48   : > { %10534 = vst [vmem:[#allocation55_spill] sm:$0xff] %v6999_v31  ;;  %10538 = vst [vmem:[#allocation59_spill] sm:$0xff] %v7018_v42  ;;  %v7023_v29 = vpack.i.bf16 %v6999_v31, %v7003_v0  ;;  %v7027_v41 = vsel %vm620_vm1, %v616_v39, %v617_v28  ;;  %v7037_v45 = vsel %vm620_vm1, %v615_v63, %v616_v39  ;;  %v642_v0 = vrot.slane %v6711_v16, 3 }
  0x49   : > { %5254 = vrot.lane.b32.xlu1 %v6968_v3, %s10422_s15  ;;  %10536 = vst [vmem:[#allocation57_spill] sm:$0xff] %v7009_v11  ;;  %10540 = vst [vmem:[#allocation61_spill] sm:$0xff] %v7027_v41  ;;  %v650_v28 = vrot.slane %v6752_v37, 3  ;;  %v679_v2 = vsel %vm662_vm2, %v644_v44, %v645_v34  ;;  %v7052_v63 = vsel %vm662_vm2, %v651_v33, %v652_v23  ;;  %v785_v30 = vrot.slane %v6787_v54, 6 }
  0x4a   : > { %10539 = vst [vmem:[#allocation60_spill] sm:$0xff] %v7023_v29  ;;  %10541 = vst [vmem:[#allocation62_spill] sm:$0xff] %v7037_v45  ;;  %v7064_v49 = vpack.i.bf16 %v7027_v41, %v7037_v45  ;;  %v786_v25 = vrot.slane %v6830_v12, 6  ;;  %v10578_v20 = vrot.slane %v6789_v55, 6  ;;  %v734_v24 = vrot.slane %v6695_v6, 5 }
  0x4b   : > { %5249 = vrot.lane.b32.xlu0 %v5248_v27, %s10422_s15  ;;  %v7048_v27 = vsel %vm662_vm2, %v648_v13, %v649_v14  ;;  %10543 = vst [vmem:[#allocation64_spill] sm:$0xff] %v7052_v63  ;;  %v7056_v39 = vsel %vm662_vm2, %v650_v28, %v651_v33  ;;  %v7060_v31 = vsel %vm662_vm2, %v649_v14, %v650_v28  ;;  %v10547_v28 = vrot.slane %v6709_v15, 3 }
  0x4c   : > { %10542 = vst [vmem:[#allocation63_spill] sm:$0xff] %v7048_v27  ;;  %10544 = vst [vmem:[#allocation65_spill] sm:$0xff] %v7056_v39  ;;  %v5283_v33 = vpack.i.bf16 %v679_v2, %v680_v57  ;;  %v681_v14 = vsel %vm662_vm2, %v642_v0, %v643_v38  ;;  %v653_v13 = vrot.slane %v6750_v36, 3  ;;  %v5293_v44 = vpack.i.bf16 %v7048_v27, %v7014_v21 }
  0x4d   : > { %5264 = vrot.lane.b32.xlu1 %v6977_v48, %s10422_s15  ;;  %10545 = vst [vmem:[#allocation66_spill] sm:$0xff] %v7060_v31  ;;  %10546 = vst [vmem:[#allocation67_spill] sm:$0xff] %v7064_v49  ;;  %v682_v41 = vsel %vm662_vm2, %v10547_v28, %v642_v0  ;;  %v678_v57 = vsel %vm662_vm2, %v645_v34, %v646_v8  ;;  %v655_v38 = vrot.slane %v6778_v51, 3  ;;  %v656_v2 = vrot.slane %v6785_v53, 3 }
  0x4e   : > { %v5278_v45 = vpack.i.bf16 %v681_v14, %v682_v41  ;;  %v657_v0 = vrot.slane %v6787_v54, 3  ;;  %v7093_v41 = vsel %vm662_vm2, %v652_v23, %v653_v13  ;;  %v5288_v14 = vpack.i.bf16 %v7018_v42, %v678_v57 }
  0x4f   : > { %5259 = vrot.lane.b32.xlu0 %v7009_v11, %s10422_s15  ;;  %10548 = vst [vmem:[#allocation68_spill] sm:$0xff] %v7093_v41  ;;  %v7108_v8 = vsel %vm662_vm2, %v655_v38, %v656_v2  ;;  %v654_v23 = vrot.slane %v6789_v55, 3  ;;  %v659_v28 = vrot.slane %v6791_v56, 3  ;;  %v5298_v57 = vpack.i.bf16 %v7056_v39, %v7060_v31 }
  0x50   : > { %v7104_v34 = vsel %vm662_vm2, %v656_v2, %v657_v0  ;;  %10550 = vst [vmem:[#allocation70_spill] sm:$0xff] %v7108_v8  ;;  %v686_v39 = vrot.slane %v6715_v18, 4  ;;  %v783_v21 = vrot.slane %v6778_v51, 6  ;;  %v737_v48 = vrot.slane %v6740_v32, 5 }
  0x51   : > { %5274 = vrot.lane.b32.xlu1 %v7023_v29, %s10422_s15  ;;  %10549 = vst [vmem:[#allocation69_spill] sm:$0xff] %v7104_v34  ;;  %v7126_v2 = vsel %vm662_vm2, %v654_v23, %v655_v38  ;;  %v685_v38 = vrot.slane %v6713_v17, 4  ;;  %v744_v11 = vrot.slane %v6830_v12, 5 }
  0x52   : > { %10552 = vst [vmem:[#allocation72_spill] sm:$0xff] %v7126_v2  ;;  %v7322_v19 = vsel %vm792_vm4, %v10578_v20, %v783_v21 }
  0x53   : > { %5269 = vrot.lane.b32.xlu0 %v7064_v49, %s10422_s15  ;;  %v722_v58 = vsel %vm704_vm3, %v685_v38, %v686_v39 }
  0x55   : > { %5284 = vrot.lane.b32.xlu1 %v5283_v33, %s10430_s17  ;;  %v7100_v33 = vpack.i.bf16 %v7093_v41, %v7052_v63  ;;  %v7118_v41 = vpack.i.bf16 %v7104_v34, %v7108_v8  ;;  %v658_v63 = vrot.slane %v6830_v12, 3  ;;  %v687_v34 = vrot.slane %v6697_v7, 4 }
  0x56   : > { %v10554_v8 = vrot.slane %v6827_v10, 3 }
  0x57   : > { %5279 = vrot.lane.b32.xlu0 %v5278_v45, %s10430_s17  ;;  %v660_v45 = vrot.slane %v6824_v9, 3  ;;  %10551 = vst [vmem:[#allocation71_spill] sm:$0xff] %v7118_v41 }
  0x59   : > { %5294 = vrot.lane.b32.xlu1 %v5293_v44, %s10430_s17  ;;  %v7130_v44 = vsel %vm662_vm2, %v653_v13, %v654_v23  ;;  %v7142_v50 = vsel %vm662_vm2, %v659_v28, %v660_v45  ;;  %v7152_v23 = vsel %vm662_vm2, %v658_v63, %v659_v28  ;;  %v721_v28 = vsel %vm704_vm3, %v686_v39, %v687_v34 }
  0x5a   : > { %10553 = vst [vmem:[#allocation73_spill] sm:$0xff] %v7130_v44  ;;  %10556 = vst [vmem:[#allocation75_spill] sm:$0xff] %v7142_v50  ;;  %v7148_v13 = vpack.i.bf16 %v7126_v2, %v7130_v44  ;;  %v7165_v2 = vsel %vm662_vm2, %v657_v0, %v658_v63  ;;  %v689_v44 = vrot.slane %v6693_v5, 4  ;;  %v10562_v0 = vrot.slane %v6709_v15, 4 }
  0x5b   : > { %5289 = vrot.lane.b32.xlu0 %v5288_v14, %s10430_s17  ;;  %v7138_v14 = vsel %vm662_vm2, %v660_v45, %v10554_v8  ;;  %10558 = vst [vmem:[#allocation77_spill] sm:$0xff] %v7152_v23  ;;  %v684_v8 = vrot.slane %v6711_v16, 4  ;;  %10560 = vst [vmem:[#allocation79_spill] sm:$0xff] %v7165_v2  ;;  %v691_v16 = vrot.slane %v6727_v22, 4  ;;  %v688_v39 = vrot.slane %v6691_v4, 4 }
  0x5c   : > { %10555 = vst [vmem:[#allocation74_spill] sm:$0xff] %v7138_v14  ;;  %10557 = vst [vmem:[#allocation76_spill] sm:$0xff] %v7148_v13  ;;  %v7161_v45 = vpack.i.bf16 %v7138_v14, %v7142_v50  ;;  %v7176_v14 = vpack.i.bf16 %v7152_v23, %v7165_v2  ;;  %v7189_v59 = vpack.i.bf16 %v721_v28, %v722_v58  ;;  %v693_v23 = vrot.slane %v6740_v32, 4 }
  0x5d   : > { %5304 = vrot.lane.b32.xlu1 %v7100_v33, %s10430_s17  ;;  %v723_v63 = vsel %vm704_vm3, %v684_v8, %v685_v38  ;;  %v724_v50 = vsel %vm704_vm3, %v10562_v0, %v684_v8  ;;  %v694_v2 = vrot.slane %v6748_v35, 4  ;;  %v695_v38 = vrot.slane %v6750_v36, 4 }
  0x5e   : > { %10559 = vst [vmem:[#allocation78_spill] sm:$0xff] %v7161_v45  ;;  %10561 = vst [vmem:[#allocation80_spill] sm:$0xff] %v7176_v14  ;;  %v5328_v0 = vpack.i.bf16 %v723_v63, %v724_v50  ;;  %v7204_v27 = vsel %vm704_vm3, %v688_v39, %v689_v44  ;;  %v720_v58 = vsel %vm704_vm3, %v687_v34, %v688_v39  ;;  %v692_v34 = vrot.slane %v6752_v37, 4 }
  0x5f   : > { %5299 = vrot.lane.b32.xlu0 %v5298_v57, %s10430_s17  ;;  %v690_v57 = vrot.slane %v6695_v6, 4  ;;  %10565 = vst [vmem:[#allocation83_spill] sm:$0xff] %v7204_v27  ;;  %v7218_v50 = vsel %vm704_vm3, %v694_v2, %v695_v38  ;;  %v698_v63 = vrot.slane %v6785_v53, 4  ;;  %v699_v39 = vrot.slane %v6787_v54, 4 }
  0x60   : > { %v5338_v31 = vpack.i.bf16 %v7204_v27, %v720_v58  ;;  %v7242_v46 = vsel %vm704_vm3, %v691_v16, %v692_v34  ;;  %v701_v58 = vrot.slane %v6791_v56, 4  ;;  %v10571_v27 = vrot.slane %v6827_v10, 4 }
  0x61   : > { %5314 = vrot.lane.b32.xlu1 %v7118_v41, %s10430_s17  ;;  %v7196_v15 = vsel %vm704_vm3, %v690_v57, %v691_v16  ;;  %v7200_v8 = vsel %vm704_vm3, %v689_v44, %v690_v57  ;;  %v7222_v44 = vsel %vm704_vm3, %v693_v23, %v694_v2  ;;  %v697_v57 = vrot.slane %v6778_v51, 4  ;;  %10567 = vst [vmem:[#allocation85_spill] sm:$0xff] %v7242_v46 }
  0x62   : > { %10563 = vst [vmem:[#allocation81_spill] sm:$0xff] %v7196_v15  ;;  %10564 = vst [vmem:[#allocation82_spill] sm:$0xff] %v7200_v8  ;;  %v7214_v28 = vpack.i.bf16 %v7196_v15, %v7200_v8  ;;  %v7231_v62 = vpack.i.bf16 %v7218_v50, %v7222_v44  ;;  %v7238_v2 = vsel %vm704_vm3, %v692_v34, %v693_v23  ;;  %v702_v15 = vrot.slane %v6824_v9, 4 }
  0x63   : > { %5309 = vrot.lane.b32.xlu0 %v7148_v13, %s10430_s17  ;;  %10566 = vst [vmem:[#allocation84_spill] sm:$0xff] %v7238_v2  ;;  %v7248_v60 = vsel %vm704_vm3, %v698_v63, %v699_v39  ;;  %v5348_v16 = vpack.i.bf16 %v7238_v2, %v7242_v46  ;;  %v7268_v8 = vsel %vm704_vm3, %v696_v40, %v697_v57  ;;  %v829_v41 = vrot.slane %v6791_v56, 7 }
  0x64   : > { %10568 = vst [vmem:[#allocation86_spill] sm:$0xff] %v7248_v60  ;;  %10570 = vst [vmem:[#allocation88_spill] sm:$0xff] %v7268_v8  ;;  %v7272_v23 = vsel %vm704_vm3, %v695_v38, %v696_v40  ;;  %v7278_v42 = vsel %vm704_vm3, %v702_v15, %v10571_v27  ;;  %v7282_v2 = vsel %vm704_vm3, %v701_v58, %v702_v15  ;;  %v6389_v38 = vld [vmem:[%s6758_s14 + $0x8] sm:$0xff]   ;;  %v745_v13 = vrot.slane %v6791_v56, 5 }
  0x65   : > { %5324 = vrot.lane.b32.xlu1 %v7161_v45, %s10430_s17  ;;  %10572 = vst [vmem:[#allocation89_spill] sm:$0xff] %v7278_v42  ;;  %10573 = vst [vmem:[#allocation90_spill] sm:$0xff] %v7282_v2  ;;  %v7291_v40 = vpack.i.bf16 %v7278_v42, %v7282_v2  ;;  %v7315_v46 = vunpack.c.l.bf16 %v6389_v38  ;;  %v7326_v42 = vsel %vm792_vm4, %v785_v30, %v786_v25  ;;  %v787_v45 = vrot.slane %v6791_v56, 6 }
  0x66   : > { %v7343_v2 = vunpack.c.h.bf16 %v6389_v38 }
  0x67   : > { %5319 = vrot.lane.b32.xlu0 %v7176_v14, %s10430_s17  ;;  %10577 = vst [vmem:[#allocation94_spill] sm:$0xff] %v7315_v46  ;;  %v7352_v20 = vsel %vm792_vm4, %v786_v25, %v787_v45  ;;  %v10253_v47 = vrot.slane %v7315_v46, 4 }
  0x68   : > { %10579 = vst [vmem:[#allocation95_spill] sm:$0xff] %v7343_v2  ;;  %v10249_v43 = vrot.slane %v7343_v2, 6  ;;  %v735_v2 = vrot.slane %v6727_v22, 5 }
  0x69   : > { %5334 = vrot.lane.b32.xlu1 %v7189_v59, %s10385_s20 }
  0x6b   : > { %5329 = vrot.lane.b32.xlu0 %v5328_v0, %s10385_s20  ;;  %v7252_v0 = vsel %vm704_vm3, %v697_v57, %v698_v63  ;;  %v700_v63 = vrot.slane %v6830_v12, 4  ;;  %v5358_v57 = vpack.i.bf16 %v7268_v8, %v7272_v23  ;;  %v741_v8 = vrot.slane %v6778_v51, 5 }
  0x6c   : > { %10569 = vst [vmem:[#allocation87_spill] sm:$0xff] %v7252_v0  ;;  %v7263_v34 = vpack.i.bf16 %v7248_v60, %v7252_v0  ;;  %v736_v60 = vrot.slane %v6752_v37, 5  ;;  %v10265_v0 = vrot.slane %v6824_v9, 7 }
  0x6d   : > { %5344 = vrot.lane.b32.xlu1 %v7214_v28, %s10385_s20  ;;  %v7295_v27 = vsel %vm704_vm3, %v700_v63, %v701_v58  ;;  %v7299_v15 = vsel %vm704_vm3, %v699_v39, %v700_v63  ;;  %v784_v39 = vrot.slane %v6785_v53, 6  ;;  %v7313_v63 = vunpack.c.h.bf16 %v6781_v52 }
  0x6e   : > { %10574 = vst [vmem:[#allocation91_spill] sm:$0xff] %v7295_v27  ;;  %10575 = vst [vmem:[#allocation92_spill] sm:$0xff] %v7299_v15  ;;  %v5368_v58 = vpack.i.bf16 %v7295_v27, %v7299_v15  ;;  %v788_v27 = vrot.slane %v6824_v9, 6 }
  0x6f   : > { %5339 = vrot.lane.b32.xlu0 %v5338_v31, %s10385_s20  ;;  %10576 = vst [vmem:[#allocation93_spill] sm:$0xff] %v7313_v63  ;;  %v7330_v29 = vsel %vm792_vm4, %v784_v39, %v785_v30  ;;  %v7334_v52 = vsel %vm792_vm4, %v783_v21, %v784_v39  ;;  %v790_v30 = vrot.slane %v7313_v63, 6  ;;  %v791_v21 = vrot.slane %v7315_v46, 6 }
  0x70   : > { %v789_v39 = vrot.slane %v6827_v10, 6 }
  0x71   : > { %5354 = vrot.lane.b32.xlu1 %v7231_v62, %s10385_s20  ;;  %v7356_v49 = vsel %vm792_vm4, %v790_v30, %v791_v21  ;;  %v7373_v25 = vsel %vm792_vm4, %v791_v21, %v10249_v43  ;;  %v732_v21 = vrot.slane %v6691_v4, 5  ;;  %v733_v43 = vrot.slane %v6693_v5, 5 }
  0x72   : > { %v7364_v38 = vsel %vm792_vm4, %v788_v27, %v789_v39  ;;  %10580 = vst [vmem:[#allocation96_spill] sm:$0xff] %v7373_v25 }
  0x73   : > { %5349 = vrot.lane.b32.xlu0 %v5348_v16, %s10385_s20  ;;  %v767_v25 = vsel %vm10477_vm5, %v732_v21, %v733_v43 }
  0x75   : > { %5364 = vrot.lane.b32.xlu1 %v7263_v34, %s10385_s20 }
  0x77   : > { %5359 = vrot.lane.b32.xlu0 %v5358_v57, %s10385_s20 }
  0x79   : > { %5374 = vrot.lane.b32.xlu1 %v7291_v40, %s10385_s20 }
  0x7b   : > { %5369 = vrot.lane.b32.xlu0 %v5368_v58, %s10385_s20 }
  0x7d   : > { %5384 = vrot.lane.b32.xlu1 %v5338_v31, %s10398_s21  ;;  %v7360_v31 = vsel %vm792_vm4, %v789_v39, %v790_v30  ;;  %v7379_v30 = vsel %vm792_vm4, %v787_v45, %v788_v27  ;;  %v725_v39 = vrot.slane %v7313_v63, 4  ;;  %v731_v45 = vrot.slane %v6697_v7, 5 }
  0x7f   : > { %5379 = vrot.lane.b32.xlu0 %v7189_v59, %s10398_s21  ;;  %v7398_v27 = vsel %vm704_vm3, %v725_v39, %v10253_v47  ;;  %v10582_v59 = vrot.slane %v6827_v10, 4  ;;  %v828_v47 = vrot.slane %v6830_v12, 7 }
  0x80   : > { %10581 = vst [vmem:[#allocation97_spill] sm:$0xff] %v7398_v27 }
  0x81   : > { %5394 = vrot.lane.b32.xlu1 %v5348_v16, %s10398_s21  ;;  %v7404_v14 = vsel %vm704_vm3, %v10582_v59, %v725_v39  ;;  %v827_v16 = vrot.slane %v6787_v54, 7  ;;  %v768_v59 = vsel %vm10477_vm5, %v731_v45, %v732_v21  ;;  %v740_v21 = vrot.slane %v6789_v55, 5 }
  0x82   : > { %10583 = vst [vmem:[#allocation98_spill] sm:$0xff] %v7404_v14  ;;  %v5423_v39 = vpack.i.bf16 %v7398_v27, %v7404_v14 }
  0x83   : > { %5389 = vrot.lane.b32.xlu0 %v7214_v28, %s10398_s21  ;;  %v729_v28 = vrot.slane %v6713_v17, 5  ;;  %v7427_v15 = vsel %vm834_vm6, %v827_v16, %v828_v47 }
  0x85   : > { %5404 = vrot.lane.b32.xlu1 %v5358_v57, %s10398_s21  ;;  %v730_v57 = vrot.slane %v6715_v18, 5 }
  0x87   : > { %5399 = vrot.lane.b32.xlu0 %v7231_v62, %s10398_s21  ;;  %v10584_v62 = vrot.slane %v6785_v53, 7  ;;  %v769_v27 = vsel %vm10477_vm5, %v730_v57, %v731_v45  ;;  %v770_v14 = vsel %vm10477_vm5, %v729_v28, %v730_v57  ;;  %v7451_v45 = vsel %vm10477_vm5, %v736_v60, %v737_v48 }
  0x88   : > { %10585 = vst [vmem:[#allocation99_spill] sm:$0xff] %v7451_v45  ;;  %v7455_v28 = vsel %vm10477_vm5, %v735_v2, %v736_v60  ;;  %v5428_v57 = vpack.i.bf16 %v769_v27, %v770_v14  ;;  %v7472_v60 = vsel %vm10477_vm5, %v734_v24, %v735_v2  ;;  %v7485_v14 = vsel %vm10477_vm5, %v740_v21, %v741_v8 }
  0x89   : > { %5414 = vrot.lane.b32.xlu1 %v5368_v58, %s10398_s21  ;;  %v7433_v58 = vsel %vm834_vm6, %v10584_v62, %v827_v16  ;;  %v5433_v16 = vpack.i.bf16 %v767_v25, %v768_v59  ;;  %v739_v62 = vrot.slane %v6750_v36, 5  ;;  %10586 = vst [vmem:[#allocation100_spill] sm:$0xff] %v7455_v28  ;;  %v7465_v25 = vsel %vm834_vm6, %v829_v41, %v10265_v0 }
  0x8a   : > { %10587 = vst [vmem:[#allocation101_spill] sm:$0xff] %v7472_v60  ;;  %10588 = vst [vmem:[#allocation102_spill] sm:$0xff] %v7485_v14  ;;  %v7505_v0 = vsel %vm10477_vm5, %v744_v11, %v745_v13  ;;  %v748_v59 = vrot.slane %v7313_v63, 5 }
  0x8b   : > { %5409 = vrot.lane.b32.xlu0 %v7263_v34, %s10398_s21  ;;  %v7459_v34 = vsel %vm834_vm6, %v828_v47, %v829_v41  ;;  %v766_v47 = vsel %vm10477_vm5, %v733_v43, %v734_v24  ;;  %v5443_v41 = vpack.i.bf16 %v7451_v45, %v7455_v28  ;;  %v7489_v24 = vsel %vm10477_vm5, %v739_v62, %v740_v21 }
  0x8c   : > { %10589 = vst [vmem:[#allocation103_spill] sm:$0xff] %v7489_v24  ;;  %v743_v43 = vrot.slane %v6787_v54, 5  ;;  %v5438_v2 = vpack.i.bf16 %v7472_v60, %v766_v47  ;;  %v5453_v27 = vpack.i.bf16 %v7485_v14, %v7489_v24  ;;  %10592 = vst [vmem:[#allocation106_spill] sm:$0xff] %v7505_v0  ;;  %v742_v21 = vrot.slane %v6785_v53, 5 }
  0x8d   : > { %5424 = vrot.lane.b32.xlu1 %v5423_v39, %s10398_s21  ;;  %v738_v39 = vrot.slane %v6748_v35, 5  ;;  %v747_v47 = vrot.slane %v6827_v10, 5  ;;  %v776_v45 = vrot.slane %v6695_v6, 6 }
  0x8f   : > { %5419 = vrot.lane.b32.xlu0 %v7291_v40, %s10398_s21  ;;  %v7495_v40 = vsel %vm10477_vm5, %v738_v39, %v739_v62  ;;  %v7512_v62 = vsel %vm10477_vm5, %v743_v43, %v744_v11  ;;  %v7527_v11 = vsel %vm10477_vm5, %v741_v8, %v742_v21  ;;  %v774_v8 = vrot.slane %v6691_v4, 6 }
  0x90   : > { %10590 = vst [vmem:[#allocation104_spill] sm:$0xff] %v7495_v40  ;;  %10593 = vst [vmem:[#allocation107_spill] sm:$0xff] %v7512_v62  ;;  %v5463_v14 = vpack.i.bf16 %v7505_v0, %v7512_v62  ;;  %v773_v0 = vrot.slane %v6697_v7, 6 }
  0x91   : > { %5434 = vrot.lane.b32.xlu1 %v5433_v16, %s10411_s22  ;;  %v7501_v16 = vsel %vm10477_vm5, %v737_v48, %v738_v39  ;;  %v10269_v48 = vrot.slane %v7315_v46, 5  ;;  %10595 = vst [vmem:[#allocation109_spill] sm:$0xff] %v7527_v11 }
  0x92   : > { %10591 = vst [vmem:[#allocation105_spill] sm:$0xff] %v7501_v16  ;;  %v5448_v39 = vpack.i.bf16 %v7495_v40, %v7501_v16  ;;  %v810_v62 = vsel %vm792_vm4, %v773_v0, %v774_v8 }
  0x93   : > { %5429 = vrot.lane.b32.xlu0 %v5428_v57, %s10411_s22  ;;  %v7523_v57 = vsel %vm10477_vm5, %v742_v21, %v743_v43  ;;  %v7536_v40 = vsel %vm10477_vm5, %v748_v59, %v10269_v48  ;;  %v7540_v43 = vsel %vm10477_vm5, %v747_v47, %v748_v59  ;;  %v775_v21 = vrot.slane %v6693_v5, 6 }
  0x94   : > { %10594 = vst [vmem:[#allocation108_spill] sm:$0xff] %v7523_v57  ;;  %10596 = vst [vmem:[#allocation110_spill] sm:$0xff] %v7536_v40 }
  0x95   : > { %5444 = vrot.lane.b32.xlu1 %v5443_v41, %s10411_s22  ;;  %v746_v41 = vrot.slane %v6824_v9, 5  ;;  %10597 = vst [vmem:[#allocation111_spill] sm:$0xff] %v7540_v43 }
  0x97   : > { %5439 = vrot.lane.b32.xlu0 %v5438_v2, %s10411_s22  ;;  %v5458_v2 = vpack.i.bf16 %v7523_v57, %v7527_v11  ;;  %v7551_v48 = vsel %vm10477_vm5, %v746_v41, %v747_v47  ;;  %v7557_v59 = vsel %vm10477_vm5, %v745_v13, %v746_v41  ;;  %v771_v57 = vrot.slane %v6713_v17, 6 }
  0x98   : > { %10598 = vst [vmem:[#allocation112_spill] sm:$0xff] %v7551_v48  ;;  %10599 = vst [vmem:[#allocation113_spill] sm:$0xff] %v7557_v59  ;;  %v772_v11 = vrot.slane %v6715_v18, 6  ;;  %v777_v47 = vrot.slane %v6727_v22, 6  ;;  %v5468_v13 = vpack.i.bf16 %v7551_v48, %v7557_v59  ;;  %v10603_v59 = vrot.slane %v6789_v55, 6 }
  0x99   : > { %5454 = vrot.lane.b32.xlu1 %v5453_v27, %s10411_s22  ;;  %v5473_v27 = vpack.i.bf16 %v7536_v40, %v7540_v43  ;;  %v809_v40 = vsel %vm792_vm4, %v774_v8, %v775_v21 }
  0x9a   : > { %v5483_v41 = vpack.i.bf16 %v809_v40, %v810_v62  ;;  %v811_v24 = vsel %vm792_vm4, %v772_v11, %v773_v0  ;;  %v812_v8 = vsel %vm792_vm4, %v771_v57, %v772_v11  ;;  %v7598_v57 = vsel %vm792_vm4, %v776_v45, %v777_v47 }
  0x9b   : > { %5449 = vrot.lane.b32.xlu0 %v5448_v39, %s10411_s22  ;;  %v778_v39 = vrot.slane %v6752_v37, 6  ;;  %v5478_v0 = vpack.i.bf16 %v811_v24, %v812_v8  ;;  %v808_v11 = vsel %vm792_vm4, %v775_v21, %v776_v45 }
  0x9c   : > { %v5488_v8 = vpack.i.bf16 %v7598_v57, %v808_v11  ;;  %v816_v11 = vrot.slane %v6691_v4, 7 }
  0x9d   : > { %5464 = vrot.lane.b32.xlu1 %v5463_v14, %s10411_s22  ;;  %v779_v14 = vrot.slane %v6740_v32, 6  ;;  %v7585_v48 = vsel %vm792_vm4, %v777_v47, %v778_v39 }
  0x9f   : > { %v7568_v43 = vpop.permute.xlu1 %5189  ;;  %5459 = vrot.lane.b32.xlu0 %v5458_v2, %s10411_s22  ;;  %v7581_v16 = vsel %vm792_vm4, %v778_v39, %v779_v14  ;;  %v781_v2 = vrot.slane %v6750_v36, 6  ;;  %v780_v39 = vrot.slane %v6748_v35, 6 }
  0xa0   : > { %10600 = vst [vmem:[#allocation114_spill] sm:$0xff] %v7568_v43  ;;  %v5493_v62 = vpack.i.bf16 %v7581_v16, %v7585_v48  ;;  %v821_v43 = vrot.slane %v6740_v32, 7 }
  0xa1   : > { %5474 = vrot.lane.b32.xlu1 %v5473_v27, %s10411_s22  ;;  %v7588_v27 = vpop.permute.xlu0 %5179  ;;  %v7607_v24 = vsel %vm792_vm4, %v781_v2, %v10603_v59  ;;  %v7620_v21 = vsel %vm792_vm4, %v780_v39, %v781_v2  ;;  %v7624_v59 = vsel %vm792_vm4, %v779_v14, %v780_v39  ;;  %v815_v2 = vrot.slane %v6697_v7, 7 }
  0xa2   : > { %10601 = vst [vmem:[#allocation115_spill] sm:$0xff] %v7588_v27  ;;  %v5503_v45 = vpack.i.bf16 %v7322_v19, %v7607_v24  ;;  %v817_v14 = vrot.slane %v6693_v5, 7  ;;  %v820_v27 = vrot.slane %v6752_v37, 7  ;;  %v818_v5 = vrot.slane %v6695_v6, 7 }
  0xa3   : > { %v7590_v40 = vpop.permute.xlu1 %5194  ;;  %5469 = vrot.lane.b32.xlu0 %v5468_v13, %s10411_s22 }
  0xa4   : > { %10602 = vst [vmem:[#allocation116_spill] sm:$0xff] %v7590_v40  ;;  %v819_v40 = vrot.slane %v6727_v22, 7 }
  0xa5   : > { %5484 = vrot.lane.b32.xlu1 %v5483_v41, %s10372_s30  ;;  %v7609_v13 = vpop.permute.xlu0 %5184 }
  0xa6   : > { %10604 = vst [vmem:[#allocation117_spill] sm:$0xff] %v7609_v13  ;;  %v852_v13 = vsel %vm834_vm6, %v815_v2, %v816_v11  ;;  %v849_v6 = vsel %vm834_vm6, %v818_v5, %v819_v40 }
  0xa7   : > { %v7611_v41 = vpop.permute.xlu1 %5204  ;;  %5479 = vrot.lane.b32.xlu0 %v5478_v0, %s10372_s30  ;;  %v5498_v0 = vpack.i.bf16 %v7620_v21, %v7624_v59 }
  0xa8   : > { %10605 = vst [vmem:[#allocation118_spill] sm:$0xff] %v7611_v41 }
  0xa9   : > { %5494 = vrot.lane.b32.xlu1 %v5493_v62, %s10372_s30  ;;  %v7626_v47 = vpop.permute.xlu0 %5199  ;;  %v5513_v62 = vpack.i.bf16 %v7352_v20, %v7326_v42 }
  0xaa   : > { %10606 = vst [vmem:[#allocation119_spill] sm:$0xff] %v7626_v47 }
  0xab   : > { %v7628_v41 = vpop.permute.xlu1 %5214  ;;  %5489 = vrot.lane.b32.xlu0 %v5488_v8, %s10372_s30  ;;  %v5523_v8 = vpack.i.bf16 %v7356_v49, %v7360_v31 }
  0xac   : > { %10607 = vst [vmem:[#allocation120_spill] sm:$0xff] %v7628_v41  ;;  %v5508_v41 = vpack.i.bf16 %v7330_v29, %v7334_v52 }
  0xad   : > { %5504 = vrot.lane.b32.xlu1 %v5503_v45, %s10372_s30  ;;  %v7639_v39 = vpop.permute.xlu0 %5209  ;;  %v851_v45 = vsel %vm834_vm6, %v816_v11, %v817_v14 }
  0xae   : > { %10608 = vst [vmem:[#allocation121_spill] sm:$0xff] %v7639_v39  ;;  %v813_v39 = vrot.slane %v6713_v17, 7  ;;  %v5533_v28 = vpack.i.bf16 %v851_v45, %v852_v13  ;;  %v848_v13 = vsel %vm834_vm6, %v819_v40, %v820_v27 }
  0xaf   : > { %v7641_v47 = vpop.permute.xlu1 %5229  ;;  %5499 = vrot.lane.b32.xlu0 %v5498_v0, %s10372_s30 }
  0xb0   : > { %10609 = vst [vmem:[#allocation122_spill] sm:$0xff] %v7641_v47  ;;  %v814_v47 = vrot.slane %v6715_v18, 7 }
  0xb1   : > { %5514 = vrot.lane.b32.xlu1 %v5513_v62, %s10372_s30  ;;  %v7658_v60 = vpop.permute.xlu0 %5219  ;;  %v5518_v62 = vpack.i.bf16 %v7364_v38, %v7379_v30 }
  0xb2   : > { %10610 = vst [vmem:[#allocation123_spill] sm:$0xff] %v7658_v60  ;;  %v853_v11 = vsel %vm834_vm6, %v814_v47, %v815_v2  ;;  %v854_v17 = vsel %vm834_vm6, %v813_v39, %v814_v47  ;;  %v823_v60 = vrot.slane %v6750_v36, 7 }
  0xb3   : > { %v7660_v0 = vpop.permute.xlu1 %5234  ;;  %5509 = vrot.lane.b32.xlu0 %v5508_v41, %s10372_s30  ;;  %v824_v41 = vrot.slane %v6789_v55, 7  ;;  %v5528_v47 = vpack.i.bf16 %v853_v11, %v854_v17 }
  0xb4   : > { %10611 = vst [vmem:[#allocation124_spill] sm:$0xff] %v7660_v0  ;;  %v7674_v0 = vsel %vm834_vm6, %v820_v27, %v821_v43  ;;  %v850_v27 = vsel %vm834_vm6, %v817_v14, %v818_v5 }
  0xb5   : > { %5524 = vrot.lane.b32.xlu1 %v5523_v8, %s10372_s30  ;;  %v825_v8 = vrot.slane %v6778_v51, 7  ;;  %v7680_v45 = vpop.permute.xlu0 %5224  ;;  %v5543_v39 = vpack.i.bf16 %v7674_v0, %v848_v13  ;;  %v5538_v40 = vpack.i.bf16 %v849_v6, %v850_v27  ;;  %v10617_v27 = vrot.slane %v6785_v53, 7 }
  0xb7   : > { %v7682_v2 = vpop.permute.xlu1 %5244  ;;  %5519 = vrot.lane.b32.xlu0 %v5518_v62, %s10372_s30  ;;  %v7693_v4 = vsel %vm834_vm6, %v824_v41, %v825_v8  ;;  %v822_v62 = vrot.slane %v6748_v35, 7 }
  0xb8   : > { %10612 = vst [vmem:[#allocation125_spill] sm:$0xff] %v7682_v2  ;;  %v7697_v2 = vsel %vm834_vm6, %v823_v60, %v824_v41 }
  0xb9   : > { %5534 = vrot.lane.b32.xlu1 %v5533_v28, %s10458_s16  ;;  %v7700_v28 = vpop.permute.xlu0 %5239  ;;  %v5553_v5 = vpack.i.bf16 %v7693_v4, %v7697_v2  ;;  %v7710_v14 = vsel %vm834_vm6, %v822_v62, %v823_v60  ;;  %v846_v11 = vsel %vm834_vm6, %v821_v43, %v822_v62  ;;  %v7727_v60 = vsel %vm834_vm6, %v825_v8, %v10617_v27 }
  0xba   : > { %10613 = vst [vmem:[#allocation126_spill] sm:$0xff] %v7700_v28  ;;  %v5568_v8 = vpack.i.bf16 %v7222_v44, %v7465_v25 }
  0xbb   : > { %v7702_v17 = vpop.permute.xlu1 %5254  ;;  %5529 = vrot.lane.b32.xlu0 %v5528_v47, %s10458_s16  ;;  %v5548_v47 = vpack.i.bf16 %v7710_v14, %v846_v11 }
  0xbc   : > { %10614 = vst [vmem:[#allocation127_spill] sm:$0xff] %v7702_v17 }
  0xbd   : > { %5544 = vrot.lane.b32.xlu1 %v5543_v39, %s10458_s16  ;;  %v7714_v41 = vpop.permute.xlu0 %5249  ;;  %v5563_v39 = vpack.i.bf16 %v7459_v34, %v7427_v15 }
  0xbe   : > { %10615 = vst [vmem:[#allocation128_spill] sm:$0xff] %v7714_v41  ;;  %v10694_v41 = vpack.i.bf16 %v7465_v25, %v7459_v34 }
  0xbf   : > { %v7716_v28 = vpop.permute.xlu1 %5264  ;;  %5539 = vrot.lane.b32.xlu0 %v5538_v40, %s10458_s16  ;;  %v5558_v40 = vpack.i.bf16 %v7433_v58, %v7727_v60 }
  0xc0   : > { %10616 = vst [vmem:[#allocation129_spill] sm:$0xff] %v7716_v28 }
  0xc1   : > { %5554 = vrot.lane.b32.xlu1 %v5553_v5, %s10458_s16  ;;  %v7729_v43 = vpop.permute.xlu0 %5259  ;;  %v5573_v5 = vpack.i.bf16 %v7585_v48, %v7598_v57  ;;  %v5578_v48 = vpack.i.bf16 %v848_v13, %v849_v6  ;;  %v5613_v6 = vpack.i.bf16 %v7624_v59, %v7581_v16 }
  0xc2   : > { %10618 = vst [vmem:[#allocation130_spill] sm:$0xff] %v7729_v43 }
  0xc3   : > { %v7731_v62 = vpop.permute.xlu1 %5274  ;;  %5549 = vrot.lane.b32.xlu0 %v5548_v47, %s10458_s16  ;;  %v5583_v47 = vpack.i.bf16 %v6752_v37, %v6727_v22 }
  0xc4   : > { %10619 = vst [vmem:[#allocation131_spill] sm:$0xff] %v7731_v62 }
  0xc5   : > { %5564 = vrot.lane.b32.xlu1 %v5563_v39, %s10458_s16  ;;  %v7739_v28 = vpop.permute.xlu0 %5269 }
  0xc6   : > { %10620 = vst [vmem:[#allocation132_spill] sm:$0xff] %v7739_v28 }
  0xc7   : > { %v7741_v17 = vpop.permute.xlu1 %5284  ;;  %5559 = vrot.lane.b32.xlu0 %v5558_v40, %s10458_s16 }
  0xc9   : > { %5574 = vrot.lane.b32.xlu1 %v5573_v5, %s10370_s25  ;;  %v7749_v39 = vpop.permute.xlu0 %5279  ;;  %v5588_v5 = vpack.i.bf16 %v6748_v35, %v6740_v32 }
  0xcb   : > { %v7751_v27 = vpop.permute.xlu1 %5294  ;;  %5569 = vrot.lane.b32.xlu0 %v5568_v8, %s10458_s16 }
  0xcd   : > { %5584 = vrot.lane.b32.xlu1 %v5583_v47, %s10430_s17  ;;  %v7755_v57 = vpop.permute.xlu0 %5289 }
  0xce   : > { %10621 = vst [vmem:[#allocation133_spill] sm:$0xff] %v7755_v57 }
  0xcf   : > { %v7757_v40 = vpop.permute.xlu1 %5304  ;;  %5579 = vrot.lane.b32.xlu0 %v5578_v48, %s10422_s15 }
  0xd0   : > { %10622 = vst [vmem:[#allocation134_spill] sm:$0xff] %v7757_v40 }
  0xd1   : > { %5594 = vrot.lane.b32.xlu1 %v6811_v61, %s10398_s21  ;;  %v7764_v62 = vpop.permute.xlu0 %5299  ;;  %v7782_v61 = vpack.i.bf16 %v7272_v23, %v7218_v50  ;;  %v5628_v50 = vpack.i.bf16 %v6789_v55, %v6750_v36 }
  0xd2   : > { %10623 = vst [vmem:[#allocation135_spill] sm:$0xff] %v7764_v62 }
  0xd3   : > { %v7766_v28 = vpop.permute.xlu1 %5314  ;;  %5589 = vrot.lane.b32.xlu0 %v5588_v5, %s10385_s20 }
  0xd4   : > { %10624 = vst [vmem:[#allocation136_spill] sm:$0xff] %v7766_v28 }
  0xd5   : > { %5604 = vrot.lane.b32.xlu1 %v7100_v33, %s10372_s30  ;;  %v7773_v13 = vpop.permute.xlu0 %5309  ;;  %v5618_v33 = vpack.i.bf16 %v846_v11, %v7674_v0  ;;  %v10631_v0 = vld [vmem:[#allocation76_spill] sm:$0xff]  ;;  %v5653_v11 = vpack.i.bf16 %v7607_v24, %v7620_v21  ;;  %v5658_v24 = vpack.i.bf16 %v7697_v2, %v7710_v14  ;;  %v10645_v2 = vld [vmem:[#allocation71_spill] sm:$0xff] }
  0xd6   : > { %10625 = vst [vmem:[#allocation137_spill] sm:$0xff] %v7773_v13 }
  0xd7   : > { %v7775_v8 = vpop.permute.xlu1 %5324  ;;  %5599 = vrot.lane.b32.xlu0 %v6968_v3, %s10411_s22 }
  0xd8   : > { %10626 = vst [vmem:[#allocation138_spill] sm:$0xff] %v7775_v8  ;;  %v10636_v8 = vld [vmem:[#allocation87_spill] sm:$0xff] }
  0xd9   : > { %5614 = vrot.lane.b32.xlu1 %v5613_v6, %s10370_s25  ;;  %v7784_v47 = vpop.permute.xlu0 %5319 }
  0xda   : > { %10627 = vst [vmem:[#allocation139_spill] sm:$0xff] %v7784_v47 }
  0xdb   : > { %v7786_v48 = vpop.permute.xlu1 %5334  ;;  %5609 = vrot.lane.b32.xlu0 %v7782_v61, %s10458_s16 }
  0xdd   : > { %5624 = vrot.lane.b32.xlu1 %v5588_v5, %s10430_s17  ;;  %v7792_v16 = vpop.permute.xlu0 %5329 }
  0xdf   : > { %v7794_v3 = vpop.permute.xlu1 %5344  ;;  %5619 = vrot.lane.b32.xlu0 %v5618_v33, %s10422_s15  ;;  %v10635_v33 = vld [vmem:[#allocation88_spill] sm:$0xff] }
  0xe0   : > { %10628 = vst [vmem:[#allocation140_spill] sm:$0xff] %v7794_v3  ;;  %v7819_v47 = vpack.i.bf16 %v10636_v8, %v10635_v33  ;;  %v10642_v8 = vld [vmem:[#allocation36_spill] sm:$0xff] }
  0xe1   : > { %5634 = vrot.lane.b32.xlu1 %v6854_v26, %s10398_s21  ;;  %v7801_v23 = vpop.permute.xlu0 %5339  ;;  %v10634_v26 = vld [vmem:[#allocation57_spill] sm:$0xff] }
  0xe2   : > { %10629 = vst [vmem:[#allocation141_spill] sm:$0xff] %v7801_v23  ;;  %10637 = vst [vmem:[#allocation57_spill] sm:$0xff] %v7819_v47 }
  0xe3   : > { %v7803_v59 = vpop.permute.xlu1 %5354  ;;  %5629 = vrot.lane.b32.xlu0 %v5628_v50, %s10385_s20 }
  0xe4   : > { %10630 = vst [vmem:[#allocation142_spill] sm:$0xff] %v7803_v59 }
  0xe5   : > { %5644 = vrot.lane.b32.xlu1 %v10631_v0, %s10372_s30  ;;  %v7810_v5 = vpop.permute.xlu0 %5349 }
  0xe6   : > { %10632 = vst [vmem:[#allocation76_spill] sm:$0xff] %v7810_v5  ;;  %v6390_v5 = vld [vmem:[%s6758_s14 + $0x10] sm:$0xff]  }
  0xe7   : > { %v7812_v6 = vpop.permute.xlu1 %5364  ;;  %5639 = vrot.lane.b32.xlu0 %v10634_v26, %s10411_s22  ;;  %v7999_v25 = vunpack.c.l.bf16 %v6390_v5 }
  0xe8   : > { %10633 = vst [vmem:[#allocation143_spill] sm:$0xff] %v7812_v6 }
  0xe9   : > { %5654 = vrot.lane.b32.xlu1 %v5653_v11, %s10370_s25  ;;  %v7821_v28 = vpop.permute.xlu0 %5359  ;;  %v5668_v11 = vpack.i.bf16 %v6785_v53, %v6778_v51  ;;  %10699 = vst [vmem:[#allocation164_spill] sm:$0xff] %v7999_v25 }
  0xea   : > { %10638 = vst [vmem:[#allocation88_spill] sm:$0xff] %v7821_v28 }
  0xeb   : > { %v7823_v13 = vpop.permute.xlu1 %5374  ;;  %5649 = vrot.lane.b32.xlu0 %v7819_v47, %s10458_s16 }
  0xec   : > { %10639 = vst [vmem:[#allocation87_spill] sm:$0xff] %v7823_v13  ;;  %v10650_v13 = vld [vmem:[#allocation86_spill] sm:$0xff] }
  0xed   : > { %5664 = vrot.lane.b32.xlu1 %v5628_v50, %s10430_s17  ;;  %v7830_v21 = vpop.permute.xlu0 %5369 }
  0xee   : > { %10640 = vst [vmem:[#allocation144_spill] sm:$0xff] %v7830_v21  ;;  %v10651_v21 = vld [vmem:[#allocation92_spill] sm:$0xff] }
  0xef   : > { %v7832_v0 = vpop.permute.xlu1 %5384  ;;  %5659 = vrot.lane.b32.xlu0 %v5658_v24, %s10422_s15  ;;  %v10648_v24 = vld [vmem:[#allocation52_spill] sm:$0xff]  ;;  %v7858_v6 = vpack.i.bf16 %v10651_v21, %v10650_v13  ;;  %v5708_v13 = vpack.i.bf16 %v6830_v12, %v6787_v54 }
  0xf0   : > { %10641 = vst [vmem:[#allocation145_spill] sm:$0xff] %v7832_v0  ;;  %v10781_v0 = vld [vmem:[#allocation49_spill] sm:$0xff] }
  0xf1   : > { %5674 = vrot.lane.b32.xlu1 %v10642_v8, %s10398_s21  ;;  %v7839_v26 = vpop.permute.xlu0 %5379  ;;  %v10649_v8 = vpack.i.bf16 %v7334_v52, %v7322_v19  ;;  %10652 = vst [vmem:[#allocation52_spill] sm:$0xff] %v7858_v6  ;;  %v10657_v52 = vld [vmem:[#allocation42_spill] sm:$0xff] }
  0xf2   : > { %10643 = vst [vmem:[#allocation36_spill] sm:$0xff] %v7839_v26  ;;  %v10780_v26 = vld [vmem:[#allocation44_spill] sm:$0xff] }
  0xf3   : > { %v7841_v33 = vpop.permute.xlu1 %5394  ;;  %5669 = vrot.lane.b32.xlu0 %v5668_v11, %s10385_s20 }
  0xf4   : > { %10644 = vst [vmem:[#allocation146_spill] sm:$0xff] %v7841_v33 }
  0xf5   : > { %5684 = vrot.lane.b32.xlu1 %v10645_v2, %s10372_s30  ;;  %v7846_v14 = vpop.permute.xlu0 %5389  ;;  %v5698_v2 = vpack.i.bf16 %v7727_v60, %v7693_v4  ;;  %v10660_v60 = vld [vmem:[#allocation80_spill] sm:$0xff] }
  0xf6   : > { %10646 = vst [vmem:[#allocation71_spill] sm:$0xff] %v7846_v14 }
  0xf7   : > { %v7848_v50 = vpop.permute.xlu1 %5404  ;;  %5679 = vrot.lane.b32.xlu0 %v10648_v24, %s10411_s22 }
  0xf8   : > { %10647 = vst [vmem:[#allocation147_spill] sm:$0xff] %v7848_v50 }
  0xf9   : > { %5694 = vrot.lane.b32.xlu1 %v10649_v8, %s10370_s25  ;;  %v7860_v28 = vpop.permute.xlu0 %5399 }
  0xfa   : > { %10653 = vst [vmem:[#allocation86_spill] sm:$0xff] %v7860_v28  ;;  %v866_v28 = vrot.slane %v7315_v46, 2 }
  0xfb   : > { %v7862_v43 = vpop.permute.xlu1 %5414  ;;  %5689 = vrot.lane.b32.xlu0 %v7858_v6, %s10458_s16 }
  0xfc   : > { %10654 = vst [vmem:[#allocation92_spill] sm:$0xff] %v7862_v43 }
  0xfd   : > { %5704 = vrot.lane.b32.xlu1 %v5668_v11, %s10430_s17  ;;  %v7869_v24 = vpop.permute.xlu0 %5409 }
  0xfe   : > { %10655 = vst [vmem:[#allocation148_spill] sm:$0xff] %v7869_v24 }
  0xff   : > { %v7871_v19 = vpop.permute.xlu1 %5424  ;;  %5699 = vrot.lane.b32.xlu0 %v5698_v2, %s10422_s15  ;;  %v10663_v2 = vld [vmem:[#allocation67_spill] sm:$0xff] }
 0x100   : > { %10656 = vst [vmem:[#allocation149_spill] sm:$0xff] %v7871_v19  ;;  %v10665_v19 = vld [vmem:[#allocation91_spill] sm:$0xff] }
 0x101   : > { %5714 = vrot.lane.b32.xlu1 %v10657_v52, %s10398_s21  ;;  %v7878_v21 = vpop.permute.xlu0 %5419  ;;  %v10664_v52 = vpack.i.bf16 %v7326_v42, %v7330_v29  ;;  %v10672_v29 = vpack.i.bf16 %v7427_v15, %v7433_v58  ;;  %v10673_v42 = vld [vmem:[#allocation39_spill] sm:$0xff]  ;;  %v856_v15 = vrot.slane %v7315_v46, 1 }
 0x102   : > { %10658 = vst [vmem:[#allocation42_spill] sm:$0xff] %v7878_v21  ;;  %v10666_v21 = vld [vmem:[#allocation90_spill] sm:$0xff] }
 0x103   : > { %v7880_v4 = vpop.permute.xlu1 %5434  ;;  %5709 = vrot.lane.b32.xlu0 %v5708_v13, %s10385_s20  ;;  %v7897_v43 = vpack.i.bf16 %v10666_v21, %v10665_v19  ;;  %v5748_v19 = vpack.i.bf16 %v6824_v9, %v6791_v56 }
 0x104   : > { %10659 = vst [vmem:[#allocation150_spill] sm:$0xff] %v7880_v4 }
 0x105   : > { %5724 = vrot.lane.b32.xlu1 %v10660_v60, %s10372_s30  ;;  %v7885_v11 = vpop.permute.xlu0 %5429  ;;  %10667 = vst [vmem:[#allocation67_spill] sm:$0xff] %v7897_v43 }
 0x106   : > { %10661 = vst [vmem:[#allocation80_spill] sm:$0xff] %v7885_v11 }
 0x107   : > { %v7887_v8 = vpop.permute.xlu1 %5444  ;;  %5719 = vrot.lane.b32.xlu0 %v10663_v2, %s10411_s22 }
 0x108   : > { %10662 = vst [vmem:[#allocation151_spill] sm:$0xff] %v7887_v8 }
 0x109   : > { %5734 = vrot.lane.b32.xlu1 %v10664_v52, %s10370_s25  ;;  %v7899_v24 = vpop.permute.xlu0 %5439 }
 0x10a   : > { %10668 = vst [vmem:[#allocation91_spill] sm:$0xff] %v7899_v24  ;;  %v10702_v24 = vrot.slane %v7315_v46, 4 }
 0x10b   : > { %v7901_v50 = vpop.permute.xlu1 %5454  ;;  %5729 = vrot.lane.b32.xlu0 %v7897_v43, %s10458_s16  ;;  %v10745_v43 = vld [vmem:[#allocation101_spill] sm:$0xff] }
 0x10c   : > { %10669 = vst [vmem:[#allocation90_spill] sm:$0xff] %v7901_v50  ;;  %v10682_v50 = vld [vmem:[#allocation98_spill] sm:$0xff] }
 0x10d   : > { %5744 = vrot.lane.b32.xlu1 %v5708_v13, %s10430_s17  ;;  %v7906_v60 = vpop.permute.xlu0 %5449  ;;  %v10676_v13 = vld [vmem:[#allocation78_spill] sm:$0xff] }
 0x10e   : > { %10670 = vst [vmem:[#allocation152_spill] sm:$0xff] %v7906_v60  ;;  %v865_v60 = vrot.slane %v7313_v63, 2 }
 0x10f   : > { %v7908_v2 = vpop.permute.xlu1 %5464  ;;  %5739 = vrot.lane.b32.xlu0 %v10672_v29, %s10422_s15 }
 0x110   : > { %10671 = vst [vmem:[#allocation153_spill] sm:$0xff] %v7908_v2  ;;  %v855_v2 = vrot.slane %v7313_v63, 1  ;;  %v7991_v33 = vsel %vm620_vm1, %v865_v60, %v866_v28 }
 0x111   : > { %5754 = vrot.lane.b32.xlu1 %v10673_v42, %s10398_s21  ;;  %v7918_v21 = vpop.permute.xlu0 %5459  ;;  %v10679_v42 = vld [vmem:[#allocation60_spill] sm:$0xff]  ;;  %10696 = vst [vmem:[#allocation162_spill] sm:$0xff] %v7991_v33 }
 0x112   : > { %10674 = vst [vmem:[#allocation39_spill] sm:$0xff] %v7918_v21  ;;  %v10681_v21 = vld [vmem:[#allocation89_spill] sm:$0xff]  ;;  %v7943_v59 = vsel %vm578_vm0, %v855_v2, %v856_v15 }
 0x113   : > { %v7920_v52 = vpop.permute.xlu1 %5474  ;;  %5749 = vrot.lane.b32.xlu0 %v5748_v19, %s10385_s20  ;;  %10684 = vst [vmem:[#allocation89_spill] sm:$0xff] %v7943_v59 }
 0x114   : > { %10675 = vst [vmem:[#allocation154_spill] sm:$0xff] %v7920_v52  ;;  %v10680_v52 = vpack.i.bf16 %v7379_v30, %v7352_v20  ;;  %v876_v20 = vrot.slane %v7315_v46, 3 }
 0x115   : > { %5764 = vrot.lane.b32.xlu1 %v10676_v13, %s10372_s30  ;;  %v7927_v58 = vpop.permute.xlu0 %5469  ;;  %v7939_v13 = vpack.i.bf16 %v10682_v50, %v10681_v21  ;;  %v10690_v21 = vrot.slane %v6827_v10, 3 }
 0x116   : > { %10677 = vst [vmem:[#allocation78_spill] sm:$0xff] %v7927_v58  ;;  %v10685_v58 = vrot.slane %v6827_v10, 1 }
 0x117   : > { %v7929_v29 = vpop.permute.xlu1 %5484  ;;  %5759 = vrot.lane.b32.xlu0 %v10679_v42, %s10411_s22  ;;  %10683 = vst [vmem:[#allocation60_spill] sm:$0xff] %v7939_v13  ;;  %v875_v42 = vrot.slane %v7313_v63, 3 }
 0x118   : > { %10678 = vst [vmem:[#allocation155_spill] sm:$0xff] %v7929_v29  ;;  %v7949_v40 = vsel %vm578_vm0, %v10685_v58, %v855_v2  ;;  %v10774_v29 = vld [vmem:[#allocation105_spill] sm:$0xff] }
 0x119   : > { %5774 = vrot.lane.b32.xlu1 %v10680_v52, %s10370_s25  ;;  %10686 = vst [vmem:[#allocation98_spill] sm:$0xff] %v7949_v40  ;;  %v7953_v30 = vpop.permute.xlu0 %5479  ;;  %v5793_v50 = vpack.i.bf16 %v7943_v59, %v7949_v40  ;;  %v7964_v2 = vsel %vm662_vm2, %v875_v42, %v876_v20  ;;  %v7970_v58 = vsel %vm662_vm2, %v10690_v21, %v875_v42 }
 0x11a   : > { %10687 = vst [vmem:[#allocation156_spill] sm:$0xff] %v7953_v30  ;;  %10689 = vst [vmem:[#allocation158_spill] sm:$0xff] %v7964_v2  ;;  %v5788_v42 = vpack.i.bf16 %v7313_v63, %v6827_v10  ;;  %v5803_v21 = vpack.i.bf16 %v7964_v2, %v7970_v58 }
 0x11b   : > { %v7955_v52 = vpop.permute.xlu1 %5494  ;;  %5769 = vrot.lane.b32.xlu0 %v7939_v13, %s10458_s16  ;;  %10691 = vst [vmem:[#allocation159_spill] sm:$0xff] %v7970_v58  ;;  %v6402_v13 = vld [vmem:[%s10158_s2 + $0x4c] ss:$12 sps:$4 sm:$0xff]  }
 0x11c   : > { %10688 = vst [vmem:[#allocation157_spill] sm:$0xff] %v7955_v52  ;;  %v10695_v52 = vld [vmem:[#allocation95_spill] sm:$0xff] }
 0x11d   : > { %5784 = vrot.lane.b32.xlu1 %v5748_v19, %s10430_s17  ;;  %v7975_v62 = vpop.permute.xlu0 %5489  ;;  %v885_v8 = vrot.slane %v10695_v52, 4  ;;  %v10754_v53 = vrot.slane %v10695_v52, 6 }
 0x11e   : > { %10692 = vst [vmem:[#allocation160_spill] sm:$0xff] %v7975_v62 }
 0x11f   : > { %v7977_v19 = vpop.permute.xlu1 %5504  ;;  %5779 = vrot.lane.b32.xlu0 %v10694_v41, %s10422_s15  ;;  %v890_v3 = vsel %vm704_vm3, %v10702_v24, %v885_v8  ;;  %v10707_v24 = vpack.i.bf16 %v7360_v31, %v7364_v38  ;;  %v877_v38 = vrot.slane %v10695_v52, 3 }
 0x120   : > { %10693 = vst [vmem:[#allocation161_spill] sm:$0xff] %v7977_v19  ;;  %v10697_v19 = vrot.slane %v6827_v10, 2 }
 0x121   : > { %5794 = vrot.lane.b32.xlu1 %v5793_v50, %s10398_s21  ;;  %v8001_v41 = vpop.permute.xlu0 %5499 }
 0x122   : > { %v7997_v34 = vsel %vm620_vm1, %v10697_v19, %v865_v60  ;;  %10700 = vst [vmem:[#allocation165_spill] sm:$0xff] %v8001_v41  ;;  %v831_v60 = vrot.slane %v6827_v10, 7  ;;  %v832_v19 = vrot.slane %v7313_v63, 7  ;;  %v857_v41 = vrot.slane %v10695_v52, 1 }
 0x123   : > { %10698 = vst [vmem:[#allocation163_spill] sm:$0xff] %v7997_v34  ;;  %v8003_v50 = vpop.permute.xlu1 %5514  ;;  %5789 = vrot.lane.b32.xlu0 %v5788_v42, %s10385_s20  ;;  %v5798_v62 = vpack.i.bf16 %v7991_v33, %v7997_v34 }
 0x124   : > { %10701 = vst [vmem:[#allocation166_spill] sm:$0xff] %v8003_v50  ;;  %v8031_v33 = vsel %vm834_vm6, %v831_v60, %v832_v19  ;;  %v10709_v50 = vrot.slane %v6824_v9, 7  ;;  %v8047_v31 = vsel %vm578_vm0, %v856_v15, %v857_v41 }
 0x125   : > { %5804 = vrot.lane.b32.xlu1 %v5803_v21, %s10372_s30  ;;  %v8017_v14 = vpop.permute.xlu0 %5509  ;;  %v10705_v21 = vld [vmem:[#allocation97_spill] sm:$0xff]  ;;  %10708 = vst [vmem:[#allocation169_spill] sm:$0xff] %v8031_v33  ;;  %10712 = vst [vmem:[#allocation171_spill] sm:$0xff] %v8047_v31 }
 0x126   : > { %10703 = vst [vmem:[#allocation167_spill] sm:$0xff] %v8017_v14  ;;  %v8022_v2 = vpack.i.bf16 %v890_v3, %v10705_v21  ;;  %v8037_v14 = vsel %vm834_vm6, %v10709_v50, %v831_v60  ;;  %v10710_v3 = vrot.slane %v7999_v25, 1  ;;  %v10352_v21 = vrot.slane %v7999_v25, 3 }
 0x127   : > { %v8019_v23 = vpop.permute.xlu1 %5524  ;;  %5799 = vrot.lane.b32.xlu0 %v5798_v62, %s10411_s22  ;;  %v5818_v50 = vpack.i.bf16 %v8031_v33, %v8037_v14 }
 0x128   : > { %10704 = vst [vmem:[#allocation168_spill] sm:$0xff] %v8019_v23  ;;  %10706 = vst [vmem:[#allocation97_spill] sm:$0xff] %v8022_v2  ;;  %v8043_v62 = vsel %vm578_vm0, %v857_v41, %v10710_v3  ;;  %v8062_v41 = vunpack.c.h.bf16 %v6390_v5  ;;  %v8068_v60 = vsel %vm662_vm2, %v877_v38, %v10352_v21  ;;  %v8072_v3 = vsel %vm662_vm2, %v876_v20, %v877_v38 }
 0x129   : > { %5814 = vrot.lane.b32.xlu1 %v10707_v24, %s10370_s25  ;;  %10711 = vst [vmem:[#allocation170_spill] sm:$0xff] %v8043_v62  ;;  %v8051_v24 = vpop.permute.xlu0 %5519  ;;  %v5833_v15 = vpack.i.bf16 %v8043_v62, %v8047_v31  ;;  %10716 = vst [vmem:[#allocation175_spill] sm:$0xff] %v8068_v60  ;;  %v5828_v5 = vpack.i.bf16 %v10695_v52, %v7315_v46  ;;  %v5843_v21 = vpack.i.bf16 %v8068_v60, %v8072_v3 }
 0x12a   : > { %10713 = vst [vmem:[#allocation172_spill] sm:$0xff] %v8051_v24  ;;  %10715 = vst [vmem:[#allocation174_spill] sm:$0xff] %v8062_v41  ;;  %v868_v24 = vrot.slane %v7999_v25, 2  ;;  %v886_v20 = vrot.slane %v7999_v25, 4  ;;  %v10724_v60 = vrot.slane %v8062_v41, 4 }
 0x12b   : > { %v8053_v23 = vpop.permute.xlu1 %5534  ;;  %5809 = vrot.lane.b32.xlu0 %v8022_v2, %s10458_s16  ;;  %10717 = vst [vmem:[#allocation176_spill] sm:$0xff] %v8072_v3 }
 0x12c   : > { %10714 = vst [vmem:[#allocation173_spill] sm:$0xff] %v8053_v23  ;;  %v888_v3 = vsel %vm704_vm3, %v886_v20, %v10724_v60 }
 0x12d   : > { %5824 = vrot.lane.b32.xlu1 %v5788_v42, %s10430_s17  ;;  %v867_v42 = vrot.slane %v10695_v52, 2  ;;  %v8076_v33 = vpop.permute.xlu0 %5529 }
 0x12e   : > { %10718 = vst [vmem:[#allocation177_spill] sm:$0xff] %v8076_v33 }
 0x12f   : > { %v8078_v62 = vpop.permute.xlu1 %5544  ;;  %5819 = vrot.lane.b32.xlu0 %v5818_v50, %s10422_s15  ;;  %v8090_v2 = vsel %vm620_vm1, %v867_v42, %v868_v24  ;;  %v6391_v50 = vld [vmem:[%s6758_s14 + $0x18] sm:$0xff]  }
 0x130   : > { %10719 = vst [vmem:[#allocation178_spill] sm:$0xff] %v8078_v62  ;;  %10720 = vst [vmem:[#allocation179_spill] sm:$0xff] %v8090_v2  ;;  %v8094_v62 = vsel %vm620_vm1, %v866_v28, %v867_v42  ;;  %v889_v28 = vsel %vm704_vm3, %v885_v8, %v886_v20  ;;  %v833_v42 = vrot.slane %v7315_v46, 7  ;;  %v8192_v58 = vunpack.c.h.bf16 %v6391_v50 }
 0x131   : > { %5834 = vrot.lane.b32.xlu1 %v5833_v15, %s10398_s21  ;;  %10721 = vst [vmem:[#allocation180_spill] sm:$0xff] %v8094_v62  ;;  %v8097_v15 = vpop.permute.xlu0 %5539  ;;  %v5838_v38 = vpack.i.bf16 %v8090_v2, %v8094_v62  ;;  %v10728_v2 = vld [vmem:[#allocation96_spill] sm:$0xff]  ;;  %v8124_v60 = vpack.i.bf16 %v888_v3, %v889_v28  ;;  %v10733_v28 = vrot.slane %v7999_v25, 1 }
 0x132   : > { %10722 = vst [vmem:[#allocation181_spill] sm:$0xff] %v8097_v15  ;;  %v10374_v15 = vrot.slane %v10695_v52, 7  ;;  %v10729_v62 = vpack.i.bf16 %v10728_v2, %v7356_v49  ;;  %v8128_v8 = vsel %vm834_vm6, %v832_v19, %v833_v42  ;;  %v6393_v49 = vld [vmem:[%s10158_s2 + $0x4] ss:$12 sps:$4 sm:$0xff]   ;;  %v8149_v19 = vpack.i.bf16 %v8062_v41, %v7999_v25  ;;  %v6395_v3 = vld [vmem:[%s10158_s2] ss:$12 sps:$4 sm:$0xff]  }
 0x133   : > { %v8099_v31 = vpop.permute.xlu1 %5554  ;;  %5829 = vrot.lane.b32.xlu0 %v5828_v5, %s10385_s20  ;;  %10730 = vst [vmem:[#allocation96_spill] sm:$0xff] %v8124_v60  ;;  %10731 = vst [vmem:[#allocation186_spill] sm:$0xff] %v8128_v8  ;;  %3311 = vmatprep.subr.bf16.mxu0 %v6393_v49  ;;  %v10407_v9 = vrot.slane %v8192_v58, 4  ;;  %v909_v30 = vrot.slane %v8192_v58, 6  ;;  %v919_v47 = vrot.slane %v8192_v58, 7 }
 0x134   : > { %10723 = vst [vmem:[#allocation182_spill] sm:$0xff] %v8099_v31  ;;  %v8113_v31 = vunpack.c.l.bf16 %v6391_v50  ;;  %v924_v20 = vsel %vm834_vm6, %v833_v42, %v10374_v15  ;;  %3312 = vmatpush1.bf16.msra.mxu0 %v6395_v3  ;;  %v6398_v3 = vld [vmem:[%s10158_s2 + $0x18] ss:$12 sps:$4 sm:$0xff]   ;;  %10737 = vst [vmem:[#allocation191_spill] sm:$0xff] %v8192_v58 }
 0x135   : > { %5844 = vrot.lane.b32.xlu1 %v5843_v21, %s10372_s30  ;;  %v8115_v59 = vpop.permute.xlu0 %5549  ;;  %v5858_v2 = vpack.i.bf16 %v924_v20, %v8128_v8  ;;  %v6396_v8 = vld [vmem:[%s10158_s2 + $0x1c] ss:$12 sps:$4 sm:$0xff]   ;;  %s10413_s30 = smov 40  }
 0x136   : > { %10725 = vst [vmem:[#allocation183_spill] sm:$0xff] %v8113_v31  ;;  %10726 = vst [vmem:[#allocation184_spill] sm:$0xff] %v8115_v59  ;;  %v10382_v20 = vrot.slane %v8113_v31, 2  ;;  %3313 = vmatprep.subr.bf16.mxu0 %v6396_v8  ;;  %v6401_v8 = vld [vmem:[%s10158_s2 + $0x30] ss:$12 sps:$4 sm:$0xff]   ;;  %v891_v10 = vrot.slane %v8113_v31, 4 }
 0x137   : > { %v8117_v21 = vpop.permute.xlu1 %5564  ;;  %5839 = vrot.lane.b32.xlu0 %v5838_v38, %s10411_s22  ;;  %v10377_v38 = vrot.slane %v8113_v31, 1  ;;  %v908_v6 = vrot.slane %v8113_v31, 6 }
 0x138   : > { %10727 = vst [vmem:[#allocation185_spill] sm:$0xff] %v8117_v21  ;;  %v859_v21 = vrot.slane %v8062_v41, 1  ;;  %3314 = vmatpush1.bf16.msra.mxu0 %v6398_v3  ;;  %v10740_v3 = vrot.slane %v7999_v25, 3 }
 0x139   : > { %5854 = vrot.lane.b32.xlu1 %v10729_v62, %s10370_s25  ;;  %v8136_v59 = vpop.permute.xlu0 %5559  ;;  %v869_v62 = vrot.slane %v8062_v41, 2  ;;  %s10417_s25 = smov 44  }
 0x13a   : > { %10732 = vst [vmem:[#allocation187_spill] sm:$0xff] %v8136_v59  ;;  %v8159_v42 = vsel %vm578_vm0, %v10733_v28, %v859_v21 }
 0x13b   : > { %v8138_v63 = vpop.permute.xlu1 %5574  ;;  %5849 = vrot.lane.b32.xlu0 %v8124_v60, %s10458_s16  ;;  %10734 = vst [vmem:[#allocation188_spill] sm:$0xff] %v8159_v42  ;;  %v8181_v49 = vsel %vm620_vm1, %v868_v24, %v869_v62  ;;  %v6399_v24 = vld [vmem:[%s10158_s2 + $0x34] ss:$12 sps:$4 sm:$0xff]  }
 0x13c   : > { %10736 = vst [vmem:[#allocation190_spill] sm:$0xff] %v8181_v49  ;;  %3315 = vmatprep.subr.bf16.mxu0 %v6399_v24  ;;  %v10743_v24 = vrot.slane %v8062_v41, 4 }
 0x13d   : > { %5864 = vrot.lane.b32.xlu1 %v5828_v5, %s10430_s17  ;;  %v932_v5 = vsel %vm578_vm0, %v859_v21, %v10377_v38  ;;  %v8166_v15 = vpop.permute.xlu0 %5569  ;;  %v5868_v21 = vpack.i.bf16 %v6697_v7, %v6715_v18  ;;  %v879_v38 = vrot.slane %v8062_v41, 3  ;;  %3316 = vmatpush1.bf16.msra.mxu0 %v6401_v8 }
 0x13e   : > { %10735 = vst [vmem:[#allocation189_spill] sm:$0xff] %v8166_v15  ;;  %v5883_v28 = vpack.i.bf16 %v932_v5, %v8159_v42  ;;  %v894_v8 = vsel %vm704_vm3, %v10743_v24, %v891_v10  ;;  %3317 = vmatprep.subr.bf16.mxu0 %v6402_v13 }
 0x13f   : > { %v8168_v59 = vpop.permute.xlu1 %5584  ;;  %5859 = vrot.lane.b32.xlu0 %v5858_v2, %s10422_s15  ;;  %v941_v2 = vsel %vm620_vm1, %v869_v62, %v10382_v20  ;;  %v10738_v62 = vld [vmem:[#allocation8_spill] sm:$0xff]  ;;  %v10739_v20 = vld [vmem:[#allocation9_spill] sm:$0xff]  ;;  %v8213_v60 = vsel %vm662_vm2, %v10740_v3, %v879_v38 }
 0x140   : > { %v8203_v34 = vpack.i.bf16 %v10739_v20, %v10738_v62  ;;  %v5893_v50 = vpack.i.bf16 %v941_v2, %v8181_v49  ;;  %10741 = vst [vmem:[#allocation8_spill] sm:$0xff] %v8213_v60  ;;  %v5577_v2 = vunpack.i.h.bf16 %v8138_v63  ;;  %v5576_v49 = vunpack.i.l.bf16 %v8138_v63 }
 0x141   : > { %5874 = vrot.lane.b32.xlu1 %v8149_v19, %s10385_s20  ;;  %v5580_v5 = vpop.permute.xlu0 %5579  ;;  %v5587_v12 = vunpack.i.h.bf16 %v8168_v59  ;;  %s10423_s20 = smov 56  }
 0x142   : > { %v5582_v3 = vunpack.i.h.bf16 %v5580_v5  ;;  %v5581_v46 = vunpack.i.l.bf16 %v5580_v5  ;;  %v893_v5 = vsel %vm704_vm3, %v891_v10, %v10407_v9  ;;  %v2869_v56 = vsel %vm10471_vm7, %v10745_v43, %v5576_v49  ;;  %v10746_v43 = vld [vmem:[#allocation14_spill] sm:$0xff] }
 0x143   : > { %v8194_v42 = vpop.permute.xlu1 %5594  ;;  %5869 = vrot.lane.b32.xlu0 %v5868_v21, %s10437_s26  ;;  %v10742_v21 = vrot.slane %v8113_v31, 3  ;;  %v5586_v9 = vunpack.i.l.bf16 %v8168_v59  ;;  %v10747_v59 = vld [vmem:[#allocation15_spill] sm:$0xff] }
 0x144   : > { %v2889_v24 = vsel %vm10472_vm8, %v2869_v56, %v5581_v46  ;;  %v10748_v49 = vpack.i.bf16 %v10746_v43, %v10747_v59  ;;  %v8265_v56 = vpack.i.bf16 %v893_v5, %v894_v8  ;;  %v6407_v46 = vld [vmem:[%s10158_s2 + $0x60] ss:$12 sps:$4 sm:$0xff]   ;;  %v5597_v5 = vunpack.i.h.bf16 %v8194_v42 }
 0x145   : > { %5884 = vrot.lane.b32.xlu1 %v5883_v28, %s10398_s21  ;;  %v950_v28 = vsel %vm662_vm2, %v879_v38, %v10742_v21  ;;  %v5590_v40 = vpop.permute.xlu0 %5589  ;;  %v6404_v38 = vld [vmem:[%s10158_s2 + $0x48] ss:$12 sps:$4 sm:$0xff]   ;;  %v906_v21 = vrot.slane %v7999_v25, 6  ;;  %v5596_v8 = vunpack.i.l.bf16 %v8194_v42  ;;  %s10460_s21 = smov 48  }
 0x146   : > { %v5903_v63 = vpack.i.bf16 %v950_v28, %v8213_v60  ;;  %v10744_v28 = vld [vmem:[#allocation100_spill] sm:$0xff]  ;;  %3318 = vmatpush1.bf16.msra.mxu0 %v6404_v38  ;;  %v5591_v13 = vunpack.i.l.bf16 %v5590_v40  ;;  %v10750_v38 = vld [vmem:[#allocation45_spill] sm:$0xff]  ;;  %10752 = vst [vmem:[#allocation9_spill] sm:$0xff] %v8265_v56 }
 0x147   : > { %v8223_v57 = vpop.permute.xlu1 %5604  ;;  %5879 = vrot.lane.b32.xlu0 %v8203_v34, %s10413_s30  ;;  %v2870_v60 = vsel %vm10471_vm7, %v10744_v28, %v5577_v2  ;;  %v6405_v2 = vld [vmem:[%s10158_s2 + $0x64] ss:$12 sps:$4 sm:$0xff]   ;;  %v913_v43 = vsel %vm792_vm4, %v10754_v53, %v906_v21  ;;  %v6408_v42 = vld [vmem:[%s10158_s2 + $0x7c] ss:$12 sps:$4 sm:$0xff]   ;;  %s10760_s30 = smov 4  }
 0x148   : > { %v2890_v10 = vsel %vm10472_vm8, %v2870_v60, %v5582_v3  ;;  %v10751_v60 = vld [vmem:[#allocation43_spill] sm:$0xff]  ;;  %3319 = vmatprep.subr.bf16.mxu0 %v6405_v2 }
 0x149   : > { %5894 = vrot.lane.b32.xlu1 %v5893_v50, %s10411_s22  ;;  %v5600_v23 = vpop.permute.xlu0 %5599  ;;  %v5592_v50 = vunpack.i.h.bf16 %v5590_v40  ;;  %v5898_v3 = vpack.i.bf16 %v10751_v60, %v10750_v38  ;;  %v10753_v40 = vrot.slane %v8062_v41, 6  ;;  %v2910_v60 = vsel %vm2083_vm9, %v2890_v10, %v5587_v12  ;;  %v6410_v12 = vld [vmem:[%s10158_s2 + $0x78] ss:$12 sps:$4 sm:$0xff]   ;;  %s10790_s22 = smov 8  }
 0x14a   : > { %3320 = vmatpush1.bf16.msra.mxu0 %v6407_v46  ;;  %v5602_v59 = vunpack.i.h.bf16 %v5600_v23  ;;  %v5601_v2 = vunpack.i.l.bf16 %v5600_v23  ;;  %v10756_v10 = vrot.slane %v10695_v52, 7 }
 0x14b   : > { %v8251_v54 = vpop.permute.xlu1 %5614  ;;  %5889 = vrot.lane.b32.xlu0 %v10748_v49, %s10417_s25  ;;  %v912_v28 = vsel %vm792_vm4, %v906_v21, %v10753_v40  ;;  %v2909_v49 = vsel %vm2083_vm9, %v2889_v24, %v5586_v9  ;;  %v2930_v21 = vsel %vm2104_vm10, %v2910_v60, %v5592_v50  ;;  %v10755_v50 = vrot.slane %v8062_v41, 7  ;;  %3321 = vmatprep.subr.bf16.mxu0 %v6408_v42  ;;  %s10788_s25 = smov 56  }
 0x14c   : > { %v2929_v53 = vsel %vm2104_vm10, %v2909_v49, %v5591_v13  ;;  %v5923_v9 = vpack.i.bf16 %v912_v28, %v913_v43  ;;  %v8308_v13 = vld [vmem:[%s6758_s14 + $0x20] sm:$0xff]   ;;  %v5607_v60 = vunpack.i.h.bf16 %v8223_v57  ;;  %v2950_v28 = vsel %vm10478_vm11, %v2930_v21, %v5597_v5  ;;  %s10452_s14 = smov 52   ;;  %v10762_v21 = vld [vmem:[#allocation82_spill] sm:$0xff] }
 0x14d   : > { %5904 = vrot.lane.b32.xlu1 %v5903_v63, %s10749_s13  ;;  %v916_v63 = vrot.slane %v7999_v25, 7  ;;  %v8284_v38 = vpop.permute.xlu0 %5609  ;;  %v2949_v46 = vsel %vm10478_vm11, %v2929_v53, %v5596_v8  ;;  %v2970_v42 = vsel %vm2146_vm12, %v2950_v28, %v5602_v59  ;;  %v10758_v8 = vld [vmem:[#allocation59_spill] sm:$0xff] }
 0x14e   : > { %3322 = vmatpush1.bf16.msra.mxu0 %v6410_v12  ;;  %v10761_v53 = vld [vmem:[#allocation83_spill] sm:$0xff]  ;;  %v2990_v28 = vsel %vm2167_vm14, %v2970_v42, %v5607_v60  ;;  %v926_v42 = vrot.slane %v8192_v58, 1 }
 0x14f   : > { %v8286_v40 = vpop.permute.xlu1 %5624  ;;  %5899 = vrot.lane.b32.xlu0 %v5898_v3, %s10460_s21  ;;  %v922_v23 = vsel %vm834_vm6, %v916_v63, %v10755_v50  ;;  %v923_v24 = vsel %vm834_vm6, %v10756_v10, %v916_v63  ;;  %v5606_v3 = vunpack.i.l.bf16 %v8223_v57  ;;  %v3164_v63 = vld [vmem:[%s10158_s2 + $0x90] sm:$0x33]  ;;  %v2969_v50 = vsel %vm2146_vm12, %v2949_v46, %v5601_v2  ;;  %v10757_v57 = vld [vmem:[#allocation58_spill] sm:$0xff] }
 0x150   : > { %v5611_v10 = vunpack.i.l.bf16 %v8284_v38  ;;  %v10759_v5 = vpack.i.bf16 %v10757_v57, %v10758_v8  ;;  %v5918_v12 = vpack.i.bf16 %v10762_v21, %v10761_v53  ;;  %v4664_v25 = vcombine.high %v3164_v63, %v3164_v63  ;;  %v6413_v21 = vld [vmem:[%s10158_s2 + $0x8] ss:$12 sps:$4 sm:$0xff]  }
 0x151   : > { %5914 = vrot.lane.b32.xlu1 %v8265_v56, %s10458_s16  ;;  %v8314_v43 = vpop.permute.xlu0 %5619  ;;  %v5933_v56 = vpack.i.bf16 %v922_v23, %v923_v24  ;;  %v8332_v2 = vunpack.c.l.bf16 %v8308_v13  ;;  %v4663_v59 = vcombine.low %v3164_v63, %v3164_v63  ;;  %v2989_v46 = vsel %vm2167_vm14, %v2969_v50, %v5606_v3  ;;  %v10763_v24 = vld [vmem:[#allocation81_spill] sm:$0xff]  ;;  %4952 = vmatprep.subr.bf16.mxu1 %v6413_v21 }
 0x152   : > { %4666 = vmatprep.subr.msk.bf16.mxu0 %vm10470_vm13, %v4664_v25  ;;  %v3010_v23 = vsel %vm2188_vm15, %v2990_v28, %v5611_v10  ;;  %v10764_v63 = vld [vmem:[#allocation85_spill] sm:$0xff]  ;;  %4953 = vmatpush3.bf16.msra.mxu1 %v6413_v21  ;;  %v5621_v33 = vunpack.i.l.bf16 %v8314_v43 }
 0x153   : > { %v8316_v49 = vpop.permute.xlu1 %5634  ;;  %5909 = vrot.lane.b32.xlu0 %v10759_v5, %s10452_s14  ;;  %v8347_v3 = vpack.i.bf16 %v10764_v63, %v10763_v24  ;;  %v3303_v60 = vsel %vm10470_vm13, %v4663_v59, 0  ;;  %v10429_v25 = vrot.slane %v8332_v2, 1  ;;  %v10427_v5 = vmov 0   ;;  %s10776_s14 = smov 44  }
 0x154   : > { %3324 = vmatpush1.bf16.msra.mxu0 %v3303_v60  ;;  %3343 = vmatprep.mubr.bf16.mxu0 %v10427_v5  ;;  %v935_v59 = vrot.slane %v8192_v58, 2  ;;  %v6414_v60 = vld [vmem:[%s10158_s2 + $0x20] ss:$12 sps:$4 sm:$0xff]   ;;  %v10435_v5 = vrot.slane %v8332_v2, 3  ;;  %v952_v52 = vrot.slane %v8332_v2, 4 }
 0x155   : > { %5924 = vrot.lane.b32.xlu1 %v5923_v9, %s10760_s30  ;;  %v8336_v57 = vpop.permute.xlu0 %5629  ;;  %v5572_v9 = vunpack.i.h.bf16 %v8166_v15  ;;  %v930_v28 = vsel %vm578_vm0, %v926_v42, %v10429_v25  ;;  %4954 = vmatprep.subr.bf16.mxu1 %v6414_v60 }
 0x156   : > { %4955 = vmatpush3.bf16.msra.mxu1 %v6414_v60  ;;  %v10770_v60 = vrot.slane %v8113_v31, 3  ;;  %v5632_v4 = vunpack.i.h.bf16 %v8336_v57 }
 0x157   : > { %v8338_v8 = vpop.permute.xlu1 %5644  ;;  %5919 = vrot.lane.b32.xlu0 %v5918_v12, %s10423_s20  ;;  %v3009_v50 = vsel %vm2188_vm15, %v2989_v46, %v5572_v9  ;;  %s10425_s20 = smov 64   ;;  %v8366_v12 = vpack.i.bf16 %v8192_v58, %v8113_v31  ;;  %v10431_v46 = vrot.slane %v8332_v2, 2  ;;  %v10765_v9 = vrot.slane %v8113_v31, 1 }
 0x159   : > { %5934 = vrot.lane.b32.xlu1 %v5933_v56, %s10422_s15  ;;  %v8354_v10 = vpop.permute.xlu0 %5639  ;;  %v5943_v56 = vpack.i.bf16 %v3010_v23, %v3009_v50  ;;  %s10439_s15 = smov 60   ;;  %v931_v23 = vsel %vm578_vm0, %v10765_v9, %v926_v42  ;;  %v939_v42 = vsel %vm620_vm1, %v935_v59, %v10431_v46  ;;  %v944_v9 = vrot.slane %v8192_v58, 3 }
 0x15a   : > { %v5963_v50 = vpack.i.bf16 %v930_v28, %v931_v23  ;;  %v6415_v23 = vld [vmem:[%s10158_s2 + $0x38] ss:$12 sps:$4 sm:$0xff]  }
 0x15b   : > { %v8356_v53 = vpop.permute.xlu1 %5654  ;;  %5929 = vrot.lane.b32.xlu0 %v8347_v3, %s10439_s15  ;;  %v948_v46 = vsel %vm662_vm2, %v944_v9, %v10435_v5  ;;  %v949_v15 = vsel %vm662_vm2, %v10770_v60, %v944_v9  ;;  %4956 = vmatprep.subr.bf16.mxu1 %v6415_v23  ;;  %v5622_v5 = vunpack.i.h.bf16 %v8314_v43  ;;  %v6416_v9 = vld [vmem:[%s10158_s2 + $0x50] ss:$12 sps:$4 sm:$0xff]   ;;  %s10772_s15 = smov 24  }
 0x15c   : > { %4957 = vmatpush3.bf16.msra.mxu1 %v6415_v23  ;;  %v5983_v60 = vpack.i.bf16 %v948_v46, %v949_v15  ;;  %v10773_v23 = vrot.slane %v8192_v58, 4  ;;  %v5627_v46 = vunpack.i.h.bf16 %v8286_v40 }
 0x15d   : > { %5944 = vrot.lane.b32.xlu1 %v5943_v56, %s10425_s20  ;;  %v8378_v24 = vpop.permute.xlu0 %5649  ;;  %s10766_s20 = smov 16   ;;  %v10767_v56 = vrot.slane %v8113_v31, 2  ;;  %4958 = vmatprep.subr.bf16.mxu1 %v6416_v9 }
 0x15e   : > { %v955_v43 = vsel %vm704_vm3, %v10773_v23, %v952_v52 }
 0x15f   : > { %v8380_v63 = vpop.permute.xlu1 %5664  ;;  %5939 = vrot.lane.b32.xlu0 %v8149_v19, %s10430_s17  ;;  %v940_v21 = vsel %vm620_vm1, %v10767_v56, %v935_v59  ;;  %v8400_v19 = vunpack.c.h.bf16 %v8308_v13  ;;  %v10768_v59 = vld [vmem:[#allocation10_spill] sm:$0xff]  ;;  %s10769_s17 = smov 20  }
 0x160   : > { %v8413_v56 = vpack.i.bf16 %v6727_v22, %v10768_v59  ;;  %v5973_v13 = vpack.i.bf16 %v939_v42, %v940_v21  ;;  %v5617_v22 = vunpack.i.h.bf16 %v8251_v54  ;;  %4959 = vmatpush3.bf16.msra.mxu1 %v6416_v9  ;;  %v5978_v9 = vpack.i.bf16 %v10781_v0, %v10780_v26  ;;  %v10805_v26 = vld [vmem:[#allocation26_spill] sm:$0xff] }
 0x161   : > { %5954 = vrot.lane.b32.xlu1 %v8366_v12, %s10766_s20  ;;  %v8402_v25 = vpop.permute.xlu0 %5659  ;;  %v5641_v0 = vunpack.i.l.bf16 %v8354_v10 }
 0x162   : > { %v2872_v11 = vsel %vm10471_vm7, %v10774_v29, %v5617_v22  ;;  %v5631_v22 = vunpack.i.l.bf16 %v8336_v57  ;;  %v6417_v29 = vld [vmem:[%s10158_s2 + $0x68] ss:$12 sps:$4 sm:$0xff]   ;;  %v10782_v57 = vrot.slane %v8062_v41, 6 }
 0x163   : > { %v8404_v28 = vpop.permute.xlu1 %5674  ;;  %5949 = vrot.lane.b32.xlu0 %v8203_v34, %s10437_s26  ;;  %v10446_v34 = vrot.slane %v8400_v19, 4  ;;  %s10771_s26 = smov 40   ;;  %4960 = vmatprep.subr.bf16.mxu1 %v6417_v29 }
 0x164   : > { %4961 = vmatpush3.bf16.msra.mxu1 %v6417_v29 }
 0x165   : > { %5964 = vrot.lane.b32.xlu1 %v5963_v50, %s10769_s17  ;;  %v5616_v50 = vunpack.i.l.bf16 %v8251_v54  ;;  %v8428_v42 = vpop.permute.xlu0 %5669  ;;  %v954_v54 = vsel %vm704_vm3, %v952_v52, %v10446_v34  ;;  %v5626_v34 = vunpack.i.l.bf16 %v8286_v40  ;;  %v2892_v52 = vsel %vm10472_vm8, %v2872_v11, %v5622_v5  ;;  %v10778_v40 = vld [vmem:[#allocation19_spill] sm:$0xff] }
 0x166   : > { %v5993_v11 = vpack.i.bf16 %v954_v54, %v955_v43  ;;  %v911_v5 = vsel %vm792_vm4, %v10782_v57, %v908_v6  ;;  %v2912_v54 = vsel %vm2083_vm9, %v2892_v52, %v5627_v46  ;;  %v5642_v57 = vunpack.i.h.bf16 %v8354_v10 }
 0x167   : > { %v8430_v21 = vpop.permute.xlu1 %5684  ;;  %5959 = vrot.lane.b32.xlu0 %v8413_v56, %s10771_s26  ;;  %v10783_v52 = vrot.slane %v8062_v41, 7  ;;  %v5647_v10 = vunpack.i.h.bf16 %v8338_v8  ;;  %v5666_v41 = vunpack.i.l.bf16 %v8380_v63 }
 0x169   : > { %5974 = vrot.lane.b32.xlu1 %v5973_v13, %s10772_s15  ;;  %v10775_v13 = vld [vmem:[#allocation99_spill] sm:$0xff]  ;;  %v8456_v51 = vpop.permute.xlu0 %5679 }
 0x16a   : > { %v2871_v15 = vsel %vm10471_vm7, %v10775_v13, %v5616_v50  ;;  %v10777_v50 = vld [vmem:[#allocation28_spill] sm:$0xff] }
 0x16b   : > { %v8458_v55 = vpop.permute.xlu1 %5694  ;;  %v2891_v23 = vsel %vm10472_vm8, %v2871_v15, %v5621_v33  ;;  %v10779_v13 = vpack.i.bf16 %v10777_v50, %v10778_v40  ;;  %v910_v33 = vsel %vm792_vm4, %v908_v6, %v909_v30  ;;  %v918_v15 = vrot.slane %v8113_v31, 7 }
 0x16c   : > { %v5637_v50 = vunpack.i.h.bf16 %v8316_v49  ;;  %v5636_v40 = vunpack.i.l.bf16 %v8316_v49  ;;  %v6418_v49 = vld [vmem:[%s10158_s2 + $0x80] ss:$12 sps:$4 sm:$0xff]   ;;  %vm2293_vm4 = vcmask 424960  }
 0x16d   : > { %5969 = vrot.lane.b32.xlu0 %v10779_v13, %s10776_s14  ;;  %5984 = vrot.lane.b32.xlu1 %v5983_v60, %s10749_s13  ;;  %v2911_v60 = vsel %vm2083_vm9, %v2891_v23, %v5626_v34  ;;  %v8486_v43 = vpop.permute.xlu0 %5689  ;;  %v2932_v13 = vsel %vm2104_vm10, %v2912_v54, %v5632_v4  ;;  %v6003_v34 = vpack.i.bf16 %v910_v33, %v911_v5  ;;  %v5646_v23 = vunpack.i.l.bf16 %v8338_v8  ;;  %v10785_v8 = vld [vmem:[#allocation66_spill] sm:$0xff] }
 0x16e   : > { %v2931_v6 = vsel %vm2104_vm10, %v2911_v60, %v5631_v22  ;;  %v920_v46 = vsel %vm834_vm6, %v918_v15, %v919_v47  ;;  %v921_v4 = vsel %vm834_vm6, %v10783_v52, %v918_v15  ;;  %4962 = vmatprep.subr.bf16.mxu1 %v6418_v49  ;;  %v2952_v29 = vsel %vm10478_vm11, %v2932_v13, %v5637_v50  ;;  %v6419_v15 = vld [vmem:[%s10158_s2 + $0x98] ss:$0 sps:$4 sm:$0x33]  }
 0x16f   : > { %v8488_v30 = vpop.permute.xlu1 %5704  ;;  %v2951_v22 = vsel %vm10478_vm11, %v2931_v6, %v5636_v40  ;;  %4963 = vmatpush3.bf16.msra.mxu1 %v6418_v49  ;;  %v2972_v33 = vsel %vm2146_vm12, %v2952_v29, %v5642_v57  ;;  %v5651_v5 = vunpack.i.l.bf16 %v8378_v24  ;;  %v10786_v40 = vld [vmem:[#allocation63_spill] sm:$0xff]  ;;  %v6013_v50 = vpack.i.bf16 %v920_v46, %v921_v4 }
 0x170   : > { %v2971_v47 = vsel %vm2146_vm12, %v2951_v22, %v5641_v0  ;;  %v10787_v60 = vpack.i.bf16 %v10785_v8, %v10786_v40  ;;  %5084 = vmatprep.subr.msk.bf16.mxu1 %vm10470_vm13, %v6419_v15  ;;  %v3309_v0 = vsel %vm10470_vm13, %v6419_v15, 0  ;;  %v2992_v6 = vsel %vm2167_vm14, %v2972_v33, %v5647_v10 }
 0x171   : > { %5979 = vrot.lane.b32.xlu0 %v5978_v9, %s10460_s21  ;;  %5994 = vrot.lane.b32.xlu1 %v5993_v11, %s10458_s16  ;;  %v8509_v9 = vpop.permute.xlu0 %5699  ;;  %s10784_s16 = smov 52   ;;  %v2991_v54 = vsel %vm2167_vm14, %v2971_v47, %v5646_v23  ;;  %v5612_v49 = vunpack.i.h.bf16 %v8284_v38  ;;  %v3012_v52 = vsel %vm2188_vm15, %v2992_v6, %v5651_v5  ;;  %v928_v10 = vrot.slane %v8400_v19, 1  ;;  %s10791_s21 = smov 60   ;;  %v10794_v47 = vld [vmem:[#allocation11_spill] sm:$0xff] }
 0x172   : > { %v10795_v33 = vrot.slane %v10794_v47, 1  ;;  %v937_v15 = vrot.slane %v8400_v19, 2  ;;  %vm2314_vm6 = vcmask 457728   ;;  %vm10475_vm13 = vcmask 490496  }
 0x173   : > { %v8511_v11 = vpop.permute.xlu1 %5714  ;;  %4965 = vmatpush3.bf16.msra.mxu1 %v3309_v0  ;;  %v3011_v4 = vsel %vm2188_vm15, %v2991_v54, %v5612_v49  ;;  %v10798_v54 = vrot.slane %v10794_v47, 2  ;;  %v946_v49 = vrot.slane %v8400_v19, 3 }
 0x174   : > { %v6023_v38 = vpack.i.bf16 %v3012_v52, %v3011_v4  ;;  %v933_v5 = vsel %vm578_vm0, %v928_v10, %v10795_v33 }
 0x175   : > { %5989 = vrot.lane.b32.xlu0 %v10787_v60, %s10784_s16  ;;  %6004 = vrot.lane.b32.xlu1 %v6003_v34, %s10760_s30  ;;  %v8528_v13 = vpop.permute.xlu0 %5709  ;;  %v10789_v34 = vld [vmem:[#allocation84_spill] sm:$0xff]  ;;  %v942_v6 = vsel %vm620_vm1, %v937_v15, %v10798_v54 }
 0x176   : > { %v8538_v46 = vpack.i.bf16 %v7222_v44, %v10789_v34  ;;  %v6033_v44 = vpack.i.bf16 %v8400_v19, %v8332_v2 }
 0x177   : > { %v8530_v57 = vpop.permute.xlu1 %5724 }
 0x179   : > { %5999 = vrot.lane.b32.xlu0 %v8347_v3, %s10788_s25  ;;  %6014 = vrot.lane.b32.xlu1 %v6013_v50, %s10790_s22  ;;  %v8543_v23 = vpop.permute.xlu0 %5719  ;;  %v10793_v3 = vrot.slane %v8332_v2, 1  ;;  %s10796_s22 = smov 12   ;;  %v10797_v50 = vrot.slane %v8332_v2, 2 }
 0x17b   : > { %v8545_v22 = vpop.permute.xlu1 %5734  ;;  %v929_v29 = vsel %vm578_vm0, %v10793_v3, %v928_v10  ;;  %v938_v0 = vsel %vm620_vm1, %v10797_v50, %v937_v15  ;;  %v5656_v15 = vunpack.i.l.bf16 %v8356_v53  ;;  %v10802_v50 = vrot.slane %v8332_v2, 3 }
 0x17c   : > { %v6043_v60 = vpack.i.bf16 %v933_v5, %v929_v29  ;;  %v8589_v29 = vpack.i.bf16 %v6740_v32, %v6752_v37  ;;  %v6053_v33 = vpack.i.bf16 %v942_v6, %v938_v0  ;;  %v5657_v5 = vunpack.i.h.bf16 %v8356_v53 }
 0x17d   : > { %6009 = vrot.lane.b32.xlu0 %v8538_v46, %s10791_s21  ;;  %6024 = vrot.lane.b32.xlu1 %v6023_v38, %s10792_s0  ;;  %v8561_v8 = vpop.permute.xlu0 %5729  ;;  %v10800_v38 = vld [vmem:[#allocation115_spill] sm:$0xff]  ;;  %v947_v54 = vsel %vm662_vm2, %v10802_v50, %v946_v49  ;;  %v5661_v0 = vunpack.i.l.bf16 %v8402_v25  ;;  %vm2209_vm0 = vcmask 293888   ;;  %vm2230_vm1 = vcmask 326656  }
 0x17e   : > { %v5181_v3 = vunpack.i.l.bf16 %v10800_v38 }
 0x17f   : > { %v8563_v40 = vpop.permute.xlu1 %5744 }
 0x181   : > { %6019 = vrot.lane.b32.xlu0 %v8366_v12, %s10796_s22  ;;  %6034 = vrot.lane.b32.xlu1 %v6033_v44, %s10766_s20  ;;  %v8577_v52 = vpop.permute.xlu0 %5739  ;;  %v10799_v12 = vld [vmem:[#allocation114_spill] sm:$0xff]  ;;  %v5182_v44 = vunpack.i.h.bf16 %v10800_v38  ;;  %s10801_s20 = smov 36   ;;  %v10804_v38 = vld [vmem:[#allocation27_spill] sm:$0xff] }
 0x182   : > { %v5192_v4 = vunpack.i.h.bf16 %v10799_v12  ;;  %v5191_v10 = vunpack.i.l.bf16 %v10799_v12  ;;  %v10803_v12 = vrot.slane %v10794_v47, 3  ;;  %v6048_v37 = vpack.i.bf16 %v10805_v26, %v10804_v38  ;;  %v10807_v26 = vld [vmem:[#allocation116_spill] sm:$0xff] }
 0x183   : > { %v8579_v34 = vpop.permute.xlu1 %5754  ;;  %v5197_v38 = vunpack.i.h.bf16 %v10807_v26  ;;  %v5196_v58 = vunpack.i.l.bf16 %v10807_v26  ;;  %v5667_v26 = vunpack.i.h.bf16 %v8380_v63  ;;  %v10813_v63 = vld [vmem:[#allocation118_spill] sm:$0xff] }
 0x184   : > { %v8612_v2 = vsel %vm10471_vm7, %v10738_v62, %v5192_v4  ;;  %v8616_v50 = vsel %vm10471_vm7, %v6697_v7, %v5191_v10  ;;  %v10808_v7 = vrot.slane %v10794_v47, 4  ;;  %v10809_v4 = vrot.slane %v8400_v19, 4 }
 0x185   : > { %6029 = vrot.lane.b32.xlu0 %v8413_v56, %s10801_s20  ;;  %6044 = vrot.lane.b32.xlu1 %v6043_v60, %s10769_s17  ;;  %v951_v56 = vsel %vm662_vm2, %v946_v49, %v10803_v12  ;;  %v5662_v60 = vunpack.i.h.bf16 %v8402_v25  ;;  %v8606_v6 = vpop.permute.xlu0 %5749  ;;  %v10806_v49 = vld [vmem:[#allocation12_spill] sm:$0xff]  ;;  %v8625_v25 = vsel %vm10471_vm7, %v10794_v47, %v5181_v3  ;;  %v5672_v47 = vunpack.i.h.bf16 %v8428_v42  ;;  %s10820_s17 = smov 32  }
 0x186   : > { %v8620_v12 = vsel %vm10471_vm7, %v10806_v49, %v5182_v44  ;;  %v6063_v62 = vpack.i.bf16 %v951_v56, %v947_v54  ;;  %v956_v10 = vsel %vm704_vm3, %v10809_v4, %v10808_v7  ;;  %v10810_v44 = vld [vmem:[#allocation103_spill] sm:$0xff]  ;;  %v10811_v3 = vld [vmem:[#allocation104_spill] sm:$0xff]  ;;  %v5671_v19 = vunpack.i.l.bf16 %v8428_v42 }
 0x187   : > { %v8608_v53 = vpop.permute.xlu1 %5764  ;;  %v2874_v49 = vsel %vm10471_vm7, %v10810_v44, %v5657_v5  ;;  %v2873_v31 = vsel %vm10471_vm7, %v10811_v3, %v5656_v15  ;;  %v2049_v5 = vsel %vm10471_vm7, %v10768_v59, %v5197_v38  ;;  %v10812_v15 = vld [vmem:[#allocation117_spill] sm:$0xff]  ;;  %v5207_v3 = vunpack.i.h.bf16 %v10813_v63  ;;  %v10814_v42 = vld [vmem:[#allocation48_spill] sm:$0xff] }
 0x188   : > { %v2893_v54 = vsel %vm10472_vm8, %v2873_v31, %v5661_v0  ;;  %v5187_v4 = vunpack.i.h.bf16 %v10812_v15  ;;  %v5186_v44 = vunpack.i.l.bf16 %v10812_v15  ;;  %v8658_v31 = vsel %vm10471_vm7, %v10739_v20, %v5196_v58  ;;  %v10815_v0 = vld [vmem:[#allocation47_spill] sm:$0xff] }
 0x189   : > { %6039 = vrot.lane.b32.xlu0 %v8589_v29, %s10771_s26  ;;  %6054 = vrot.lane.b32.xlu1 %v6053_v33, %s10772_s15  ;;  %v2894_v33 = vsel %vm10472_vm8, %v2874_v49, %v5662_v60  ;;  %v8647_v56 = vpop.permute.xlu0 %5759  ;;  %v5206_v60 = vunpack.i.l.bf16 %v10813_v63  ;;  %v6058_v49 = vpack.i.bf16 %v10815_v0, %v10814_v42  ;;  %v6073_v59 = vpack.i.bf16 %v8037_v14, %v956_v10  ;;  %s10819_s15 = smov 48  }
 0x18a   : > { %v5677_v38 = vunpack.i.h.bf16 %v8404_v28  ;;  %v5676_v15 = vunpack.i.l.bf16 %v8404_v28  ;;  %v2913_v1 = vsel %vm2083_vm9, %v2893_v54, %v5666_v41  ;;  %v2914_v58 = vsel %vm2083_vm9, %v2894_v33, %v5667_v26  ;;  %v10816_v28 = vld [vmem:[#allocation13_spill] sm:$0xff] }
 0x18b   : > { %v8649_v7 = vpop.permute.xlu1 %5774  ;;  %v2933_v20 = vsel %vm2104_vm10, %v2913_v1, %v5671_v19  ;;  %v2934_v63 = vsel %vm2104_vm10, %v2914_v58, %v5672_v47  ;;  %v5681_v0 = vunpack.i.l.bf16 %v8456_v51  ;;  %v2045_v14 = vsel %vm10471_vm7, %v6715_v18, %v5187_v4  ;;  %v10817_v1 = vld [vmem:[#allocation124_spill] sm:$0xff] }
 0x18c   : > { %v2044_v41 = vsel %vm10471_vm7, %v10816_v28, %v5186_v44  ;;  %v8684_v10 = vsel %vm10471_vm7, %v6748_v35, %v5207_v3  ;;  %v5236_v26 = vunpack.i.l.bf16 %v10817_v1  ;;  %v8689_v33 = vsel %vm10471_vm7, %v6740_v32, %v5206_v60 }
 0x18d   : > { %6049 = vrot.lane.b32.xlu0 %v6048_v37, %s10776_s14  ;;  %6064 = vrot.lane.b32.xlu1 %v6063_v62, %s10749_s13  ;;  %v5682_v37 = vunpack.i.h.bf16 %v8456_v51  ;;  %v8674_v42 = vpop.permute.xlu0 %5769  ;;  %v10818_v51 = vld [vmem:[#allocation119_spill] sm:$0xff]  ;;  %v5237_v47 = vunpack.i.h.bf16 %v10817_v1  ;;  %v5687_v18 = vunpack.i.h.bf16 %v8430_v21  ;;  %v5686_v19 = vunpack.i.l.bf16 %v8430_v21  ;;  %v10823_v1 = vld [vmem:[#allocation65_spill] sm:$0xff] }
 0x18e   : > { %v2953_v4 = vsel %vm10478_vm11, %v2933_v20, %v5676_v15  ;;  %v2954_v44 = vsel %vm10478_vm11, %v2934_v63, %v5677_v38  ;;  %v5691_v58 = vunpack.i.l.bf16 %v8486_v43  ;;  %v5227_v21 = vunpack.i.h.bf16 %v7680_v45  ;;  %v10821_v20 = vld [vmem:[#allocation125_spill] sm:$0xff] }
 0x18f   : > { %v8676_v62 = vpop.permute.xlu1 %5784  ;;  %v2973_v32 = vsel %vm2146_vm12, %v2953_v4, %v5681_v0  ;;  %v2974_v60 = vsel %vm2146_vm12, %v2954_v44, %v5682_v37  ;;  %v5226_v15 = vunpack.i.l.bf16 %v7680_v45  ;;  %v5247_v38 = vunpack.i.h.bf16 %v10821_v20  ;;  %v10822_v37 = vld [vmem:[#allocation64_spill] sm:$0xff] }
 0x190   : > { %v2066_v63 = vsel %vm10472_vm8, %v2045_v14, %v5237_v47  ;;  %v5697_v0 = vunpack.i.h.bf16 %v8458_v55  ;;  %v10824_v4 = vpack.i.bf16 %v10822_v37, %v10823_v1  ;;  %v5696_v45 = vunpack.i.l.bf16 %v8458_v55 }
 0x191   : > { %6059 = vrot.lane.b32.xlu0 %v6058_v49, %s10819_s15  ;;  %6074 = vrot.lane.b32.xlu1 %v6073_v59, %s10820_s17  ;;  %v8703_v28 = vpop.permute.xlu0 %5779  ;;  %v2065_v59 = vsel %vm10472_vm8, %v2044_v41, %v5236_v26  ;;  %v5246_v41 = vunpack.i.l.bf16 %v10821_v20  ;;  %v2993_v26 = vsel %vm2167_vm14, %v2973_v32, %v5686_v19  ;;  %v2994_v44 = vsel %vm2167_vm14, %v2974_v60, %v5687_v18  ;;  %v10826_v60 = vld [vmem:[#allocation109_spill] sm:$0xff] }
 0x192   : > { %v5652_v14 = vunpack.i.h.bf16 %v8378_v24  ;;  %v3014_v47 = vsel %vm2188_vm15, %v2994_v44, %v5691_v58  ;;  %v5702_v3 = vunpack.i.h.bf16 %v8509_v9  ;;  %v5701_v37 = vunpack.i.l.bf16 %v8509_v9  ;;  %v10825_v24 = vld [vmem:[#allocation126_spill] sm:$0xff] }
 0x193   : > { %v8705_v49 = vpop.permute.xlu1 %5794  ;;  %v2063_v20 = vsel %vm10472_vm8, %v8625_v25, %v5226_v15  ;;  %v2064_v55 = vsel %vm10472_vm8, %v8620_v12, %v5227_v21  ;;  %v8736_v18 = vsel %vm10472_vm8, %v2049_v5, %v5247_v38  ;;  %v5242_v19 = vunpack.i.h.bf16 %v10825_v24  ;;  %v10827_v25 = vld [vmem:[#allocation25_spill] sm:$0xff]  ;;  %v10828_v12 = vld [vmem:[#allocation35_spill] sm:$0xff]  ;;  %v10829_v5 = vld [vmem:[#allocation102_spill] sm:$0xff] }
 0x194   : > { %v5241_v32 = vunpack.i.l.bf16 %v10825_v24  ;;  %v2876_v9 = vsel %vm10471_vm7, %v10826_v60, %v5697_v0  ;;  %v3013_v58 = vsel %vm2188_vm15, %v2993_v26, %v5652_v14  ;;  %v6103_v21 = vpack.i.bf16 %v10828_v12, %v10827_v25 }
 0x195   : > { %6069 = vrot.lane.b32.xlu0 %v10824_v4, %s10784_s16  ;;  %6084 = vrot.lane.b32.xlu1 %v7782_v61, %s10791_s21  ;;  %v8727_v1 = vpop.permute.xlu0 %5789  ;;  %v2875_v15 = vsel %vm10471_vm7, %v10829_v5, %v5696_v45  ;;  %v5707_v38 = vunpack.i.h.bf16 %v8488_v30  ;;  %v5706_v44 = vunpack.i.l.bf16 %v8488_v30  ;;  %v6088_v24 = vpack.i.bf16 %v3014_v47, %v3013_v58 }
 0x196   : > { %v2896_v0 = vsel %vm10472_vm8, %v2876_v9, %v5702_v3  ;;  %v5712_v26 = vunpack.i.h.bf16 %v8528_v13  ;;  %v5711_v14 = vunpack.i.l.bf16 %v8528_v13  ;;  %v8763_v45 = vsel %vm10472_vm8, %v8658_v31, %v5246_v41  ;;  %v10831_v41 = vld [vmem:[#allocation68_spill] sm:$0xff] }
 0x197   : > { %v8729_v4 = vpop.permute.xlu1 %5804  ;;  %v8767_v30 = vsel %vm10472_vm8, %v8612_v2, %v5242_v19  ;;  %v5287_v3 = vunpack.i.h.bf16 %v7741_v17  ;;  %v5286_v47 = vunpack.i.l.bf16 %v7741_v17  ;;  %v8774_v13 = vsel %vm10472_vm8, %v8616_v50, %v5241_v32  ;;  %v10832_v2 = vld [vmem:[#allocation73_spill] sm:$0xff] }
 0x198   : > { %v6098_v31 = vpack.i.bf16 %v6750_v36, %v6748_v35  ;;  %v6113_v19 = vpack.i.bf16 %v10832_v2, %v10831_v41  ;;  %v5717_v58 = vunpack.i.h.bf16 %v8511_v11  ;;  %v5716_v17 = vunpack.i.l.bf16 %v8511_v11 }
 0x199   : > { %6079 = vrot.lane.b32.xlu0 %v8538_v46, %s10788_s25  ;;  %6094 = vrot.lane.b32.xlu1 %v8589_v29, %s10801_s20  ;;  %v2895_v46 = vsel %vm10472_vm8, %v2875_v15, %v5701_v37  ;;  %v8757_v29 = vpop.permute.xlu0 %5799  ;;  %v10830_v37 = vld [vmem:[#allocation120_spill] sm:$0xff]  ;;  %v2916_v12 = vsel %vm2083_vm9, %v2896_v0, %v5707_v38  ;;  %v5722_v5 = vunpack.i.h.bf16 %v8543_v23  ;;  %v5721_v35 = vunpack.i.l.bf16 %v8543_v23  ;;  %v10834_v23 = vld [vmem:[#allocation54_spill] sm:$0xff] }
 0x19a   : > { %v2915_v25 = vsel %vm2083_vm9, %v2895_v46, %v5706_v44  ;;  %v2936_v32 = vsel %vm2104_vm10, %v2916_v12, %v5712_v26  ;;  %v2087_v11 = vsel %vm2083_vm9, %v2066_v63, %v5287_v3  ;;  %v5282_v44 = vunpack.i.h.bf16 %v7749_v39  ;;  %v10833_v26 = vld [vmem:[#allocation46_spill] sm:$0xff] }
 0x19b   : > { %v8759_v60 = vpop.permute.xlu1 %5814  ;;  %v2935_v50 = vsel %vm2104_vm10, %v2915_v25, %v5711_v14  ;;  %v5281_v38 = vunpack.i.l.bf16 %v7749_v39  ;;  %v5337_v0 = vunpack.i.h.bf16 %v7786_v48  ;;  %v5336_v46 = vunpack.i.l.bf16 %v7786_v48 }
 0x19c   : > { %v6108_v14 = vpack.i.bf16 %v10834_v23, %v10833_v26  ;;  %v5727_v41 = vunpack.i.h.bf16 %v8530_v57  ;;  %v2955_v63 = vsel %vm10478_vm11, %v2935_v50, %v5716_v17  ;;  %v2956_v3 = vsel %vm10478_vm11, %v2936_v32, %v5717_v58 }
 0x19d   : > { %6089 = vrot.lane.b32.xlu0 %v6088_v24, %s10792_s0  ;;  %6104 = vrot.lane.b32.xlu1 %v6103_v21, %s10776_s14  ;;  %v8790_v21 = vpop.permute.xlu0 %5809  ;;  %v2086_v24 = vsel %vm2083_vm9, %v2065_v59, %v5286_v47  ;;  %v5726_v59 = vunpack.i.l.bf16 %v8530_v57  ;;  %v2975_v47 = vsel %vm2146_vm12, %v2955_v63, %v5721_v35  ;;  %v2976_v48 = vsel %vm2146_vm12, %v2956_v3, %v5722_v5  ;;  %v10835_v5 = vld [vmem:[#allocation57_spill] sm:$0xff]  ;;  %v10837_v3 = vld [vmem:[#allocation36_spill] sm:$0xff] }
 0x19e   : > { %v5731_v2 = vunpack.i.l.bf16 %v8561_v8  ;;  %v2085_v57 = vsel %vm2083_vm9, %v2064_v55, %v5282_v44  ;;  %v5332_v17 = vunpack.i.h.bf16 %v7792_v16  ;;  %v5331_v58 = vunpack.i.l.bf16 %v7792_v16 }
 0x19f   : > { %v8792_v15 = vpop.permute.xlu1 %5824  ;;  %v2107_v50 = vsel %vm2104_vm10, %v2086_v24, %v5336_v46  ;;  %v5737_v32 = vunpack.i.h.bf16 %v8545_v22  ;;  %v2108_v35 = vsel %vm2104_vm10, %v2087_v11, %v5337_v0  ;;  %v2995_v63 = vsel %vm2167_vm14, %v2975_v47, %v5726_v59  ;;  %v10836_v59 = vld [vmem:[#allocation145_spill] sm:$0xff]  ;;  %v10838_v47 = vld [vmem:[#allocation107_spill] sm:$0xff] }
 0x1a0   : > { %v2996_v55 = vsel %vm2167_vm14, %v2976_v48, %v5727_v41  ;;  %v5692_v44 = vunpack.i.h.bf16 %v8486_v43  ;;  %v5742_v24 = vunpack.i.h.bf16 %v8577_v52  ;;  %v2106_v0 = vsel %vm2104_vm10, %v2085_v57, %v5332_v17  ;;  %v10841_v57 = vld [vmem:[#allocation108_spill] sm:$0xff] }
 0x1a1   : > { %6099 = vrot.lane.b32.xlu0 %v6098_v31, %s10771_s26  ;;  %6114 = vrot.lane.b32.xlu1 %v6113_v19, %s10784_s16  ;;  %v8812_v25 = vpop.permute.xlu0 %5819  ;;  %v2084_v19 = vsel %vm2083_vm9, %v2063_v20, %v5281_v38  ;;  %v5736_v20 = vunpack.i.l.bf16 %v8545_v22  ;;  %v3016_v16 = vsel %vm2188_vm15, %v2996_v55, %v5731_v2  ;;  %v5741_v38 = vunpack.i.l.bf16 %v8577_v52  ;;  %v10839_v2 = vld [vmem:[#allocation34_spill] sm:$0xff] }
 0x1a2   : > { %v2105_v11 = vsel %vm2104_vm10, %v2084_v19, %v5331_v58  ;;  %v5387_v22 = vunpack.i.h.bf16 %v10836_v59  ;;  %v5386_v41 = vunpack.i.l.bf16 %v10836_v59  ;;  %v5381_v43 = vunpack.i.l.bf16 %v10837_v3  ;;  %v10840_v19 = vld [vmem:[#allocation33_spill] sm:$0xff] }
 0x1a3   : > { %v8814_v12 = vpop.permute.xlu1 %5834  ;;  %v2878_v48 = vsel %vm10471_vm7, %v10838_v47, %v5737_v32  ;;  %v3015_v52 = vsel %vm2188_vm15, %v2995_v63, %v5692_v44  ;;  %v6143_v58 = vpack.i.bf16 %v10840_v19, %v10839_v2  ;;  %v2877_v17 = vsel %vm10471_vm7, %v10841_v57, %v5736_v20  ;;  %v10845_v57 = vld [vmem:[#allocation72_spill] sm:$0xff] }
 0x1a4   : > { %v5747_v55 = vunpack.i.h.bf16 %v8563_v40  ;;  %v5746_v59 = vunpack.i.l.bf16 %v8563_v40  ;;  %v6128_v9 = vpack.i.bf16 %v3016_v16, %v3015_v52  ;;  %v2898_v32 = vsel %vm10472_vm8, %v2878_v48, %v5742_v24  ;;  %v10842_v40 = vld [vmem:[#allocation150_spill] sm:$0xff]  ;;  %v10843_v48 = vld [vmem:[#allocation23_spill] sm:$0xff] }
 0x1a5   : > { %6109 = vrot.lane.b32.xlu0 %v6108_v14, %s10819_s15  ;;  %6124 = vrot.lane.b32.xlu1 %v10835_v5, %s10791_s21  ;;  %v8833_v46 = vpop.permute.xlu0 %5829  ;;  %v2897_v47 = vsel %vm10472_vm8, %v2877_v17, %v5741_v38  ;;  %v5751_v63 = vunpack.i.l.bf16 %v8606_v6  ;;  %v2128_v2 = vsel %vm10478_vm11, %v2107_v50, %v5386_v41  ;;  %v2129_v20 = vsel %vm10478_vm11, %v2108_v35, %v5387_v22  ;;  %v10846_v17 = vld [vmem:[#allocation70_spill] sm:$0xff] }
 0x1a6   : > { %v5382_v19 = vunpack.i.h.bf16 %v10837_v3  ;;  %v5436_v16 = vunpack.i.l.bf16 %v10842_v40  ;;  %v2126_v24 = vsel %vm10478_vm11, %v2105_v11, %v5381_v43  ;;  %v5437_v38 = vunpack.i.h.bf16 %v10842_v40 }
 0x1a7   : > { %v8835_v14 = vpop.permute.xlu1 %5844  ;;  %v6153_v50 = vpack.i.bf16 %v10846_v17, %v10845_v57  ;;  %v5757_v35 = vunpack.i.h.bf16 %v8579_v34  ;;  %v5756_v22 = vunpack.i.l.bf16 %v8579_v34  ;;  %v2917_v41 = vsel %vm2083_vm9, %v2897_v47, %v5746_v59  ;;  %v10847_v17 = vld [vmem:[#allocation80_spill] sm:$0xff] }
 0x1a8   : > { %v2918_v11 = vsel %vm2083_vm9, %v2898_v32, %v5747_v55  ;;  %v2937_v3 = vsel %vm2104_vm10, %v2917_v41, %v5751_v63  ;;  %v5762_v43 = vunpack.i.h.bf16 %v8647_v56  ;;  %v5761_v40 = vunpack.i.l.bf16 %v8647_v56  ;;  %v10848_v56 = vld [vmem:[#allocation53_spill] sm:$0xff] }
 0x1a9   : > { %6119 = vrot.lane.b32.xlu0 %v7782_v61, %s10788_s25  ;;  %6134 = vrot.lane.b32.xlu1 %v6098_v31, %s10801_s20  ;;  %v5752_v61 = vunpack.i.h.bf16 %v8606_v6  ;;  %v8858_v31 = vpop.permute.xlu0 %5839  ;;  %v10844_v6 = vld [vmem:[#allocation20_spill] sm:$0xff]  ;;  %v2127_v57 = vsel %vm10478_vm11, %v2106_v0, %v5382_v19  ;;  %v2149_v34 = vsel %vm2146_vm12, %v2128_v2, %v5436_v16  ;;  %v5432_v59 = vunpack.i.h.bf16 %v10847_v17 }
 0x1aa   : > { %v6138_v52 = vpack.i.bf16 %v10844_v6, %v10843_v48  ;;  %v5431_v55 = vunpack.i.l.bf16 %v10847_v17  ;;  %v8891_v32 = vsel %vm2146_vm12, %v2129_v20, %v5437_v38  ;;  %v5767_v47 = vunpack.i.h.bf16 %v8608_v53 }
 0x1ab   : > { %v8860_v44 = vpop.permute.xlu1 %5854  ;;  %v5766_v0 = vunpack.i.l.bf16 %v8608_v53  ;;  %v2957_v2 = vsel %vm10478_vm11, %v2937_v3, %v5756_v22  ;;  %v5777_v16 = vunpack.i.h.bf16 %v8649_v7  ;;  %v5776_v41 = vunpack.i.l.bf16 %v8649_v7  ;;  %v10850_v3 = vld [vmem:[#allocation155_spill] sm:$0xff]  ;;  %v10852_v7 = vld [vmem:[#allocation52_spill] sm:$0xff] }
 0x1ac   : > { %v2977_v20 = vsel %vm2146_vm12, %v2957_v2, %v5761_v40  ;;  %v2147_v53 = vsel %vm2146_vm12, %v2126_v24, %v5431_v55  ;;  %v5781_v22 = vunpack.i.l.bf16 %v8703_v28  ;;  %v10851_v40 = vld [vmem:[#allocation156_spill] sm:$0xff]  ;;  %v5732_v2 = vunpack.i.h.bf16 %v8561_v8  ;;  %v10853_v24 = vld [vmem:[#allocation113_spill] sm:$0xff]  ;;  %v10854_v55 = vld [vmem:[#allocation106_spill] sm:$0xff] }
 0x1ad   : > { %6129 = vrot.lane.b32.xlu0 %v6128_v9, %s10792_s0  ;;  %6144 = vrot.lane.b32.xlu1 %v6143_v58, %s10776_s14  ;;  %v2938_v9 = vsel %vm2104_vm10, %v2918_v11, %v5752_v61  ;;  %v8882_v58 = vpop.permute.xlu0 %5849  ;;  %v10849_v61 = vld [vmem:[#allocation51_spill] sm:$0xff]  ;;  %v5771_v11 = vunpack.i.l.bf16 %v8674_v42  ;;  %vm2251_vm2 = vcmask 359424   ;;  %vm2272_vm3 = vcmask 392192  }
 0x1ae   : > { %v6148_v63 = vpack.i.bf16 %v10849_v61, %v10848_v56  ;;  %v2958_v19 = vsel %vm10478_vm11, %v2938_v9, %v5757_v35  ;;  %v5782_v35 = vunpack.i.h.bf16 %v8703_v28  ;;  %v5486_v9 = vunpack.i.l.bf16 %v10850_v3 }
 0x1af   : > { %v8884_v54 = vpop.permute.xlu1 %5864  ;;  %v2978_v38 = vsel %vm2146_vm12, %v2958_v19, %v5762_v43  ;;  %v5481_v43 = vunpack.i.l.bf16 %v10851_v40  ;;  %v2997_v19 = vsel %vm2167_vm14, %v2977_v20, %v5766_v0  ;;  %v2879_v28 = vsel %vm10471_vm7, %v10854_v55, %v5776_v41  ;;  %v10855_v41 = vld [vmem:[#allocation32_spill] sm:$0xff]  ;;  %v10869_v55 = vld [vmem:[#allocation38_spill] sm:$0xff] }
 0x1b0   : > { %v5787_v56 = vunpack.i.h.bf16 %v8676_v62  ;;  %v2899_v0 = vsel %vm10472_vm8, %v2879_v28, %v5781_v22  ;;  %v8938_v20 = vsel %vm2167_vm14, %v2149_v34, %v5486_v9  ;;  %v5797_v9 = vunpack.i.h.bf16 %v8705_v49  ;;  %v10858_v28 = vld [vmem:[#allocation21_spill] sm:$0xff] }
 0x1b1   : > { %6139 = vrot.lane.b32.xlu0 %v6138_v52, %s10771_s26  ;;  %6154 = vrot.lane.b32.xlu1 %v6153_v50, %s10784_s16  ;;  %v8906_v17 = vpop.permute.xlu0 %5859  ;;  %v2148_v50 = vsel %vm2146_vm12, %v2127_v57, %v5432_v59  ;;  %v2880_v57 = vsel %vm10471_vm7, %v10853_v24, %v5777_v16  ;;  %v2998_v59 = vsel %vm2167_vm14, %v2978_v38, %v5767_v47  ;;  %v5792_v16 = vunpack.i.h.bf16 %v8727_v1  ;;  %v10857_v24 = vld [vmem:[#allocation177_spill] sm:$0xff] }
 0x1b2   : > { %v3018_v61 = vsel %vm2188_vm15, %v2998_v59, %v5771_v11  ;;  %v2900_v8 = vsel %vm10472_vm8, %v2880_v57, %v5782_v35  ;;  %v5791_v47 = vunpack.i.l.bf16 %v8727_v1  ;;  %v5482_v38 = vunpack.i.h.bf16 %v10851_v40  ;;  %v10856_v11 = vld [vmem:[#allocation41_spill] sm:$0xff] }
 0x1b3   : > { %v8908_v39 = vpop.permute.xlu1 %5874  ;;  %v6183_v35 = vpack.i.bf16 %v10856_v11, %v10855_v41  ;;  %v2168_v22 = vsel %vm2167_vm14, %v2147_v53, %v5481_v43  ;;  %v5532_v57 = vunpack.i.h.bf16 %v10857_v24  ;;  %v5531_v1 = vunpack.i.l.bf16 %v10857_v24  ;;  %v10863_v11 = vld [vmem:[#allocation95_spill] sm:$0xff] }
 0x1b4   : > { %v5796_v40 = vunpack.i.l.bf16 %v8705_v49  ;;  %v5802_v43 = vunpack.i.h.bf16 %v8757_v29  ;;  %v2169_v49 = vsel %vm2167_vm14, %v2148_v50, %v5482_v38  ;;  %v5807_v38 = vunpack.i.h.bf16 %v8729_v4 }
 0x1b5   : > { %6149 = vrot.lane.b32.xlu0 %v6148_v63, %s10819_s15  ;;  %6164 = vrot.lane.b32.xlu1 %v10852_v7, %s10791_s21  ;;  %v5786_v63 = vunpack.i.l.bf16 %v8676_v62  ;;  %v8929_v23 = vpop.permute.xlu0 %5869  ;;  %v3017_v62 = vsel %vm2188_vm15, %v2997_v19, %v5732_v2  ;;  %v2920_v2 = vsel %vm2083_vm9, %v2900_v8, %v5787_v56  ;;  %v10859_v56 = vld [vmem:[#allocation22_spill] sm:$0xff]  ;;  %v10860_v8 = vld [vmem:[#allocation69_spill] sm:$0xff]  ;;  %v8972_v41 = vsel %vm2188_vm15, %v2168_v22, %v5531_v1 }
 0x1b6   : > { %v6168_v34 = vpack.i.bf16 %v3018_v61, %v3017_v62  ;;  %v2940_v53 = vsel %vm2104_vm10, %v2920_v2, %v5792_v16  ;;  %v5801_v61 = vunpack.i.l.bf16 %v8757_v29  ;;  %v10862_v62 = vld [vmem:[#allocation173_spill] sm:$0xff]  ;;  %v8975_v29 = vsel %vm2188_vm15, %v2169_v49, %v5532_v57 }
 0x1b7   : > { %v8931_v26 = vpop.permute.xlu1 %5884  ;;  %v5806_v24 = vunpack.i.l.bf16 %v8729_v4  ;;  %v5811_v57 = vunpack.i.l.bf16 %v8790_v21  ;;  %v5816_v49 = vunpack.i.l.bf16 %v8759_v60  ;;  %v10864_v4 = vld [vmem:[#allocation50_spill] sm:$0xff]  ;;  %v5772_v50 = vunpack.i.h.bf16 %v8674_v42  ;;  %v10873_v42 = vld [vmem:[#allocation67_spill] sm:$0xff] }
 0x1b8   : > { %v5822_v6 = vunpack.i.h.bf16 %v8812_v25 }
 0x1b9   : > { %6159 = vrot.lane.b32.xlu0 %v10835_v5, %s10788_s25  ;;  %6174 = vrot.lane.b32.xlu1 %v6138_v52, %s10801_s20  ;;  %v2919_v5 = vsel %vm2083_vm9, %v2899_v0, %v5786_v63  ;;  %v8954_v19 = vpop.permute.xlu0 %5879  ;;  %v6178_v63 = vpack.i.bf16 %v10859_v56, %v10858_v28  ;;  %v10861_v0 = vld [vmem:[#allocation79_spill] sm:$0xff]  ;;  %v5826_v56 = vunpack.i.l.bf16 %v8792_v15 }
 0x1ba   : > { %v2939_v59 = vsel %vm2104_vm10, %v2919_v5, %v5791_v47  ;;  %v6193_v47 = vpack.i.bf16 %v10861_v0, %v10860_v8 }
 0x1bb   : > { %v8956_v52 = vpop.permute.xlu1 %5894 }
 0x1bd   : > { %6169 = vrot.lane.b32.xlu0 %v6168_v34, %s10792_s0  ;;  %6184 = vrot.lane.b32.xlu1 %v6183_v35, %s10776_s14  ;;  %v2959_v34 = vsel %vm10478_vm11, %v2939_v59, %v5796_v40  ;;  %v2960_v35 = vsel %vm10478_vm11, %v2940_v53, %v5797_v9  ;;  %v8982_v5 = vpop.permute.xlu0 %5889  ;;  %v10865_v40 = vld [vmem:[#allocation62_spill] sm:$0xff]  ;;  %v5817_v9 = vunpack.i.h.bf16 %v8759_v60  ;;  %v5821_v53 = vunpack.i.l.bf16 %v8812_v25  ;;  %v10868_v60 = vld [vmem:[#allocation40_spill] sm:$0xff] }
 0x1be   : > { %v2979_v22 = vsel %vm2146_vm12, %v2959_v34, %v5801_v61  ;;  %v2980_v1 = vsel %vm2146_vm12, %v2960_v35, %v5802_v43  ;;  %v6188_v59 = vpack.i.bf16 %v10865_v40, %v10864_v4  ;;  %v10866_v34 = vld [vmem:[#allocation31_spill] sm:$0xff]  ;;  %v10867_v35 = vld [vmem:[#allocation24_spill] sm:$0xff]  ;;  %v6223_v40 = vpack.i.bf16 %v10869_v55, %v10868_v60  ;;  %v10870_v4 = vld [vmem:[#allocation61_spill] sm:$0xff] }
 0x1bf   : > { %v8984_v2 = vpop.permute.xlu1 %5904  ;;  %v2999_v43 = vsel %vm2167_vm14, %v2979_v22, %v5806_v24  ;;  %v3000_v61 = vsel %vm2167_vm14, %v2980_v1, %v5807_v38  ;;  %v9002_v16 = vpack.i.bf16 %v10867_v35, %v10866_v34  ;;  %v10871_v24 = vld [vmem:[#allocation56_spill] sm:$0xff]  ;;  %v10876_v34 = vld [vmem:[#allocation111_spill] sm:$0xff]  ;;  %v5872_v25 = vunpack.i.h.bf16 %v8929_v23 }
 0x1c0   : > { %v10872_v38 = vld [vmem:[#allocation112_spill] sm:$0xff]  ;;  %v2882_v55 = vsel %vm10471_vm7, %v10876_v34, %v5817_v9  ;;  %v5837_v35 = vunpack.i.h.bf16 %v8814_v12  ;;  %v5836_v9 = vunpack.i.l.bf16 %v8814_v12  ;;  %v5881_v34 = vunpack.i.l.bf16 %v8954_v19 }
 0x1c1   : > { %6179 = vrot.lane.b32.xlu0 %v6178_v63, %s10771_s26  ;;  %6194 = vrot.lane.b32.xlu1 %v6193_v47, %s10784_s16  ;;  %v5900_v8 = vpop.permute.xlu0 %5899  ;;  %v3020_v47 = vsel %vm2188_vm15, %v3000_v61, %v5811_v57  ;;  %v2881_v1 = vsel %vm10471_vm7, %v10872_v38, %v5816_v49  ;;  %v10874_v57 = vld [vmem:[#allocation77_spill] sm:$0xff]  ;;  %v10875_v61 = vld [vmem:[#allocation75_spill] sm:$0xff]  ;;  %v3019_v49 = vsel %vm2188_vm15, %v2999_v43, %v5772_v50  ;;  %v5827_v38 = vunpack.i.h.bf16 %v8792_v15 }
 0x1c2   : > { %v2901_v60 = vsel %vm10472_vm8, %v2881_v1, %v5821_v53  ;;  %v6208_v48 = vpack.i.bf16 %v3020_v47, %v3019_v49  ;;  %v5882_v53 = vunpack.i.h.bf16 %v8954_v19  ;;  %vm10474_vm7 = vcmask 523264  }
 0x1c3   : > { %v8998_v0 = vpop.permute.xlu1 %5914  ;;  %v2902_v15 = vsel %vm10472_vm8, %v2882_v55, %v5822_v6  ;;  %v2921_v50 = vsel %vm2083_vm9, %v2901_v60, %v5826_v56  ;;  %v5891_v43 = vunpack.i.l.bf16 %v8982_v5  ;;  %v5832_v12 = vunpack.i.h.bf16 %v8833_v46 }
 0x1c4   : > { %v5831_v47 = vunpack.i.l.bf16 %v8833_v46  ;;  %v5902_v1 = vunpack.i.h.bf16 %v5900_v8  ;;  %v5901_v19 = vunpack.i.l.bf16 %v5900_v8  ;;  %v2211_v56 = vsel %vm2209_vm0, %v8975_v29, %v5872_v25 }
 0x1c5   : > { %6189 = vrot.lane.b32.xlu0 %v6188_v59, %s10819_s15  ;;  %6204 = vrot.lane.b32.xlu1 %v10873_v42, %s10791_s21  ;;  %v5871_v59 = vunpack.i.l.bf16 %v8929_v23  ;;  %v5910_v22 = vpop.permute.xlu0 %5909  ;;  %v5892_v23 = vunpack.i.h.bf16 %v8982_v5  ;;  %vm10473_vm8 = vcmask 818176   ;;  %v2232_v8 = vsel %vm2230_vm1, %v2211_v56, %v5882_v53 }
 0x1c6   : > { %v5912_v55 = vunpack.i.h.bf16 %v5910_v22  ;;  %v5911_v60 = vunpack.i.l.bf16 %v5910_v22  ;;  %v2941_v22 = vsel %vm2104_vm10, %v2921_v50, %v5831_v47  ;;  %v5846_v47 = vunpack.i.l.bf16 %v8835_v14 }
 0x1c7   : > { %v9026_v36 = vpop.permute.xlu1 %5924  ;;  %v2210_v6 = vsel %vm2209_vm0, %v8972_v41, %v5871_v59  ;;  %v2253_v41 = vsel %vm2251_vm2, %v2232_v8, %v5892_v23 }
 0x1c8   : > { %v2231_v46 = vsel %vm2230_vm1, %v2210_v6, %v5881_v34  ;;  %v2274_v34 = vsel %vm2272_vm3, %v2253_v41, %v5902_v1 }
 0x1c9   : > { %6199 = vrot.lane.b32.xlu0 %v10852_v7, %s10788_s25  ;;  %6214 = vrot.lane.b32.xlu1 %v6178_v63, %s10801_s20  ;;  %v5920_v5 = vpop.permute.xlu0 %5919  ;;  %v2922_v7 = vsel %vm2083_vm9, %v2902_v15, %v5827_v38  ;;  %v5847_v63 = vunpack.i.h.bf16 %v8835_v14  ;;  %v2252_v28 = vsel %vm2251_vm2, %v2231_v46, %v5891_v43  ;;  %v5841_v38 = vunpack.i.l.bf16 %v8858_v31 }
 0x1ca   : > { %v5922_v59 = vunpack.i.h.bf16 %v5920_v5  ;;  %v5921_v29 = vunpack.i.l.bf16 %v5920_v5  ;;  %v2273_v25 = vsel %vm2272_vm3, %v2252_v28, %v5901_v19  ;;  %v2942_v53 = vsel %vm2104_vm10, %v2922_v7, %v5832_v12 }
 0x1cb   : > { %v9045_v49 = vpop.permute.xlu1 %5934  ;;  %v5842_v15 = vunpack.i.h.bf16 %v8858_v31  ;;  %v2294_v23 = vsel %vm2293_vm4, %v2273_v25, %v5911_v60  ;;  %v2295_v43 = vsel %vm2293_vm4, %v2274_v34, %v5912_v55  ;;  %v2961_v28 = vsel %vm10478_vm11, %v2941_v22, %v5836_v9 }
 0x1cc   : > { %v2315_v1 = vsel %vm2314_vm6, %v2294_v23, %v5921_v29  ;;  %v2316_v12 = vsel %vm2314_vm6, %v2295_v43, %v5922_v59  ;;  %v10877_v31 = vpack.i.bf16 %v10875_v61, %v10874_v57  ;;  %v2962_v19 = vsel %vm10478_vm11, %v2942_v53, %v5837_v35  ;;  %v10878_v61 = vld [vmem:[#allocation164_spill] sm:$0xff]  ;;  %v10879_v29 = vld [vmem:[#allocation174_spill] sm:$0xff] }
 0x1cd   : > { %6209 = vrot.lane.b32.xlu0 %v6208_v48, %s10792_s0  ;;  %6224 = vrot.lane.b32.xlu1 %v6223_v40, %s10776_s14  ;;  %v5930_v6 = vpop.permute.xlu0 %5929  ;;  %v2981_v55 = vsel %vm2146_vm12, %v2961_v28, %v5841_v38  ;;  %v2982_v60 = vsel %vm2146_vm12, %v2962_v19, %v5842_v15  ;;  %v5851_v7 = vunpack.i.l.bf16 %v8882_v58  ;;  %v5536_v35 = vunpack.i.l.bf16 %v10862_v62  ;;  %v10882_v23 = vld [vmem:[#allocation60_spill] sm:$0xff] }
 0x1ce   : > { %v5932_v56 = vunpack.i.h.bf16 %v5930_v6  ;;  %v5931_v40 = vunpack.i.l.bf16 %v5930_v6  ;;  %v896_v59 = vrot.slane %v10878_v61, 5  ;;  %v10476_v22 = vrot.slane %v10879_v29, 5 }
 0x1cf   : > { %v5945_v48 = vpop.permute.xlu1 %5944  ;;  %v10880_v25 = vunpack.i.h.bf16 %v10850_v3  ;;  %v5857_v53 = vunpack.i.h.bf16 %v8860_v44  ;;  %v10881_v15 = vpack.i.bf16 %v10871_v24, %v10870_v4  ;;  %v3001_v43 = vsel %vm2167_vm14, %v2981_v55, %v5846_v47  ;;  %v10886_v3 = vld [vmem:[#allocation7_spill] sm:$0xff] }
 0x1d0   : > { %v5947_v5 = vunpack.i.h.bf16 %v5945_v48  ;;  %v5946_v50 = vunpack.i.l.bf16 %v5945_v48  ;;  %v2336_v14 = vsel %vm10475_vm13, %v2315_v1, %v5931_v40  ;;  %v2337_v9 = vsel %vm10475_vm13, %v2316_v12, %v5932_v56  ;;  %v10884_v48 = vld [vmem:[#allocation94_spill] sm:$0xff] }
 0x1d1   : > { %6219 = vrot.lane.b32.xlu0 %v9002_v16, %s10771_s26  ;;  %6234 = vrot.lane.b32.xlu1 %v10877_v31, %s10784_s16  ;;  %v9079_v46 = vpop.permute.xlu0 %5939  ;;  %v2171_v34 = vsel %vm2167_vm14, %v8891_v32, %v10880_v25  ;;  %v10883_v6 = vrot.slane %v10863_v11, 5  ;;  %v10885_v56 = vrot.slane %v10884_v48, 5  ;;  %v5856_v32 = vunpack.i.l.bf16 %v8860_v44 }
 0x1d2   : > { %v3110_v8 = vsel %vm10474_vm7, %v2336_v14, %v5946_v50  ;;  %v3111_v41 = vsel %vm10474_vm7, %v2337_v9, %v5947_v5  ;;  %v3002_v5 = vsel %vm2167_vm14, %v2982_v60, %v5847_v63  ;;  %v5812_v50 = vunpack.i.h.bf16 %v8790_v21  ;;  %v10889_v14 = vld [vmem:[#allocation133_spill] sm:$0xff] }
 0x1d3   : > { %v9083_v57 = vpop.permute.xlu1 %5954  ;;  %v3130_v38 = vpack.c.bf16 %v3111_v41, %v3110_v8  ;;  %v904_v40 = vsel %vm10477_vm5, %v10885_v56, %v10883_v6  ;;  %v3022_v28 = vsel %vm2188_vm15, %v3002_v5, %v5851_v7  ;;  %v5862_v47 = vunpack.i.h.bf16 %v8906_v17  ;;  %v10892_v7 = vld [vmem:[#allocation98_spill] sm:$0xff]  ;;  %v10898_v5 = vld [vmem:[#allocation29_spill] sm:$0xff] }
 0x1d4   : > { %v5861_v1 = vunpack.i.l.bf16 %v8906_v17  ;;  %v10887_v19 = vmov 0   ;;  %v5296_v44 = vunpack.i.l.bf16 %v7751_v27  ;;  %v9122_v63 = vsel %vm2188_vm15, %v8938_v20, %v5536_v35  ;;  %v10893_v41 = vld [vmem:[#allocation110_spill] sm:$0xff] }
 0x1d5   : > { %6229 = vrot.lane.b32.xlu0 %v10881_v15, %s10819_s15  ;;  %6244 = vrot.lane.b32.xlu1 %v10882_v23, %s10791_s21  ;;  %v9114_v12 = vpop.permute.xlu0 %5949  ;;  %v10888_v21 = vunpack.i.h.bf16 %v10862_v62  ;;  %v9133_v17 = vsel %vm10477_vm5, %v896_v59, %v10476_v22  ;;  %v3021_v20 = vsel %vm2188_vm15, %v3001_v43, %v5812_v50  ;;  %v10891_v62 = vld [vmem:[#allocation37_spill] sm:$0xff]  ;;  %v5866_v25 = vunpack.i.l.bf16 %v8884_v54  ;;  %v10899_v50 = vld [vmem:[#allocation30_spill] sm:$0xff] }
 0x1d6   : > { %4667 = vmatmul.mubr.msk.bf16.vlgmr.msra.gmra.mrb[0].mxu0 %vm10473_vm8, %v3130_v38  ;;  %4966 = vmatprep.mubr.msk.bf16.mxu1 %vm10473_vm8, %v3130_v38  ;;  %vm10890_vm8 = vcmask 31744   ;;  %v6263_v8 = vpack.i.bf16 %v10892_v7, %v10891_v62  ;;  %v5867_v38 = vunpack.i.h.bf16 %v8884_v54  ;;  %v5877_v15 = vunpack.i.h.bf16 %v8908_v39 }
 0x1d7   : > { %v9116_v31 = vpop.permute.xlu1 %5964  ;;  %3353 = vmatprep.mubr.bf16.mxu0 %v10887_v19  ;;  %v9127_v55 = vsel %vm2188_vm15, %v2171_v34, %v10888_v21  ;;  %v2884_v60 = vsel %vm10890_vm8, %v904_v40, %v5857_v53  ;;  %vm10894_vm7 = vmmov %vm10890_vm8  ;;  %v6248_v34 = vpack.i.bf16 %v3022_v28, %v3021_v20  ;;  %vm10895_vm8 = vcmask 64512   ;;  %v10901_v21 = vld [vmem:[#allocation163_spill] sm:$0xff] }
 0x1d8   : > { %v2883_v35 = vsel %vm10894_vm7, %v10893_v41, %v5856_v32  ;;  %v2904_v53 = vsel %vm10895_vm8, %v2884_v60, %v5862_v47  ;;  %vm10896_vm13 = vmmov %vm10895_vm8  ;;  %v5876_v43 = vunpack.i.l.bf16 %v8908_v39  ;;  %v5887_v56 = vunpack.i.h.bf16 %v8931_v26  ;;  %v10903_v20 = vld [vmem:[#allocation159_spill] sm:$0xff] }
 0x1d9   : > { %6239 = vrot.lane.b32.xlu0 %v10873_v42, %s10788_s25  ;;  %6254 = vrot.lane.b32.xlu1 %v9002_v16, %s10801_s20  ;;  %v2903_v42 = vsel %vm10896_vm13, %v2883_v35, %v5861_v1  ;;  %v9152_v16 = vpop.permute.xlu0 %5959  ;;  %v5886_v40 = vunpack.i.l.bf16 %v8931_v26  ;;  %v10897_v32 = vrot.slane %v10863_v11, 5  ;;  %v6258_v28 = vpack.i.bf16 %v10899_v50, %v10898_v5  ;;  %v10900_v1 = vld [vmem:[#allocation55_spill] sm:$0xff]  ;;  %v10902_v26 = vld [vmem:[#allocation74_spill] sm:$0xff]  ;;  %vm10912_vm13 = vmmov %vm10894_vm7 }
 0x1da   : > { %v5897_v47 = vunpack.i.h.bf16 %v8956_v52  ;;  %v5896_v39 = vunpack.i.l.bf16 %v8956_v52  ;;  %v6268_v60 = vpack.i.bf16 %v10901_v21, %v10900_v1  ;;  %v6273_v62 = vpack.i.bf16 %v10903_v20, %v10902_v26 }
 0x1db   : > { %v9154_v6 = vpop.permute.xlu1 %5974  ;;  %v903_v54 = vsel %vm10477_vm5, %v10897_v32, %v896_v59  ;;  %v2923_v7 = vsel %vm2083_vm9, %v2903_v42, %v5866_v25  ;;  %v2924_v59 = vsel %vm2083_vm9, %v2904_v53, %v5867_v38  ;;  %v5907_v41 = vunpack.i.h.bf16 %v8984_v2  ;;  %v10904_v42 = vld [vmem:[#allocation93_spill] sm:$0xff]  ;;  %vm10913_vm5 = vmmov %vm10895_vm8 }
 0x1dc   : > { %v5906_v35 = vunpack.i.l.bf16 %v8984_v2  ;;  %v2943_v52 = vsel %vm2104_vm10, %v2923_v7, %v5876_v43  ;;  %v5926_v20 = vunpack.i.l.bf16 %v9026_v36  ;;  %v5937_v7 = vunpack.i.h.bf16 %v9045_v49 }
 0x1dd   : > { %6249 = vrot.lane.b32.xlu0 %v6248_v34, %s10792_s0  ;;  %6264 = vrot.lane.b32.xlu1 %v6263_v8, %s10776_s14  ;;  %v2944_v34 = vsel %vm2104_vm10, %v2924_v59, %v5877_v15  ;;  %v5916_v8 = vunpack.i.l.bf16 %v8998_v0  ;;  %v2963_v26 = vsel %vm10478_vm11, %v2943_v52, %v5886_v40  ;;  %v9192_v15 = vpack.i.bf16 %v10884_v48, %v10904_v42 }
 0x1de   : > { %v2964_v25 = vsel %vm10478_vm11, %v2944_v34, %v5887_v56  ;;  %v2983_v53 = vsel %vm2146_vm12, %v2963_v26, %v5896_v39  ;;  %v5927_v56 = vunpack.i.h.bf16 %v9026_v36  ;;  %v5852_v39 = vunpack.i.h.bf16 %v8882_v58  ;;  %v10906_v34 = vld [vmem:[#allocation171_spill] sm:$0xff]  ;;  %v10907_v26 = vld [vmem:[#allocation162_spill] sm:$0xff] }
 0x1df   : > { %v9179_v32 = vpop.permute.xlu0 %5969  ;;  %v9181_v50 = vpop.permute.xlu1 %5984  ;;  %v2984_v2 = vsel %vm2146_vm12, %v2964_v25, %v5897_v47  ;;  %v3003_v43 = vsel %vm2167_vm14, %v2983_v53, %v5906_v35  ;;  %v5942_v48 = vunpack.i.h.bf16 %v9079_v46  ;;  %v10905_v35 = vld [vmem:[#allocation89_spill] sm:$0xff]  ;;  %v10908_v25 = vld [vmem:[#allocation180_spill] sm:$0xff]  ;;  %v10909_v36 = vld [vmem:[#allocation158_spill] sm:$0xff]  ;;  %v5941_v42 = vunpack.i.l.bf16 %v9079_v46 }
 0x1e0   : > { %v3004_v40 = vsel %vm2167_vm14, %v2984_v2, %v5907_v41  ;;  %v6303_v41 = vpack.i.bf16 %v10906_v34, %v10905_v35  ;;  %v10910_v2 = vld [vmem:[#allocation176_spill] sm:$0xff]  ;;  %v2886_v35 = vsel %vm10894_vm7, %v9133_v17, %v5927_v56  ;;  %v2885_v34 = vsel %vm10912_vm13, %v903_v54, %v5926_v20 }
 0x1e1   : > { %6259 = vrot.lane.b32.xlu0 %v6258_v28, %s10771_s26  ;;  %6274 = vrot.lane.b32.xlu1 %v6273_v62, %s10784_s16  ;;  %v3024_v47 = vsel %vm2188_vm15, %v3004_v40, %v5916_v8  ;;  %v5936_v62 = vunpack.i.l.bf16 %v9045_v49  ;;  %v6313_v58 = vpack.i.bf16 %v10910_v2, %v10909_v36  ;;  %v3023_v8 = vsel %vm2188_vm15, %v3003_v43, %v5852_v39  ;;  %v10911_v40 = vld [vmem:[#allocation97_spill] sm:$0xff] }
 0x1e2   : > { %v5957_v49 = vunpack.i.h.bf16 %v9083_v57  ;;  %v6288_v22 = vpack.i.bf16 %v3024_v47, %v3023_v8  ;;  %v5956_v9 = vunpack.i.l.bf16 %v9083_v57  ;;  %v2906_v43 = vsel %vm10913_vm5, %v2886_v35, %v5937_v7 }
 0x1e3   : > { %v5980_v59 = vpop.permute.xlu0 %5979  ;;  %v9202_v52 = vpop.permute.xlu1 %5994  ;;  %v2905_v38 = vsel %vm10895_vm8, %v2885_v34, %v5936_v62  ;;  %v5952_v46 = vunpack.i.h.bf16 %v9114_v12  ;;  %v5951_v39 = vunpack.i.l.bf16 %v9114_v12  ;;  %v2926_v47 = vsel %vm2083_vm9, %v2906_v43, %v5942_v48 }
 0x1e4   : > { %v5962_v8 = vunpack.i.h.bf16 %v9152_v16  ;;  %v5961_v17 = vunpack.i.l.bf16 %v9152_v16  ;;  %v5966_v54 = vunpack.i.l.bf16 %v9116_v31  ;;  %v2925_v57 = vsel %vm2083_vm9, %v2905_v38, %v5941_v42 }
 0x1e5   : > { %6269 = vrot.lane.b32.xlu0 %v6268_v60, %s10819_s15  ;;  %6284 = vrot.lane.b32.xlu1 %v10911_v40, %s10791_s21  ;;  %v2946_v56 = vsel %vm2104_vm10, %v2926_v47, %v5957_v49  ;;  %v5972_v20 = vunpack.i.h.bf16 %v9179_v32  ;;  %v5971_v7 = vunpack.i.l.bf16 %v9179_v32  ;;  %v2945_v12 = vsel %vm2104_vm10, %v2925_v57, %v5956_v9 }
 0x1e6   : > { %v5967_v62 = vunpack.i.h.bf16 %v9116_v31  ;;  %v5982_v16 = vunpack.i.h.bf16 %v5980_v59  ;;  %v5981_v48 = vunpack.i.l.bf16 %v5980_v59  ;;  %v2212_v38 = vsel %vm2209_vm0, %v9122_v63, %v5951_v39 }
 0x1e7   : > { %v5990_v60 = vpop.permute.xlu0 %5989  ;;  %v9225_v53 = vpop.permute.xlu1 %6004  ;;  %v2213_v42 = vsel %vm2209_vm0, %v9127_v55, %v5952_v46  ;;  %v2965_v9 = vsel %vm10478_vm11, %v2945_v12, %v5966_v54  ;;  %v5977_v31 = vunpack.i.h.bf16 %v9154_v6  ;;  %v5976_v55 = vunpack.i.l.bf16 %v9154_v6 }
 0x1e8   : > { %v5992_v49 = vunpack.i.h.bf16 %v5990_v60  ;;  %v5991_v35 = vunpack.i.l.bf16 %v5990_v60  ;;  %v5987_v47 = vunpack.i.h.bf16 %v9181_v50  ;;  %v5996_v57 = vunpack.i.l.bf16 %v9202_v52 }
 0x1e9   : > { %6279 = vrot.lane.b32.xlu0 %v10882_v23, %s10788_s25  ;;  %6294 = vrot.lane.b32.xlu1 %v6258_v28, %s10801_s20  ;;  %v2233_v23 = vsel %vm2230_vm1, %v2212_v38, %v5961_v17  ;;  %v2234_v28 = vsel %vm2230_vm1, %v2213_v42, %v5962_v8  ;;  %v5986_v8 = vunpack.i.l.bf16 %v9181_v50  ;;  %v10914_v38 = vld [vmem:[#allocation141_spill] sm:$0xff]  ;;  %vm10915_vm5 = vcmask 490496  }
 0x1ea   : > { %v2254_v59 = vsel %vm2251_vm2, %v2233_v23, %v5971_v7  ;;  %v2255_v63 = vsel %vm2251_vm2, %v2234_v28, %v5972_v20  ;;  %vm10916_vm7 = vmmov %vm10915_vm5  ;;  %vm10917_vm13 = vcmask 523264   ;;  %v5341_v2 = vunpack.i.l.bf16 %v10914_v38 }
 0x1eb   : > { %v6000_v32 = vpop.permute.xlu0 %5999  ;;  %v9244_v34 = vpop.permute.xlu1 %6014  ;;  %v2275_v46 = vsel %vm2272_vm3, %v2254_v59, %v5981_v48  ;;  %v2276_v60 = vsel %vm2272_vm3, %v2255_v63, %v5982_v16  ;;  %v5342_v48 = vunpack.i.h.bf16 %v10914_v38  ;;  %v2966_v16 = vsel %vm10478_vm11, %v2946_v56, %v5967_v62  ;;  %vm10918_vm8 = vmmov %vm10917_vm13 }
 0x1ec   : > { %v6002_v43 = vunpack.i.h.bf16 %v6000_v32  ;;  %v6001_v39 = vunpack.i.l.bf16 %v6000_v32  ;;  %v2296_v17 = vsel %vm2293_vm4, %v2275_v46, %v5991_v35  ;;  %v2297_v54 = vsel %vm2293_vm4, %v2276_v60, %v5992_v49  ;;  %v10920_v46 = vld [vmem:[#allocation71_spill] sm:$0xff] }
 0x1ed   : > { %6289 = vrot.lane.b32.xlu0 %v6288_v22, %s10792_s0  ;;  %6304 = vrot.lane.b32.xlu1 %v6303_v41, %s10776_s14  ;;  %v2985_v49 = vsel %vm2146_vm12, %v2965_v9, %v5976_v55  ;;  %v2986_v35 = vsel %vm2146_vm12, %v2966_v16, %v5977_v31  ;;  %v5391_v60 = vunpack.i.l.bf16 %v10920_v46 }
 0x1ee   : > { %v2317_v42 = vsel %vm2314_vm6, %v2296_v17, %v6001_v39  ;;  %v2318_v50 = vsel %vm2314_vm6, %v2297_v54, %v6002_v43  ;;  %v3005_v62 = vsel %vm2167_vm14, %v2985_v49, %v5986_v8  ;;  %v3006_v23 = vsel %vm2167_vm14, %v2986_v35, %v5987_v47  ;;  %v10922_v47 = vld [vmem:[#allocation96_spill] sm:$0xff]  ;;  %v10931_v35 = vld [vmem:[#allocation169_spill] sm:$0xff] }
 0x1ef   : > { %v6010_v20 = vpop.permute.xlu0 %6009  ;;  %v6025_v22 = vpop.permute.xlu1 %6024  ;;  %v3026_v9 = vsel %vm2188_vm15, %v3006_v23, %v5996_v57  ;;  %v9291_v43 = vsel %vm2083_vm9, %v8763_v45, %v5296_v44  ;;  %v10919_v39 = vunpack.i.h.bf16 %v7751_v27  ;;  %v10923_v8 = vunpack.i.l.bf16 %v10889_v14  ;;  %v10924_v44 = vld [vmem:[#allocation183_spill] sm:$0xff] }
 0x1f0   : > { %v6012_v7 = vunpack.i.h.bf16 %v6010_v20  ;;  %v6011_v41 = vunpack.i.l.bf16 %v6010_v20  ;;  %v6027_v12 = vunpack.i.h.bf16 %v6025_v22  ;;  %v6026_v6 = vunpack.i.l.bf16 %v6025_v22  ;;  %v10928_v20 = vld [vmem:[#allocation140_spill] sm:$0xff] }
 0x1f1   : > { %6299 = vrot.lane.b32.xlu0 %v9192_v15, %s10771_s26  ;;  %6314 = vrot.lane.b32.xlu1 %v6313_v58, %s10784_s16  ;;  %v5917_v58 = vunpack.i.h.bf16 %v8998_v0  ;;  %v9297_v55 = vsel %vm2083_vm9, %v8736_v18, %v10919_v39  ;;  %v10921_v0 = vpack.i.bf16 %v10908_v25, %v10907_v26  ;;  %v2088_v45 = vsel %vm2083_vm9, %v8774_v13, %v10923_v8 }
 0x1f2   : > { %v2338_v32 = vsel %vm10915_vm5, %v2317_v42, %v6011_v41  ;;  %v2339_v56 = vsel %vm10916_vm7, %v2318_v50, %v6012_v7  ;;  %v5392_v27 = vunpack.i.h.bf16 %v10920_v46  ;;  %v898_v17 = vrot.slane %v10924_v44, 5  ;;  %v10929_v7 = vld [vmem:[#allocation91_spill] sm:$0xff] }
 0x1f3   : > { %v9278_v28 = vpop.permute.xlu0 %6019  ;;  %v3112_v59 = vsel %vm10917_vm13, %v2338_v32, %v6026_v6  ;;  %v3113_v63 = vsel %vm10918_vm8, %v2339_v56, %v6027_v12  ;;  %v9282_v36 = vpop.permute.xlu1 %6034  ;;  %v3025_v18 = vsel %vm2188_vm15, %v3005_v62, %v5917_v58  ;;  %vm10925_vm5 = vcmask 818176   ;;  %v10932_v32 = vld [vmem:[#allocation186_spill] sm:$0xff]  ;;  %v10935_v58 = vld [vmem:[#allocation160_spill] sm:$0xff] }
 0x1f4   : > { %v3131_v31 = vpack.c.bf16 %v3113_v63, %v3112_v59  ;;  %vm10926_vm7 = vmmov %vm10925_vm5  ;;  %v10927_v54 = vunpack.i.h.bf16 %v10889_v14  ;;  %v5347_v22 = vunpack.i.h.bf16 %v10928_v20  ;;  %v5441_v41 = vunpack.i.l.bf16 %v10929_v7  ;;  %v10930_v14 = vld [vmem:[#allocation191_spill] sm:$0xff] }
 0x1f5   : > { %6309 = vrot.lane.b32.xlu0 %v10921_v0, %s10819_s15  ;;  %6324 = vrot.lane.b32.xlu1 %v10922_v47, %s10791_s21  ;;  %v6333_v13 = vpack.i.bf16 %v3026_v9, %v3025_v18  ;;  %v5346_v38 = vunpack.i.l.bf16 %v10928_v20  ;;  %v2109_v16 = vsel %vm2104_vm10, %v2088_v45, %v5341_v2  ;;  %v899_v50 = vrot.slane %v10930_v14, 5 }
 0x1f6   : > { %4668 = vmatmul.mubr.msk.bf16.gmra.mrb[4].mxu0 %vm10925_vm5, %v3131_v31  ;;  %4967 = vmatmul.mubr.msk.bf16.vlgmr.msra.gmra.mrb[0].mxu1 %vm10926_vm7, %v3131_v31  ;;  %v2089_v57 = vsel %vm2083_vm9, %v8767_v30, %v10927_v54  ;;  %v2130_v30 = vsel %vm10478_vm11, %v2109_v16, %v5391_v60  ;;  %v6006_v49 = vunpack.i.l.bf16 %v9225_v53  ;;  %v6328_v56 = vpack.i.bf16 %v10932_v32, %v10931_v35  ;;  %v10942_v16 = vld [vmem:[#allocation170_spill] sm:$0xff] }
 0x1f7   : > { %v9321_v12 = vpop.permute.xlu0 %6029  ;;  %v6045_v6 = vpop.permute.xlu1 %6044  ;;  %3363 = vmatprep.mubr.bf16.mxu0 %v10887_v19  ;;  %v2110_v42 = vsel %vm2104_vm10, %v2089_v57, %v5342_v48  ;;  %v6343_v62 = vpack.i.bf16 %v10878_v61, %v10863_v11  ;;  %v5442_v48 = vunpack.i.h.bf16 %v10929_v7  ;;  %v10933_v59 = vrot.slane %v10879_v29, 5 }
 0x1f8   : > { %v2131_v23 = vsel %vm10478_vm11, %v2110_v42, %v5392_v27  ;;  %vm10934_vm13 = vcmp.lt.s32.totalorder %v10886_v3, 3  ;;  %v6016_v2 = vunpack.i.l.bf16 %v9244_v34  ;;  %v5492_v9 = vunpack.i.h.bf16 %v10935_v58  ;;  %v10939_v27 = vld [vmem:[#allocation190_spill] sm:$0xff]  ;;  %v10943_v42 = vld [vmem:[#allocation188_spill] sm:$0xff] }
 0x1f9   : > { %6319 = vrot.lane.b32.xlu0 %v10911_v40, %s10788_s25  ;;  %6334 = vrot.lane.b32.xlu1 %v6333_v13, %s10792_s0  ;;  %v901_v63 = vsel %vm10934_vm13, %v10933_v59, %v898_v17  ;;  %v2151_v40 = vsel %vm2146_vm12, %v2130_v30, %v5441_v41  ;;  %v6007_v31 = vunpack.i.h.bf16 %v9225_v53  ;;  %v6021_v39 = vunpack.i.l.bf16 %v9278_v28  ;;  %vm10936_vm8 = vmmov %vm10934_vm13  ;;  %v10938_v53 = vld [vmem:[#allocation179_spill] sm:$0xff] }
 0x1fa   : > { %v900_v46 = vsel %vm10936_vm8, %v898_v17, %v899_v50  ;;  %v6017_v29 = vunpack.i.h.bf16 %v9244_v34  ;;  %v6036_v60 = vunpack.i.l.bf16 %v9282_v36  ;;  %vm10937_vm5 = vcmask 31744  }
 0x1fb   : > { %v9348_v11 = vpop.permute.xlu0 %6039  ;;  %v6055_v61 = vpop.permute.xlu1 %6054  ;;  %v2887_v0 = vsel %vm10937_vm5, %v901_v63, %v6006_v49  ;;  %v6022_v8 = vunpack.i.h.bf16 %v9278_v28  ;;  %v6046_v45 = vunpack.i.l.bf16 %v6045_v6  ;;  %v6353_v18 = vpack.i.bf16 %v10939_v27, %v10938_v53  ;;  %vm10941_vm13 = vmmov %vm10937_vm5 }
 0x1fc   : > { %v5491_v44 = vunpack.i.l.bf16 %v10935_v58  ;;  %vm10940_vm7 = vcmask 64512   ;;  %v6037_v34 = vunpack.i.h.bf16 %v9282_v36  ;;  %v6056_v54 = vunpack.i.l.bf16 %v6055_v61  ;;  %v10945_v58 = vld [vmem:[#allocation181_spill] sm:$0xff] }
 0x1fd   : > { %6329 = vrot.lane.b32.xlu0 %v6328_v56, %s10820_s17  ;;  %6344 = vrot.lane.b32.xlu1 %v6343_v62, %s10771_s26  ;;  %v2907_v17 = vsel %vm10940_vm7, %v2887_v0, %v6016_v2  ;;  %v2888_v57 = vsel %vm10941_vm13, %v900_v46, %v6007_v31  ;;  %v6047_v28 = vunpack.i.h.bf16 %v6045_v6  ;;  %v6348_v14 = vpack.i.bf16 %v10943_v42, %v10942_v16  ;;  %vm10944_vm8 = vmmov %vm10940_vm7  ;;  %v6422_v16 = vld [vmem:[%s10161_s5 + $0x48] sm:$0xff]   ;;  %s5089_s26 = smul.u32 40, %s6526_s9 }
 0x1fe   : > { %v2927_v7 = vsel %vm2083_vm9, %v2907_v17, %v6021_v39  ;;  %v2908_v50 = vsel %vm10944_vm8, %v2888_v57, %v6017_v29  ;;  %v6057_v49 = vunpack.i.h.bf16 %v6055_v61  ;;  %v2152_v56 = vsel %vm2146_vm12, %v2131_v23, %v5442_v48 }
 0x1ff   : > { %v9365_v41 = vpop.permute.xlu0 %6049  ;;  %v6065_v13 = vpop.permute.xlu1 %6064  ;;  %v2947_v30 = vsel %vm2104_vm10, %v2927_v7, %v6036_v60  ;;  %v2928_v36 = vsel %vm2083_vm9, %v2908_v50, %v6022_v8  ;;  %v2172_v62 = vsel %vm2167_vm14, %v2151_v40, %v5491_v44  ;;  %v2173_v2 = vsel %vm2167_vm14, %v2152_v56, %v5492_v9  ;;  %v10946_v8 = vld [vmem:[#allocation175_spill] sm:$0xff]  ;;  %s4516_s13 = sadd.s32 %s5089_s26, %s6675_s24 }
 0x200   : > { %v6066_v35 = vunpack.i.l.bf16 %v6065_v13  ;;  %v2967_v32 = vsel %vm10478_vm11, %v2947_v30, %v6046_v45  ;;  %v6067_v6 = vunpack.i.h.bf16 %v6065_v13  ;;  %v2948_v59 = vsel %vm2104_vm10, %v2928_v36, %v6037_v34  ;;  %v10947_v45 = vld [vmem:[#allocation8_spill] sm:$0xff]  ;;  %s4742_s9 = sshll.u32 %s4516_s13, 6 }
 0x201   : > { %6339 = vrot.lane.b32.xlu0 %v9192_v15, %s10801_s20  ;;  %6354 = vrot.lane.b32.xlu1 %v6353_v18, %s10819_s15  ;;  %v2987_v63 = vsel %vm2146_vm12, %v2967_v32, %v6056_v54  ;;  %v5541_v31 = vunpack.i.l.bf16 %v10945_v58  ;;  %v2968_v39 = vsel %vm10478_vm11, %v2948_v59, %v6047_v28  ;;  %v5542_v29 = vunpack.i.h.bf16 %v10945_v58  ;;  %v6421_v54 = vld [vmem:[%s10161_s5] sm:$0xff]   ;;  %v10948_v59 = vld [vmem:[#allocation146_spill] sm:$0xff]  ;;  %s10094_s20 = scalar_lea.hbm %s10164_s8, %s4742_s9 }
 0x202   : > { %v3007_v15 = vsel %vm2167_vm14, %v2987_v63, %v6066_v35  ;;  %v5997_v23 = vunpack.i.h.bf16 %v9202_v52  ;;  %v2988_v48 = vsel %vm2146_vm12, %v2968_v39, %v6057_v49  ;;  %v6032_v60 = vunpack.i.h.bf16 %v9321_v12 }
 0x203   : > { %v6060_v61 = vpop.permute.xlu0 %6059  ;;  %v9384_v46 = vpop.permute.xlu1 %6074  ;;  %v6031_v9 = vunpack.i.l.bf16 %v9321_v12  ;;  %v3008_v0 = vsel %vm2167_vm14, %v2988_v48, %v6067_v6  ;;  %v6358_v18 = vpack.i.bf16 %v10947_v45, %v10946_v8  ;;  %v6042_v52 = vunpack.i.h.bf16 %v9348_v11  ;;  %v6420_v12 = vld [vmem:[%s10161_s5 + $0x40] sm:$0xff]  }
 0x204   : > { %v6076_v40 = vunpack.i.l.bf16 %v9384_v46  ;;  %v6041_v44 = vunpack.i.l.bf16 %v9348_v11  ;;  %v3027_v17 = vsel %vm2188_vm15, %v3007_v15, %v5997_v23  ;;  %v2193_v57 = vsel %vm2188_vm15, %v2172_v62, %v5541_v31  ;;  %4858 = vmatprep.subr.bf16.mxu0 %v6420_v12  ;;  %v6423_v62 = vld [vmem:[%s10161_s5 + $0x8] sm:$0xff]  }
 0x205   : > { %6349 = vrot.lane.b32.xlu0 %v6348_v14, %s10776_s14  ;;  %6364 = vrot.lane.b32.xlu1 %v10922_v47, %s10788_s25  ;;  %v6052_v47 = vunpack.i.h.bf16 %v9365_v41  ;;  %v6051_v7 = vunpack.i.l.bf16 %v9365_v41  ;;  %v2194_v42 = vsel %vm2188_vm15, %v2173_v2, %v5542_v29  ;;  %v6062_v14 = vunpack.i.h.bf16 %v6060_v61  ;;  %s369_s25 = sand.u32 1, %s6514_s28  }
 0x206   : > { %v3028_v34 = vsel %vm2188_vm15, %v3008_v0, %v6076_v40  ;;  %v6061_v50 = vunpack.i.l.bf16 %v6060_v61  ;;  %v2214_v30 = vsel %vm2209_vm0, %v2193_v57, %v6031_v9  ;;  %v2215_v49 = vsel %vm2209_vm0, %v2194_v42, %v6032_v60  ;;  %4859 = vmatpush3.bf16.msra.mxu0 %v6421_v54  ;;  %v10949_v40 = vld [vmem:[#allocation9_spill] sm:$0xff]  ;;  %v10950_v60 = vld [vmem:[#allocation151_spill] sm:$0xff]  ;;  %s5086_s17 = smul.u32 80, %s369_s25  ;;  %s10101_s24 = scalar_lea.sflag [#allocation3], %s369_s25 }
 0x207   : > { %v6070_v28 = vpop.permute.xlu0 %6069  ;;  %v6373_v11 = vpack.i.bf16 %v3028_v34, %v3027_v17  ;;  %v6085_v13 = vpop.permute.xlu1 %6084  ;;  %v2111_v41 = vsel %vm2104_vm10, %v9291_v43, %v5346_v38  ;;  %v2112_v32 = vsel %vm2104_vm10, %v9297_v55, %v5347_v22  ;;  %v2235_v6 = vsel %vm2230_vm1, %v2214_v30, %v6041_v44  ;;  %4860 = vmatprep.subr.bf16.mxu0 %v6422_v16  ;;  %v6424_v55 = vld [vmem:[%s10161_s5 + $0x50] sm:$0xff]  }
 0x208   : > { %v6072_v35 = vunpack.i.h.bf16 %v6070_v28  ;;  %v6071_v36 = vunpack.i.l.bf16 %v6070_v28  ;;  %v2236_v56 = vsel %vm2230_vm1, %v2215_v49, %v6042_v52  ;;  %v5397_v63 = vunpack.i.h.bf16 %v10948_v59  ;;  %v10951_v17 = vld [vmem:[#allocation157_spill] sm:$0xff] }
 0x209   : > { %6359 = vrot.lane.b32.xlu0 %v6358_v18, %s10784_s16  ;;  %6374 = vrot.lane.b32.xlu1 %v6373_v11, %s10792_s0  ;;  %v5396_v2 = vunpack.i.l.bf16 %v10948_v59  ;;  %v2256_v43 = vsel %vm2251_vm2, %v2235_v6, %v6051_v7  ;;  %v2257_v20 = vsel %vm2251_vm2, %v2236_v56, %v6052_v47  ;;  %v6087_v23 = vunpack.i.h.bf16 %v6085_v13  ;;  %v6425_v18 = vld [vmem:[%s10161_s5 + $0x10] sm:$0xff]   ;;  %v6426_v47 = vld [vmem:[%s10161_s5 + $0x58] sm:$0xff]   ;;  %s10061_s16 = scalar_lea.vmem [#allocation2], %s5086_s17  ;;  %s6557_s17 = smov [#allocation2]  }
 0x20a   : > { %v2277_v22 = vsel %vm2272_vm3, %v2256_v43, %v6061_v50  ;;  %v2278_v31 = vsel %vm2272_vm3, %v2257_v20, %v6062_v14  ;;  %v6086_v48 = vunpack.i.l.bf16 %v6085_v13  ;;  %v5447_v9 = vunpack.i.h.bf16 %v10950_v60  ;;  %4861 = vmatpush3.bf16.msra.mxu0 %v6423_v62  ;;  %v10952_v7 = vld [vmem:[#allocation178_spill] sm:$0xff]  ;;  %s4519_s22 = sshll.u32 %s10061_s16, 4  ;;  %s6448_s26 = sshll.u32 %s6557_s17, 4  ;;  %s10096_s22 = int_to_ptr.vmem [resolvable:$true] %s4519_s22  ;;  %s6449_s26 = int_to_ptr.vmem [resolvable:$false] %s6448_s26 }
 0x20b   : > { %v6080_v38 = vpop.permute.xlu0 %6079  ;;  %v6095_v58 = vpop.permute.xlu1 %6094  ;;  %v2298_v15 = vsel %vm2293_vm4, %v2277_v22, %v6071_v36  ;;  %v2299_v29 = vsel %vm2293_vm4, %v2278_v31, %v6072_v35  ;;  %v5446_v0 = vunpack.i.l.bf16 %v10950_v60  ;;  %v2132_v52 = vsel %vm10478_vm11, %v2111_v41, %v5396_v2  ;;  %4862 = vmatprep.subr.bf16.mxu0 %v6424_v55  ;;  %v10958_v56 = vld [vmem:[#allocation18_spill] sm:$0xff]  ;;  %s6444_s15 = scalar_lea.vmem %s10096_s22, 1280  ;;  %s6450_s13 = scalar_lea.vmem %s6449_s26, 2560 }
 0x20c   : > { %v6082_v39 = vunpack.i.h.bf16 %v6080_v38  ;;  %v6081_v61 = vunpack.i.l.bf16 %v6080_v38  ;;  %v2133_v44 = vsel %vm10478_vm11, %v2112_v32, %v5397_v63  ;;  %v5497_v34 = vunpack.i.h.bf16 %v10951_v17  ;;  %v6427_v32 = vld [vmem:[%s10161_s5 + $0x18] sm:$0xff]   ;;  %v6428_v38 = vld [vmem:[%s10161_s5 + $0x60] sm:$0xff]   ;;  %p6445_p1 = scmp.ne.s32.totalorder %s10096_s22, %s6444_s15  ;;  %p6451_p5 = scmp.lt.s32.totalorder %s10096_s22, %s6449_s26 }
 0x20d   : > { %6369 = vrot.lane.b32.xlu0 %v10949_v40, %s10791_s21  ;;  %v5496_v12 = vunpack.i.l.bf16 %v10951_v17  ;;  %v5547_v28 = vunpack.i.h.bf16 %v10952_v7  ;;  %v5546_v11 = vunpack.i.l.bf16 %v10952_v7  ;;  %vm10953_vm5 = vcmask 490496   ;;  %v10967_v17 = vld [vmem:[#allocation135_spill] sm:$0xff]  ;;  %p6452_p6 = scmp.lt.s32.totalorder %s6450_s13, %s6444_s15 }
 0x20e   : > { %v2319_v8 = vsel %vm2314_vm6, %v2298_v15, %v6081_v61  ;;  %v2320_v45 = vsel %vm2314_vm6, %v2299_v29, %v6082_v39  ;;  %vm10954_vm7 = vmmov %vm10953_vm5  ;;  %v6097_v50 = vunpack.i.h.bf16 %v6095_v58  ;;  %v6096_v30 = vunpack.i.l.bf16 %v6095_v58  ;;  %4863 = vmatpush3.bf16.msra.mxu0 %v6425_v18  ;;  %p6446_p2 = pnand %p6445_p1, %p6654_p3 }
 0x20f   : > { %v6090_v54 = vpop.permute.xlu0 %6089  ;;  %v6105_v57 = vpop.permute.xlu1 %6104  ;;  %v2340_v42 = vsel %vm10953_vm5, %v2319_v8, %v6086_v48  ;;  %v2341_v14 = vsel %vm10954_vm7, %v2320_v45, %v6087_v23  ;;  %v2153_v49 = vsel %vm2146_vm12, %v2132_v52, %v5446_v0  ;;  %v2154_v35 = vsel %vm2146_vm12, %v2133_v44, %v5447_v9  ;;  %4864 = vmatprep.subr.bf16.mxu0 %v6426_v47  ;;  %v10962_v23 = vld [vmem:[#allocation128_spill] sm:$0xff]  ;;  %v6429_v0 = vld [vmem:[%s10161_s5 + $0x20] sm:$0xff]   ;;  %p6453_p7 = por %p6452_p6, %p6451_p5 }
 0x210   : > { %v6092_v13 = vunpack.i.h.bf16 %v6090_v54  ;;  %v6091_v16 = vunpack.i.l.bf16 %v6090_v54  ;;  %vm10955_vm13 = vcmask 523264   ;;  %v10957_v6 = vunpack.i.h.bf16 %v10818_v51  ;;  %v10964_v45 = vld [vmem:[#allocation16_spill] sm:$0xff]  ;;  %v10966_v52 = vld [vmem:[#allocation127_spill] sm:$0xff]  ;;  %p6447_p4 = pneg %p6446_p2 }
 0x211   : > { %vm10956_vm8 = vmmov %vm10955_vm13  ;;  %vm10959_vm5 = vcmask 31744   ;;  %v2174_v59 = vsel %vm2167_vm14, %v2153_v49, %v5496_v12  ;;  %v2175_v63 = vsel %vm2167_vm14, %v2154_v35, %v5497_v34  ;;  %v6107_v15 = vunpack.i.h.bf16 %v6105_v57  ;;  %v10968_v47 = vld [vmem:[#allocation76_spill] sm:$0xff] }
 0x212   : > { %v3114_v36 = vsel %vm10955_vm13, %v2340_v42, %v6091_v16  ;;  %v3115_v41 = vsel %vm10956_vm8, %v2341_v14, %v6092_v13  ;;  %v2051_v62 = vsel %vm10959_vm5, %v10958_v56, %v10957_v6  ;;  %v2195_v58 = vsel %vm2188_vm15, %v2174_v59, %v5546_v11  ;;  %4865 = vmatpush3.bf16.msra.mxu0 %v6427_v32  ;;  %vm10965_vm8 = vmmov %vm10959_vm5  ;;  %v10971_v32 = vld [vmem:[#allocation86_spill] sm:$0xff]  ;;  %p6454_p9 = pnand %p6453_p7, %p6447_p4 }
 0x213   : > { %v3132_v2 = vpack.c.bf16 %v3115_v41, %v3114_v36  ;;  %v6100_v43 = vpop.permute.xlu0 %6099  ;;  %v6115_v20 = vpop.permute.xlu1 %6114  ;;  %v2196_v55 = vsel %vm2188_vm15, %v2175_v63, %v5547_v28  ;;  %v2216_v61 = vsel %vm2209_vm0, %v2195_v58, %v6096_v30  ;;  %v6106_v29 = vunpack.i.l.bf16 %v6105_v57  ;;  %4866 = vmatprep.subr.bf16.mxu0 %v6428_v38 }
 0x214   : > { %v6102_v22 = vunpack.i.h.bf16 %v6100_v43  ;;  %v6101_v31 = vunpack.i.l.bf16 %v6100_v43  ;;  %v2217_v39 = vsel %vm2209_vm0, %v2196_v55, %v6097_v50  ;;  %vm10960_vm7 = vcmask 818176  }
 0x215   : > { %4669 = vmatmul.mubr.msk.bf16.gmra.mrb[8].mxu0 %vm10960_vm7, %v3132_v2  ;;  %vm10961_vm13 = vmmov %vm10960_vm7  ;;  %v5252_v48 = vunpack.i.h.bf16 %v10962_v23  ;;  %v5251_v40 = vunpack.i.l.bf16 %v10962_v23  ;;  %v10963_v8 = vunpack.i.l.bf16 %v10818_v51  ;;  %v5257_v44 = vunpack.i.h.bf16 %v10966_v52 }
 0x216   : > { %4970 = vmatprep.mubr.msk.bf16.mxu1 %vm10961_vm13, %v3132_v2  ;;  %v2237_v60 = vsel %vm2230_vm1, %v2216_v61, %v6101_v31  ;;  %v2238_v9 = vsel %vm2230_vm1, %v2217_v39, %v6102_v22  ;;  %3373 = vmatprep.mubr.bf16.mxu0 %v10887_v19  ;;  %v5302_v34 = vunpack.i.h.bf16 %v10967_v17  ;;  %v5301_v12 = vunpack.i.l.bf16 %v10967_v17  ;;  %v10972_v31 = vld [vmem:[#allocation152_spill] sm:$0xff] }
 0x217   : > { %v2050_v18 = vsel %vm10965_vm8, %v10964_v45, %v10963_v8  ;;  %v6110_v54 = vpop.permute.xlu0 %6109  ;;  %v6125_v57 = vpop.permute.xlu1 %6124  ;;  %v5352_v7 = vunpack.i.h.bf16 %v10968_v47  ;;  %v5351_v28 = vunpack.i.l.bf16 %v10968_v47  ;;  %v2258_v51 = vsel %vm2251_vm2, %v2237_v60, %v6106_v29  ;;  %4867 = vmatpush3.bf16.msra.mxu0 %v6429_v0  ;;  %v10974_v45 = vld [vmem:[#allocation184_spill] sm:$0xff] }
 0x218   : > { %v6112_v11 = vunpack.i.h.bf16 %v6110_v54  ;;  %v6111_v13 = vunpack.i.l.bf16 %v6110_v54  ;;  %v2259_v16 = vsel %vm2251_vm2, %v2238_v9, %v6107_v15  ;;  %v6117_v42 = vunpack.i.h.bf16 %v6115_v20 }
 0x219   : > { %v6116_v14 = vunpack.i.l.bf16 %v6115_v20  ;;  %vm10969_vm5 = vcmask 64512   ;;  %v5402_v6 = vunpack.i.h.bf16 %v10971_v32  ;;  %v5401_v56 = vunpack.i.l.bf16 %v10971_v32 }
 0x21a   : > { %v2071_v50 = vsel %vm10969_vm5, %v2050_v18, %v5251_v40  ;;  %vm10970_vm7 = vmmov %vm10969_vm5  ;;  %v2279_v49 = vsel %vm2272_vm3, %v2258_v51, %v6111_v13  ;;  %v2280_v35 = vsel %vm2272_vm3, %v2259_v16, %v6112_v11  ;;  %v6127_v55 = vunpack.i.h.bf16 %v6125_v57  ;;  %v10973_v40 = vld [vmem:[#allocation165_spill] sm:$0xff] }
 0x21b   : > { %v2072_v30 = vsel %vm10970_vm7, %v2051_v62, %v5252_v48  ;;  %v2092_v36 = vsel %vm2083_vm9, %v2071_v50, %v5301_v12  ;;  %v6120_v59 = vpop.permute.xlu0 %6119  ;;  %v6135_v63 = vpop.permute.xlu1 %6134  ;;  %v2300_v38 = vsel %vm2293_vm4, %v2279_v49, %v6116_v14  ;;  %v2301_v58 = vsel %vm2293_vm4, %v2280_v35, %v6117_v42 }
 0x21c   : > { %v2093_v41 = vsel %vm2083_vm9, %v2072_v30, %v5302_v34  ;;  %v2113_v2 = vsel %vm2104_vm10, %v2092_v36, %v5351_v28  ;;  %v6122_v62 = vunpack.i.h.bf16 %v6120_v59  ;;  %v6121_v20 = vunpack.i.l.bf16 %v6120_v59 }
 0x21d   : > { %v2114_v43 = vsel %vm2104_vm10, %v2093_v41, %v5352_v7  ;;  %v6126_v22 = vunpack.i.l.bf16 %v6125_v57  ;;  %v5452_v39 = vunpack.i.h.bf16 %v10972_v31  ;;  %v5451_v61 = vunpack.i.l.bf16 %v10972_v31  ;;  %v10984_v31 = vld [vmem:[#allocation142_spill] sm:$0xff] }
 0x21e   : > { %v2321_v15 = vsel %vm2314_vm6, %v2300_v38, %v6121_v20  ;;  %v2322_v29 = vsel %vm2314_vm6, %v2301_v58, %v6122_v62  ;;  %v2134_v23 = vsel %vm10478_vm11, %v2113_v2, %v5401_v56  ;;  %v2135_v48 = vsel %vm10478_vm11, %v2114_v43, %v5402_v6  ;;  %v10981_v43 = vld [vmem:[#allocation134_spill] sm:$0xff] }
 0x21f   : > { %v5502_v60 = vunpack.i.h.bf16 %v10973_v40  ;;  %v5501_v9 = vunpack.i.l.bf16 %v10973_v40  ;;  %v6130_v0 = vpop.permute.xlu0 %6129  ;;  %v6145_v8 = vpop.permute.xlu1 %6144  ;;  %v5552_v18 = vunpack.i.h.bf16 %v10974_v45  ;;  %v5551_v17 = vunpack.i.l.bf16 %v10974_v45 }
 0x220   : > { %v6132_v34 = vunpack.i.h.bf16 %v6130_v0  ;;  %v6131_v12 = vunpack.i.l.bf16 %v6130_v0  ;;  %vm10975_vm13 = vcmask 490496   ;;  %v6137_v47 = vunpack.i.h.bf16 %v6135_v63 }
 0x221   : > { %v2342_v54 = vsel %vm10975_vm13, %v2321_v15, %v6126_v22  ;;  %vm10976_vm8 = vmmov %vm10975_vm13  ;;  %v6136_v7 = vunpack.i.l.bf16 %v6135_v63  ;;  %v2155_v28 = vsel %vm2146_vm12, %v2134_v23, %v5451_v61  ;;  %v2156_v11 = vsel %vm2146_vm12, %v2135_v48, %v5452_v39  ;;  %v10985_v23 = vld [vmem:[#allocation147_spill] sm:$0xff] }
 0x222   : > { %v2343_v57 = vsel %vm10976_vm8, %v2322_v29, %v6127_v55  ;;  %vm10977_vm5 = vcmask 523264   ;;  %v5256_v16 = vunpack.i.l.bf16 %v10966_v52  ;;  %v2176_v42 = vsel %vm2167_vm14, %v2155_v28, %v5501_v9 }
 0x223   : > { %v3116_v13 = vsel %vm10977_vm5, %v2342_v54, %v6131_v12  ;;  %vm10978_vm7 = vmmov %vm10977_vm5  ;;  %v2177_v14 = vsel %vm2167_vm14, %v2156_v11, %v5502_v60  ;;  %v6140_v30 = vpop.permute.xlu0 %6139  ;;  %v6155_v49 = vpop.permute.xlu1 %6154  ;;  %v2197_v35 = vsel %vm2188_vm15, %v2176_v42, %v5551_v17  ;;  %v6147_v59 = vunpack.i.h.bf16 %v6145_v8  ;;  %v10987_v17 = vld [vmem:[#allocation21_spill] sm:$0xff]  ;;  %v6430_v42 = vld [vmem:[%s10161_s5 + $0x68] sm:$0xff]  }
 0x224   : > { %v3117_v51 = vsel %vm10978_vm7, %v2343_v57, %v6132_v34  ;;  %v2198_v36 = vsel %vm2188_vm15, %v2177_v14, %v5552_v18  ;;  %v6142_v41 = vunpack.i.h.bf16 %v6140_v30  ;;  %v6141_v32 = vunpack.i.l.bf16 %v6140_v30  ;;  %v10989_v57 = vld [vmem:[#allocation90_spill] sm:$0xff]  ;;  %4868 = vmatprep.subr.bf16.mxu0 %v6430_v42 }
 0x225   : > { %v3133_v50 = vpack.c.bf16 %v3117_v51, %v3116_v13  ;;  %v2218_v6 = vsel %vm2209_vm0, %v2197_v35, %v6136_v7  ;;  %v2219_v56 = vsel %vm2209_vm0, %v2198_v36, %v6137_v47  ;;  %v6146_v63 = vunpack.i.l.bf16 %v6145_v8  ;;  %v3859_v35 = vld [vmem:[%s10162_s6] sm:$0x3]  ;;  %v6431_v36 = vld [vmem:[%s10161_s5 + $0x28] sm:$0xff]  }
 0x226   : > { %vm10979_vm13 = vcmask 818176   ;;  %v5216_v2 = vunpack.i.l.bf16 %v10830_v37  ;;  %v5306_v62 = vunpack.i.l.bf16 %v10981_v43  ;;  %v2239_v20 = vsel %vm2230_vm1, %v2218_v6, %v6141_v32  ;;  %4869 = vmatpush3.bf16.msra.mxu0 %v6431_v36  ;;  %v9630_v36 = vld [vmem:[%s10161_s5 + $0x80] sm:$0xff]  }
 0x227   : > { %4670 = vmatmul.mubr.msk.bf16.gmra.mrb[12].mxu0 %vm10979_vm13, %v3133_v50  ;;  %vm10980_vm8 = vmmov %vm10979_vm13  ;;  %v2240_v38 = vsel %vm2230_vm1, %v2219_v56, %v6142_v41  ;;  %vm10982_vm5 = vcmask 64512   ;;  %v5307_v22 = vunpack.i.h.bf16 %v10981_v43  ;;  %v5356_v39 = vunpack.i.l.bf16 %v10984_v31  ;;  %v6150_v61 = vpop.permute.xlu0 %6149  ;;  %v6165_v15 = vpop.permute.xlu1 %6164 }
 0x228   : > { %4971 = vmatmul.mubr.msk.bf16.gmra.mrb[4].mxu1 %vm10980_vm8, %v3133_v50  ;;  %3383 = vmatprep.mubr.bf16.mxu0 %v10887_v19  ;;  %v2074_v58 = vsel %vm10982_vm5, %v8684_v10, %v5257_v44  ;;  %vm10983_vm7 = vmmov %vm10982_vm5  ;;  %v5357_v29 = vunpack.i.h.bf16 %v10984_v31  ;;  %v5406_v48 = vunpack.i.l.bf16 %v10985_v23  ;;  %v6152_v40 = vunpack.i.h.bf16 %v6150_v61 }
 0x229   : > { %v2073_v55 = vsel %vm10983_vm7, %v8689_v33, %v5256_v16  ;;  %v6151_v60 = vunpack.i.l.bf16 %v6150_v61  ;;  %v2260_v52 = vsel %vm2251_vm2, %v2239_v20, %v6146_v63  ;;  %v2261_v9 = vsel %vm2251_vm2, %v2240_v38, %v6147_v59  ;;  %v10991_v63 = vld [vmem:[#allocation161_spill] sm:$0xff]  ;;  %v10992_v20 = vld [vmem:[#allocation182_spill] sm:$0xff] }
 0x22a   : > { %v6157_v10 = vunpack.i.h.bf16 %v6155_v49  ;;  %v6156_v44 = vunpack.i.l.bf16 %v6155_v49  ;;  %v2094_v33 = vsel %vm2083_vm9, %v2073_v55, %v5306_v62  ;;  %v5407_v0 = vunpack.i.h.bf16 %v10985_v23 }
 0x22b   : > { %v2281_v8 = vsel %vm2272_vm3, %v2260_v52, %v6151_v60  ;;  %v2282_v45 = vsel %vm2272_vm3, %v2261_v9, %v6152_v40  ;;  %v10986_v18 = vunpack.i.h.bf16 %v10830_v37  ;;  %vm10988_vm13 = vcmask 31744   ;;  %v6160_v7 = vpop.permute.xlu0 %6159  ;;  %v6175_v28 = vpop.permute.xlu1 %6174  ;;  %v6433_v60 = vld [vmem:[%s10161_s5 + $0x30] sm:$0xff]  }
 0x22c   : > { %v2095_v12 = vsel %vm2083_vm9, %v2074_v58, %v5307_v22  ;;  %v2115_v54 = vsel %vm2104_vm10, %v2094_v33, %v5356_v39  ;;  %v5456_v47 = vunpack.i.l.bf16 %v10989_v57  ;;  %v6162_v51 = vunpack.i.h.bf16 %v6160_v7  ;;  %v10996_v52 = vld [vmem:[#allocation121_spill] sm:$0xff] }
 0x22d   : > { %v9566_v34 = vsel %vm10988_vm13, %v10987_v17, %v10986_v18  ;;  %v2116_v11 = vsel %vm2104_vm10, %v2095_v12, %v5357_v29  ;;  %v2136_v13 = vsel %vm10478_vm11, %v2115_v54, %v5406_v48  ;;  %v6161_v16 = vunpack.i.l.bf16 %v6160_v7 }
 0x22e   : > { %v2302_v14 = vsel %vm2293_vm4, %v2281_v8, %v6156_v44  ;;  %v2303_v50 = vsel %vm2293_vm4, %v2282_v45, %v6157_v10  ;;  %v6167_v30 = vunpack.i.h.bf16 %v6165_v15  ;;  %v6166_v49 = vunpack.i.l.bf16 %v6165_v15  ;;  %v6432_v15 = vld [vmem:[%s10161_s5 + $0x70] sm:$0xff]  }
 0x22f   : > { %v2137_v41 = vsel %vm10478_vm11, %v2116_v11, %v5407_v0  ;;  %v5457_v32 = vunpack.i.h.bf16 %v10989_v57  ;;  %v2323_v6 = vsel %vm2314_vm6, %v2302_v14, %v6161_v16  ;;  %v2324_v56 = vsel %vm2314_vm6, %v2303_v50, %v6162_v51  ;;  %v6170_v58 = vpop.permute.xlu0 %6169  ;;  %v6185_v55 = vpop.permute.xlu1 %6184  ;;  %4870 = vmatprep.subr.bf16.mxu0 %v6432_v15  ;;  %v6434_v0 = vld [vmem:[%s10161_s5 + $0x78] sm:$0xff]  }
 0x230   : > { %vm10990_vm8 = vcmask 1041408   ;;  %v2157_v59 = vsel %vm2146_vm12, %v2136_v13, %v5456_v47  ;;  %v5507_v43 = vunpack.i.h.bf16 %v10991_v63  ;;  %v5506_v62 = vunpack.i.l.bf16 %v10991_v63  ;;  %4871 = vmatpush3.bf16.msra.mxu0 %v6433_v60  ;;  %v6435_v11 = vld [vmem:[%s10161_s5 + $0x38] sm:$0xff]  }
 0x231   : > { %5085 = vmatprep.subr.msk.bf16.mxu1 %vm10990_vm8, %v3859_v35  ;;  %v5557_v38 = vunpack.i.h.bf16 %v10992_v20  ;;  %v5556_v22 = vunpack.i.l.bf16 %v10992_v20  ;;  %v6172_v31 = vunpack.i.h.bf16 %v6170_v58  ;;  %v6171_v39 = vunpack.i.l.bf16 %v6170_v58  ;;  %vm10995_vm13 = vmmov %vm10990_vm8  ;;  %v11001_v14 = vld [vmem:[#allocation130_spill] sm:$0xff]  ;;  %4872 = vmatprep.subr.bf16.mxu0 %v6434_v0 }
 0x232   : > { %v6177_v61 = vunpack.i.h.bf16 %v6175_v28  ;;  %vm10993_vm5 = vcmask 490496   ;;  %v6176_v48 = vunpack.i.l.bf16 %v6175_v28  ;;  %v3891_v40 = vsel %vm10995_vm13, %v3859_v35, 0 }
 0x233   : > { %v2344_v29 = vsel %vm10993_vm5, %v2323_v6, %v6166_v49  ;;  %vm10994_vm7 = vmmov %vm10993_vm5  ;;  %v5212_v9 = vunpack.i.h.bf16 %v10996_v52  ;;  %v2158_v10 = vsel %vm2146_vm12, %v2137_v41, %v5457_v32  ;;  %vm10997_vm8 = vcmask 523264   ;;  %4987 = vmatpush3.bf16.msra.mxu1 %v3891_v40  ;;  %v6180_v12 = vpop.permute.xlu0 %6179  ;;  %v6195_v54 = vpop.permute.xlu1 %6194  ;;  %v11002_v41 = vld [vmem:[#allocation23_spill] sm:$0xff]  ;;  %v11004_v6 = vld [vmem:[#allocation17_spill] sm:$0xff] }
 0x234   : > { %v2345_v23 = vsel %vm10994_vm7, %v2324_v56, %v6167_v30  ;;  %v3118_v44 = vsel %vm10997_vm8, %v2344_v29, %v6171_v39  ;;  %vm10998_vm11 = vmmov %vm10997_vm8  ;;  %v5211_v8 = vunpack.i.l.bf16 %v10996_v52  ;;  %v2178_v45 = vsel %vm2167_vm14, %v2157_v59, %v5506_v62  ;;  %v11006_v59 = vld [vmem:[#allocation137_spill] sm:$0xff]  ;;  %4873 = vmatpush3.bf16.msra.mxu0 %v6435_v11  ;;  %5008 = vmatprep.subr.bf16.mxu1 %v9630_v36 }
 0x235   : > { %v3119_v33 = vsel %vm10998_vm11, %v2345_v23, %v6172_v31  ;;  %v2179_v18 = vsel %vm2167_vm14, %v2158_v10, %v5507_v43  ;;  %v2199_v57 = vsel %vm2188_vm15, %v2178_v45, %v5556_v22  ;;  %v6182_v7 = vunpack.i.h.bf16 %v6180_v12  ;;  %v11010_v10 = vld [vmem:[#allocation148_spill] sm:$0xff] }
 0x236   : > { %v3134_v17 = vpack.c.bf16 %v3119_v33, %v3118_v44  ;;  %v2200_v47 = vsel %vm2188_vm15, %v2179_v18, %v5557_v38  ;;  %v6181_v28 = vunpack.i.l.bf16 %v6180_v12  ;;  %v2220_v51 = vsel %vm2209_vm0, %v2199_v57, %v6176_v48  ;;  %v11007_v38 = vld [vmem:[#allocation88_spill] sm:$0xff] }
 0x237   : > { %v2221_v13 = vsel %vm2209_vm0, %v2200_v47, %v6177_v61  ;;  %v6187_v16 = vunpack.i.h.bf16 %v6185_v55  ;;  %v6186_v42 = vunpack.i.l.bf16 %v6185_v55  ;;  %vm10999_vm11 = vcmask 818176   ;;  %v6190_v62 = vpop.permute.xlu0 %6189  ;;  %v6205_v20 = vpop.permute.xlu1 %6204 }
 0x238   : > { %4671 = vmatmul.mubr.msk.bf16.gmra.mrb[16].mxu0 %vm10999_vm11, %v3134_v17  ;;  %vm11000_vm5 = vmmov %vm10999_vm11  ;;  %v5262_v50 = vunpack.i.h.bf16 %v11001_v14  ;;  %v5261_v30 = vunpack.i.l.bf16 %v11001_v14  ;;  %v2241_v49 = vsel %vm2230_vm1, %v2220_v51, %v6181_v28  ;;  %v2242_v35 = vsel %vm2230_vm1, %v2221_v13, %v6182_v7  ;;  %v11011_v28 = vld [vmem:[#allocation39_spill] sm:$0xff] }
 0x239   : > { %4974 = vmatprep.mubr.msk.bf16.mxu1 %vm11000_vm5, %v3134_v17  ;;  %3393 = vmatprep.mubr.bf16.mxu0 %v10887_v19  ;;  %vm11003_vm7 = vcmask 31744   ;;  %v5312_v63 = vunpack.i.h.bf16 %v11006_v59  ;;  %v5311_v43 = vunpack.i.l.bf16 %v11006_v59  ;;  %v5362_v58 = vunpack.i.h.bf16 %v11007_v38 }
 0x23a   : > { %v2055_v32 = vsel %vm11003_vm7, %v11002_v41, %v5212_v9  ;;  %vm11005_vm13 = vmmov %vm11003_vm7  ;;  %v5361_v55 = vunpack.i.l.bf16 %v11007_v38  ;;  %v6192_v22 = vunpack.i.h.bf16 %v6190_v62  ;;  %v6191_v31 = vunpack.i.l.bf16 %v6190_v62 }
 0x23b   : > { %v2054_v56 = vsel %vm11005_vm13, %v11004_v6, %v5211_v8  ;;  %v2262_v39 = vsel %vm2251_vm2, %v2241_v49, %v6186_v42  ;;  %v2263_v61 = vsel %vm2251_vm2, %v2242_v35, %v6187_v16  ;;  %v6197_v15 = vunpack.i.h.bf16 %v6195_v54  ;;  %v6200_v0 = vpop.permute.xlu0 %6199  ;;  %v6215_v8 = vpop.permute.xlu1 %6214 }
 0x23c   : > { %v6196_v29 = vunpack.i.l.bf16 %v6195_v54  ;;  %vm11008_vm8 = vcmask 64512   ;;  %v2283_v40 = vsel %vm2272_vm3, %v2262_v39, %v6191_v31  ;;  %v2284_v60 = vsel %vm2272_vm3, %v2263_v61, %v6192_v22  ;;  %v11020_v39 = vld [vmem:[#allocation20_spill] sm:$0xff] }
 0x23d   : > { %v2075_v23 = vsel %vm11008_vm8, %v2054_v56, %v5261_v30  ;;  %vm11009_vm11 = vmmov %vm11008_vm8  ;;  %v5412_v44 = vunpack.i.h.bf16 %v11010_v10  ;;  %v5411_v33 = vunpack.i.l.bf16 %v11010_v10  ;;  %v6202_v17 = vunpack.i.h.bf16 %v6200_v0 }
 0x23e   : > { %v2076_v48 = vsel %vm11009_vm11, %v2055_v32, %v5262_v50  ;;  %v2096_v52 = vsel %vm2083_vm9, %v2075_v23, %v5311_v43  ;;  %v6201_v12 = vunpack.i.l.bf16 %v6200_v0  ;;  %v2304_v54 = vsel %vm2293_vm4, %v2283_v40, %v6196_v29  ;;  %v11014_v50 = vld [vmem:[#allocation167_spill] sm:$0xff] }
 0x23f   : > { %v2097_v9 = vsel %vm2083_vm9, %v2076_v48, %v5312_v63  ;;  %v2117_v45 = vsel %vm2104_vm10, %v2096_v52, %v5361_v55  ;;  %v2305_v57 = vsel %vm2293_vm4, %v2284_v60, %v6197_v15  ;;  %v6207_v47 = vunpack.i.h.bf16 %v6205_v20  ;;  %v6210_v35 = vpop.permute.xlu0 %6209  ;;  %v6225_v41 = vpop.permute.xlu1 %6224  ;;  %v11015_v32 = vld [vmem:[#allocation187_spill] sm:$0xff] }
 0x240   : > { %v2118_v18 = vsel %vm2104_vm10, %v2097_v9, %v5362_v58  ;;  %v6206_v7 = vunpack.i.l.bf16 %v6205_v20  ;;  %v5462_v11 = vunpack.i.h.bf16 %v11011_v28  ;;  %v5461_v13 = vunpack.i.l.bf16 %v11011_v28 }
 0x241   : > { %v2325_v51 = vsel %vm2314_vm6, %v2304_v54, %v6201_v12  ;;  %v2326_v16 = vsel %vm2314_vm6, %v2305_v57, %v6202_v17  ;;  %vm11012_vm5 = vcmask 162816   ;;  %v5512_v30 = vunpack.i.h.bf16 %v11014_v50  ;;  %v11025_v12 = vld [vmem:[#allocation122_spill] sm:$0xff]  ;;  %v11026_v57 = vld [vmem:[#allocation123_spill] sm:$0xff] }
 0x242   : > { %v2138_v42 = vsel %vm11012_vm5, %v2117_v45, %v5411_v33  ;;  %vm11013_vm7 = vmmov %vm11012_vm5  ;;  %v5511_v49 = vunpack.i.l.bf16 %v11014_v50  ;;  %v5562_v6 = vunpack.i.h.bf16 %v11015_v32  ;;  %v5561_v56 = vunpack.i.l.bf16 %v11015_v32 }
 0x243   : > { %v2139_v14 = vsel %vm11013_vm7, %v2118_v18, %v5412_v44  ;;  %v6212_v59 = vunpack.i.h.bf16 %v6210_v35  ;;  %v6211_v63 = vunpack.i.l.bf16 %v6210_v35  ;;  %vm11016_vm13 = vcmask 490496   ;;  %v6220_v48 = vpop.permute.xlu0 %6219  ;;  %v6235_v40 = vpop.permute.xlu1 %6234 }
 0x244   : > { %v2346_v43 = vsel %vm11016_vm13, %v2325_v51, %v6206_v7  ;;  %vm11017_vm8 = vmmov %vm11016_vm13  ;;  %v6217_v20 = vunpack.i.h.bf16 %v6215_v8  ;;  %v6216_v38 = vunpack.i.l.bf16 %v6215_v8  ;;  %v2159_v58 = vsel %vm2146_vm12, %v2138_v42, %v5461_v13  ;;  %v11027_v7 = vld [vmem:[#allocation136_spill] sm:$0xff] }
 0x245   : > { %v2347_v62 = vsel %vm11017_vm8, %v2326_v16, %v6207_v47  ;;  %v2160_v55 = vsel %vm2146_vm12, %v2139_v14, %v5462_v11  ;;  %vm11018_vm11 = vcmask 523264   ;;  %vm11021_vm7 = vcmask 31744   ;;  %v11028_v16 = vld [vmem:[#allocation143_spill] sm:$0xff] }
 0x246   : > { %v3120_v22 = vsel %vm11018_vm11, %v2346_v43, %v6211_v63  ;;  %vm11019_vm5 = vmmov %vm11018_vm11  ;;  %v2056_v61 = vsel %vm11021_vm7, %v11020_v39, %v5216_v2  ;;  %v2180_v15 = vsel %vm2167_vm14, %v2159_v58, %v5511_v49  ;;  %v2181_v29 = vsel %vm2167_vm14, %v2160_v55, %v5512_v30  ;;  %v11024_v2 = vld [vmem:[#allocation129_spill] sm:$0xff] }
 0x247   : > { %v3121_v31 = vsel %vm11019_vm5, %v2347_v62, %v6212_v59  ;;  %v2201_v60 = vsel %vm2188_vm15, %v2180_v15, %v5561_v56  ;;  %v2202_v52 = vsel %vm2188_vm15, %v2181_v29, %v5562_v6  ;;  %v6222_v9 = vunpack.i.h.bf16 %v6220_v48  ;;  %v6230_v13 = vpop.permute.xlu0 %6229  ;;  %v6245_v51 = vpop.permute.xlu1 %6244 }
 0x248   : > { %v3135_v23 = vpack.c.bf16 %v3121_v31, %v3120_v22  ;;  %v6221_v10 = vunpack.i.l.bf16 %v6220_v48  ;;  %v2222_v44 = vsel %vm2209_vm0, %v2201_v60, %v6216_v38  ;;  %v2223_v37 = vsel %vm2209_vm0, %v2202_v52, %v6217_v20  ;;  %v11031_v20 = vld [vmem:[#allocation92_spill] sm:$0xff] }
 0x249   : > { %v6227_v33 = vunpack.i.h.bf16 %v6225_v41  ;;  %v6226_v0 = vunpack.i.l.bf16 %v6225_v41  ;;  %vm11022_vm13 = vcmask 818176   ;;  %v5267_v8 = vunpack.i.h.bf16 %v11024_v2 }
 0x24a   : > { %4672 = vmatmul.mubr.msk.bf16.gmra.mrb[20].mxu0 %vm11022_vm13, %v3135_v23  ;;  %vm11023_vm8 = vmmov %vm11022_vm13  ;;  %v5266_v45 = vunpack.i.l.bf16 %v11024_v2  ;;  %v2243_v18 = vsel %vm2230_vm1, %v2222_v44, %v6221_v10  ;;  %v2244_v17 = vsel %vm2230_vm1, %v2223_v37, %v6222_v9  ;;  %v5232_v54 = vunpack.i.h.bf16 %v11025_v12 }
 0x24b   : > { %4975 = vmatmul.mubr.msk.bf16.gmra.mrb[8].mxu1 %vm11023_vm8, %v3135_v23  ;;  %3403 = vmatprep.mubr.bf16.mxu0 %v10887_v19  ;;  %v5222_v47 = vunpack.i.h.bf16 %v11026_v57  ;;  %v5317_v28 = vunpack.i.h.bf16 %v11027_v7  ;;  %v5316_v11 = vunpack.i.l.bf16 %v11027_v7  ;;  %v5367_v42 = vunpack.i.h.bf16 %v11028_v16  ;;  %v6240_v55 = vpop.permute.xlu0 %6239  ;;  %v6255_v22 = vpop.permute.xlu1 %6254 }
 0x24c   : > { %v5366_v14 = vunpack.i.l.bf16 %v11028_v16  ;;  %v6232_v50 = vunpack.i.h.bf16 %v6230_v13  ;;  %v6231_v30 = vunpack.i.l.bf16 %v6230_v13  ;;  %v2264_v49 = vsel %vm2251_vm2, %v2243_v18, %v6226_v0  ;;  %v11036_v18 = vld [vmem:[#allocation185_spill] sm:$0xff] }
 0x24d   : > { %v2265_v35 = vsel %vm2251_vm2, %v2244_v17, %v6227_v33  ;;  %v6237_v41 = vunpack.i.h.bf16 %v6235_v40  ;;  %v6236_v32 = vunpack.i.l.bf16 %v6235_v40  ;;  %vm11029_vm11 = vcmask 64512   ;;  %v11032_v40 = vld [vmem:[#allocation153_spill] sm:$0xff]  ;;  %v11035_v33 = vld [vmem:[#allocation166_spill] sm:$0xff] }
 0x24e   : > { %v2078_v6 = vsel %vm11029_vm11, %v9566_v34, %v5267_v8  ;;  %vm11030_vm5 = vmmov %vm11029_vm11  ;;  %v2285_v59 = vsel %vm2272_vm3, %v2264_v49, %v6231_v30  ;;  %v2286_v63 = vsel %vm2272_vm3, %v2265_v35, %v6232_v50  ;;  %v5417_v38 = vunpack.i.h.bf16 %v11031_v20 }
 0x24f   : > { %v2077_v56 = vsel %vm11030_vm5, %v2056_v61, %v5266_v45  ;;  %v2099_v62 = vsel %vm2083_vm9, %v2078_v6, %v5317_v28  ;;  %v5416_v58 = vunpack.i.l.bf16 %v11031_v20  ;;  %v6242_v39 = vunpack.i.h.bf16 %v6240_v55  ;;  %v6250_v8 = vpop.permute.xlu0 %6249  ;;  %v6265_v45 = vpop.permute.xlu1 %6264 }
 0x250   : > { %v2098_v43 = vsel %vm2083_vm9, %v2077_v56, %v5316_v11  ;;  %v2120_v34 = vsel %vm2104_vm10, %v2099_v62, %v5367_v42  ;;  %v6241_v61 = vunpack.i.l.bf16 %v6240_v55  ;;  %v2306_v15 = vsel %vm2293_vm4, %v2285_v59, %v6236_v32 }
 0x251   : > { %v2119_v31 = vsel %vm2104_vm10, %v2098_v43, %v5366_v14  ;;  %v2307_v29 = vsel %vm2293_vm4, %v2286_v63, %v6237_v41  ;;  %v6247_v23 = vunpack.i.h.bf16 %v6245_v51  ;;  %v6246_v48 = vunpack.i.l.bf16 %v6245_v51 }
 0x252   : > { %v5467_v60 = vunpack.i.h.bf16 %v11032_v40  ;;  %v5466_v52 = vunpack.i.l.bf16 %v11032_v40  ;;  %v2327_v9 = vsel %vm2314_vm6, %v2306_v15, %v6241_v61  ;;  %v2328_v10 = vsel %vm2314_vm6, %v2307_v29, %v6242_v39  ;;  %v11044_v29 = vld [vmem:[#allocation31_spill] sm:$0xff] }
 0x253   : > { %vm11033_vm7 = vcmask 162816   ;;  %v5517_v0 = vunpack.i.h.bf16 %v11035_v33  ;;  %v5516_v2 = vunpack.i.l.bf16 %v11035_v33  ;;  %v5567_v17 = vunpack.i.h.bf16 %v11036_v18  ;;  %v6260_v56 = vpop.permute.xlu0 %6259  ;;  %v6275_v59 = vpop.permute.xlu1 %6274 }
 0x254   : > { %v2140_v44 = vsel %vm11033_vm7, %v2119_v31, %v5416_v58  ;;  %vm11034_vm13 = vmmov %vm11033_vm7  ;;  %v5566_v7 = vunpack.i.l.bf16 %v11036_v18  ;;  %v6252_v28 = vunpack.i.h.bf16 %v6250_v8  ;;  %v6251_v11 = vunpack.i.l.bf16 %v6250_v8  ;;  %v11043_v31 = vld [vmem:[#allocation132_spill] sm:$0xff] }
 0x255   : > { %v2141_v37 = vsel %vm11034_vm13, %v2120_v34, %v5417_v38  ;;  %vm11037_vm8 = vcmask 490496   ;;  %v6257_v16 = vunpack.i.h.bf16 %v6255_v22  ;;  %v6256_v42 = vunpack.i.l.bf16 %v6255_v22 }
 0x256   : > { %v2348_v13 = vsel %vm11037_vm8, %v2327_v9, %v6246_v48  ;;  %vm11038_vm11 = vmmov %vm11037_vm8  ;;  %v2161_v14 = vsel %vm2146_vm12, %v2140_v44, %v5466_v52  ;;  %v2162_v50 = vsel %vm2146_vm12, %v2141_v37, %v5467_v60  ;;  %vm11039_vm5 = vcmask 523264   ;;  %v11046_v48 = vld [vmem:[#allocation22_spill] sm:$0xff]  ;;  %v11048_v60 = vld [vmem:[#allocation139_spill] sm:$0xff] }
 0x257   : > { %v2349_v51 = vsel %vm11038_vm11, %v2328_v10, %v6247_v23  ;;  %v3122_v30 = vsel %vm11039_vm5, %v2348_v13, %v6251_v11  ;;  %vm11040_vm7 = vmmov %vm11039_vm5  ;;  %v5221_v35 = vunpack.i.l.bf16 %v11026_v57  ;;  %v2182_v41 = vsel %vm2167_vm14, %v2161_v14, %v5516_v2  ;;  %v6270_v10 = vpop.permute.xlu0 %6269  ;;  %v6285_v44 = vpop.permute.xlu1 %6284  ;;  %v11049_v37 = vld [vmem:[#allocation144_spill] sm:$0xff] }
 0x258   : > { %v3123_v49 = vsel %vm11040_vm7, %v2349_v51, %v6252_v28  ;;  %v2183_v32 = vsel %vm2167_vm14, %v2162_v50, %v5517_v0  ;;  %v2203_v63 = vsel %vm2188_vm15, %v2182_v41, %v5566_v7  ;;  %v6262_v62 = vunpack.i.h.bf16 %v6260_v56 }
 0x259   : > { %v3136_v6 = vpack.c.bf16 %v3123_v49, %v3122_v30  ;;  %v2204_v43 = vsel %vm2188_vm15, %v2183_v32, %v5567_v17  ;;  %v6261_v20 = vunpack.i.l.bf16 %v6260_v56  ;;  %v2224_v58 = vsel %vm2209_vm0, %v2203_v63, %v6256_v42 }
 0x25a   : > { %v2225_v38 = vsel %vm2209_vm0, %v2204_v43, %v6257_v16  ;;  %v6267_v55 = vunpack.i.h.bf16 %v6265_v45  ;;  %v6266_v22 = vunpack.i.l.bf16 %v6265_v45  ;;  %vm11041_vm13 = vcmask 818176   ;;  %v11052_v16 = vld [vmem:[#allocation42_spill] sm:$0xff] }
 0x25b   : > { %4673 = vmatmul.mubr.msk.bf16.gmra.mrb[24].mxu0 %vm11041_vm13, %v3136_v6  ;;  %vm11042_vm8 = vmmov %vm11041_vm13  ;;  %v5272_v34 = vunpack.i.h.bf16 %v11043_v31  ;;  %v5271_v39 = vunpack.i.l.bf16 %v11043_v31  ;;  %v2245_v61 = vsel %vm2230_vm1, %v2224_v58, %v6261_v20  ;;  %v2246_v15 = vsel %vm2230_vm1, %v2225_v38, %v6262_v62  ;;  %v6280_v50 = vpop.permute.xlu0 %6279  ;;  %v6295_v30 = vpop.permute.xlu1 %6294  ;;  %v11053_v43 = vld [vmem:[#allocation78_spill] sm:$0xff]  ;;  %v11056_v31 = vld [vmem:[#allocation172_spill] sm:$0xff] }
 0x25c   : > { %4978 = vmatprep.mubr.msk.bf16.mxu1 %vm11042_vm8, %v3136_v6  ;;  %3413 = vmatprep.mubr.bf16.mxu0 %v10887_v19  ;;  %vm11045_vm11 = vcmask 31744   ;;  %v5322_v52 = vunpack.i.h.bf16 %v11048_v60  ;;  %v5321_v9 = vunpack.i.l.bf16 %v11048_v60  ;;  %v5372_v33 = vunpack.i.h.bf16 %v11049_v37 }
 0x25d   : > { %v2059_v23 = vsel %vm11045_vm11, %v11044_v29, %v5222_v47  ;;  %vm11047_vm5 = vmmov %vm11045_vm11  ;;  %v5371_v0 = vunpack.i.l.bf16 %v11049_v37  ;;  %v6272_v2 = vunpack.i.h.bf16 %v6270_v10  ;;  %v6271_v8 = vunpack.i.l.bf16 %v6270_v10  ;;  %v11057_v29 = vld [vmem:[#allocation189_spill] sm:$0xff] }
 0x25e   : > { %v2058_v40 = vsel %vm11047_vm5, %v11046_v48, %v5221_v35  ;;  %v2266_v57 = vsel %vm2251_vm2, %v2245_v61, %v6266_v22  ;;  %v2267_v45 = vsel %vm2251_vm2, %v2246_v15, %v6267_v55  ;;  %v6277_v47 = vunpack.i.h.bf16 %v6275_v59 }
 0x25f   : > { %v6276_v18 = vunpack.i.l.bf16 %v6275_v59  ;;  %vm11050_vm7 = vcmask 64512   ;;  %v2287_v28 = vsel %vm2272_vm3, %v2266_v57, %v6271_v8  ;;  %v2288_v11 = vsel %vm2272_vm3, %v2267_v45, %v6272_v2  ;;  %v6290_v61 = vpop.permute.xlu0 %6289  ;;  %v6305_v15 = vpop.permute.xlu1 %6304 }
 0x260   : > { %v2079_v17 = vsel %vm11050_vm7, %v2058_v40, %v5271_v39  ;;  %vm11051_vm13 = vmmov %vm11050_vm7  ;;  %v5422_v42 = vunpack.i.h.bf16 %v11052_v16  ;;  %v5421_v14 = vunpack.i.l.bf16 %v11052_v16  ;;  %v6282_v41 = vunpack.i.h.bf16 %v6280_v50 }
 0x261   : > { %v2080_v7 = vsel %vm11051_vm13, %v2059_v23, %v5272_v34  ;;  %v2100_v13 = vsel %vm2083_vm9, %v2079_v17, %v5321_v9  ;;  %v6281_v32 = vunpack.i.l.bf16 %v6280_v50  ;;  %v2308_v6 = vsel %vm2293_vm4, %v2287_v28, %v6276_v18 }
 0x262   : > { %v2101_v51 = vsel %vm2083_vm9, %v2080_v7, %v5322_v52  ;;  %v2121_v49 = vsel %vm2104_vm10, %v2100_v13, %v5371_v0  ;;  %v2309_v56 = vsel %vm2293_vm4, %v2288_v11, %v6277_v47  ;;  %v6287_v59 = vunpack.i.h.bf16 %v6285_v44 }
 0x263   : > { %v2122_v35 = vsel %vm2104_vm10, %v2101_v51, %v5372_v33  ;;  %v6286_v63 = vunpack.i.l.bf16 %v6285_v44  ;;  %v5472_v62 = vunpack.i.h.bf16 %v11053_v43  ;;  %v5471_v20 = vunpack.i.l.bf16 %v11053_v43  ;;  %v6300_v47 = vpop.permute.xlu0 %6299  ;;  %v6315_v18 = vpop.permute.xlu1 %6314  ;;  %v11067_v43 = vld [vmem:[#allocation24_spill] sm:$0xff] }
 0x264   : > { %v2329_v38 = vsel %vm2314_vm6, %v2308_v6, %v6281_v32  ;;  %v2330_v58 = vsel %vm2314_vm6, %v2309_v56, %v6282_v41  ;;  %vm11054_vm8 = vcmask 162816   ;;  %v5522_v34 = vunpack.i.h.bf16 %v11056_v31  ;;  %v11066_v32 = vld [vmem:[#allocation138_spill] sm:$0xff] }
 0x265   : > { %v2142_v55 = vsel %vm11054_vm8, %v2121_v49, %v5421_v14  ;;  %vm11055_vm11 = vmmov %vm11054_vm8  ;;  %v5521_v39 = vunpack.i.l.bf16 %v11056_v31  ;;  %v5571_v23 = vunpack.i.l.bf16 %v11057_v29  ;;  %v6077_v48 = vunpack.i.h.bf16 %v9384_v46  ;;  %v11064_v14 = vld [vmem:[#allocation131_spill] sm:$0xff] }
 0x266   : > { %v2143_v22 = vsel %vm11055_vm11, %v2122_v35, %v5422_v42  ;;  %v6292_v40 = vunpack.i.h.bf16 %v6290_v61  ;;  %v6291_v60 = vunpack.i.l.bf16 %v6290_v61  ;;  %vm11058_vm5 = vcmask 490496  }
 0x267   : > { %v2350_v52 = vsel %vm11058_vm5, %v2329_v38, %v6286_v63  ;;  %vm11059_vm7 = vmmov %vm11058_vm5  ;;  %v6297_v10 = vunpack.i.h.bf16 %v6295_v30  ;;  %v6296_v44 = vunpack.i.l.bf16 %v6295_v30  ;;  %v2163_v37 = vsel %vm2146_vm12, %v2142_v55, %v5471_v20  ;;  %v6325_v63 = vpop.permute.xlu1 %6324  ;;  %v11069_v20 = vld [vmem:[#allocation87_spill] sm:$0xff] }
 0x268   : > { %v2351_v9 = vsel %vm11059_vm7, %v2330_v58, %v6287_v59  ;;  %v2164_v33 = vsel %vm2146_vm12, %v2143_v22, %v5472_v62  ;;  %vm11060_vm13 = vcmask 523264   ;;  %v5231_v8 = vunpack.i.l.bf16 %v11025_v12  ;;  %v6310_v59 = vpop.permute.xlu0 %6309 }
 0x269   : > { %v3124_v0 = vsel %vm11060_vm13, %v2350_v52, %v6291_v60  ;;  %vm11061_vm8 = vmmov %vm11060_vm13  ;;  %v2184_v46 = vsel %vm2167_vm14, %v2163_v37, %v5521_v39  ;;  %v2185_v57 = vsel %vm2167_vm14, %v2164_v33, %v5522_v34  ;;  %v6302_v28 = vunpack.i.h.bf16 %v6300_v47 }
 0x26a   : > { %v3125_v2 = vsel %vm11061_vm8, %v2351_v9, %v6292_v40  ;;  %v2205_v17 = vsel %vm2188_vm15, %v2184_v46, %v5571_v23  ;;  %v2206_v7 = vsel %vm2188_vm15, %v2185_v57, %v6077_v48  ;;  %v6301_v11 = vunpack.i.l.bf16 %v6300_v47 }
 0x26b   : > { %v3137_v45 = vpack.c.bf16 %v3125_v2, %v3124_v0  ;;  %v2226_v13 = vsel %vm2209_vm0, %v2205_v17, %v6296_v44  ;;  %v2227_v51 = vsel %vm2209_vm0, %v2206_v7, %v6297_v10  ;;  %v6307_v16 = vunpack.i.h.bf16 %v6305_v15  ;;  %v6335_v60 = vpop.permute.xlu1 %6334 }
 0x26c   : > { %v6306_v42 = vunpack.i.l.bf16 %v6305_v15  ;;  %vm11062_vm11 = vcmask 818176   ;;  %v5277_v50 = vunpack.i.h.bf16 %v11064_v14  ;;  %v5276_v30 = vunpack.i.l.bf16 %v11064_v14  ;;  %v6320_v23 = vpop.permute.xlu0 %6319 }
 0x26d   : > { %4674 = vmatmul.mubr.msk.bf16.gmra.mrb[28].mxu0 %vm11062_vm11, %v3137_v45  ;;  %vm11063_vm5 = vmmov %vm11062_vm11  ;;  %v2247_v49 = vsel %vm2230_vm1, %v2226_v13, %v6301_v11  ;;  %v2248_v35 = vsel %vm2230_vm1, %v2227_v51, %v6302_v28  ;;  %vm11065_vm7 = vcmask 31744   ;;  %v5327_v6 = vunpack.i.h.bf16 %v11066_v32 }
 0x26e   : > { %4979 = vmatmul.mubr.msk.bf16.gmra.mrb[12].mxu1 %vm11063_vm5, %v3137_v45  ;;  %3423 = vmatprep.mubr.bf16.mxu0 %v10887_v19  ;;  %v2061_v41 = vsel %vm11065_vm7, %v10898_v5, %v5232_v54  ;;  %v5326_v56 = vunpack.i.l.bf16 %v11066_v32  ;;  %vm11068_vm13 = vmmov %vm11065_vm7  ;;  %v5376_v38 = vunpack.i.l.bf16 %v11069_v20  ;;  %v6312_v58 = vunpack.i.h.bf16 %v6310_v59 }
 0x26f   : > { %v2060_v62 = vsel %vm11068_vm13, %v11067_v43, %v5231_v8  ;;  %v6311_v55 = vunpack.i.l.bf16 %v6310_v59  ;;  %v2268_v22 = vsel %vm2251_vm2, %v2247_v49, %v6306_v42  ;;  %v2269_v12 = vsel %vm2251_vm2, %v2248_v35, %v6307_v16  ;;  %v11072_v8 = vld [vmem:[#allocation149_spill] sm:$0xff]  ;;  %v6345_v51 = vpop.permute.xlu1 %6344  ;;  %v11076_v16 = vld [vmem:[#allocation168_spill] sm:$0xff] }
 0x270   : > { %v6317_v31 = vunpack.i.h.bf16 %v6315_v18  ;;  %v6316_v34 = vunpack.i.l.bf16 %v6315_v18  ;;  %vm11070_vm8 = vcmask 64512   ;;  %v2290_v61 = vsel %vm2272_vm3, %v2269_v12, %v6312_v58  ;;  %v11073_v18 = vld [vmem:[#allocation154_spill] sm:$0xff]  ;;  %v6330_v13 = vpop.permute.xlu0 %6329 }
 0x271   : > { %v2082_v5 = vsel %vm11070_vm8, %v2061_v41, %v5277_v50  ;;  %vm11071_vm11 = vmmov %vm11070_vm8  ;;  %v2289_v39 = vsel %vm2272_vm3, %v2268_v22, %v6311_v55  ;;  %v6327_v48 = vunpack.i.h.bf16 %v6325_v63  ;;  %v6326_v40 = vunpack.i.l.bf16 %v6325_v63 }
 0x272   : > { %v2081_v54 = vsel %vm11071_vm11, %v2060_v62, %v5276_v30  ;;  %v2103_v29 = vsel %vm2083_vm9, %v2082_v5, %v5327_v6  ;;  %v6322_v52 = vunpack.i.h.bf16 %v6320_v23  ;;  %v6321_v9 = vunpack.i.l.bf16 %v6320_v23 }
 0x273   : > { %v2102_v15 = vsel %vm2083_vm9, %v2081_v54, %v5326_v56  ;;  %v6337_v10 = vunpack.i.h.bf16 %v6335_v60  ;;  %v6336_v44 = vunpack.i.l.bf16 %v6335_v60  ;;  %v5377_v37 = vunpack.i.h.bf16 %v11069_v20  ;;  %v6355_v62 = vpop.permute.xlu1 %6354 }
 0x274   : > { %v2123_v33 = vsel %vm2104_vm10, %v2102_v15, %v5376_v38  ;;  %v2310_v0 = vsel %vm2293_vm4, %v2289_v39, %v6316_v34  ;;  %v2311_v2 = vsel %vm2293_vm4, %v2290_v61, %v6317_v31  ;;  %v5427_v46 = vunpack.i.h.bf16 %v11072_v8  ;;  %v6340_v43 = vpop.permute.xlu0 %6339 }
 0x275   : > { %v5426_v57 = vunpack.i.l.bf16 %v11072_v8  ;;  %v2331_v45 = vsel %vm2314_vm6, %v2310_v0, %v6321_v9  ;;  %v2332_v47 = vsel %vm2314_vm6, %v2311_v2, %v6322_v52  ;;  %v5477_v17 = vunpack.i.h.bf16 %v11073_v18 }
 0x276   : > { %v5476_v7 = vunpack.i.l.bf16 %v11073_v18  ;;  %vm11074_vm9 = vcmask 490496   ;;  %v5527_v42 = vunpack.i.h.bf16 %v11076_v16  ;;  %v5526_v14 = vunpack.i.l.bf16 %v11076_v16 }
 0x277   : > { %v2352_v28 = vsel %vm11074_vm9, %v2331_v45, %v6326_v40  ;;  %vm11075_vm5 = vmmov %vm11074_vm9  ;;  %vm11077_vm7 = vcmask 523264   ;;  %v2124_v49 = vsel %vm2104_vm10, %v2103_v29, %v5377_v37  ;;  %v6332_v35 = vunpack.i.h.bf16 %v6330_v13  ;;  %v6365_v61 = vpop.permute.xlu1 %6364 }
 0x278   : > { %v2353_v11 = vsel %vm11075_vm5, %v2332_v47, %v6327_v48  ;;  %v3126_v50 = vsel %vm11077_vm7, %v2352_v28, %v6336_v44  ;;  %vm11078_vm13 = vmmov %vm11077_vm7  ;;  %v6331_v41 = vunpack.i.l.bf16 %v6330_v13  ;;  %vm11079_vm8 = vcmask 162816   ;;  %v6350_v39 = vpop.permute.xlu0 %6349 }
 0x279   : > { %v3127_v30 = vsel %vm11078_vm13, %v2353_v11, %v6337_v10  ;;  %v2144_v6 = vsel %vm11079_vm8, %v2123_v33, %v5426_v57  ;;  %vm11080_vm11 = vmmov %vm11079_vm8  ;;  %vm11081_vm9 = vcmask 818176   ;;  %v6342_v58 = vunpack.i.h.bf16 %v6340_v43 }
 0x27a   : > { %v3138_v32 = vpack.c.bf16 %v3127_v30, %v3126_v50  ;;  %v2145_v56 = vsel %vm11080_vm11, %v2124_v49, %v5427_v46  ;;  %v2165_v59 = vsel %vm2146_vm12, %v2144_v6, %v5476_v7  ;;  %vm11082_vm5 = vmmov %vm11081_vm9  ;;  %v6341_v55 = vunpack.i.l.bf16 %v6340_v43  ;;  %v11088_v50 = vld [vmem:[#allocation43_spill] sm:$0xff]  ;;  %v11094_v6 = vld [vmem:[#allocation48_spill] sm:$0xff] }
 0x27b   : > { %v2166_v63 = vsel %vm2146_vm12, %v2145_v56, %v5477_v17  ;;  %v2186_v20 = vsel %vm2167_vm14, %v2165_v59, %v5526_v14  ;;  %v6347_v31 = vunpack.i.h.bf16 %v6345_v51  ;;  %v6346_v34 = vunpack.i.l.bf16 %v6345_v51  ;;  %v6375_v37 = vpop.permute.xlu1 %6374  ;;  %v11087_v14 = vld [vmem:[#allocation45_spill] sm:$0xff]  ;;  %v11095_v56 = vld [vmem:[#allocation47_spill] sm:$0xff] }
 0x27c   : > { %4675 = vmatmul.mubr.msk.bf16.gmra.mrb[32].mxu0 %vm11081_vm9, %v3138_v32  ;;  %4982 = vmatprep.mubr.msk.bf16.mxu1 %vm11082_vm5, %v3138_v32  ;;  %v2187_v38 = vsel %vm2167_vm14, %v2166_v63, %v5527_v42  ;;  %v2207_v12 = vsel %vm2188_vm15, %v2186_v20, %v6331_v41  ;;  %v6352_v15 = vunpack.i.h.bf16 %v6350_v39  ;;  %v6351_v29 = vunpack.i.l.bf16 %v6350_v39  ;;  %v6360_v9 = vpop.permute.xlu0 %6359  ;;  %vm11085_vm14 = vmmov %vm11077_vm7  ;;  %v11093_v41 = vld [vmem:[#allocation49_spill] sm:$0xff]  ;;  %v6437_v63 = vld [vmem:[%s10161_s5 + $0x88] sm:$0xff]  }
 0x27d   : > { %3433 = vmatprep.mubr.bf16.mxu0 %v10887_v19  ;;  %v2208_v22 = vsel %vm2188_vm15, %v2187_v38, %v6332_v35  ;;  %v2228_v5 = vsel %vm2209_vm0, %v2207_v12, %v6341_v55  ;;  %v6357_v40 = vunpack.i.h.bf16 %v6355_v62  ;;  %v6356_v19 = vunpack.i.l.bf16 %v6355_v62  ;;  %vm11086_vm15 = vmmov %vm11077_vm7  ;;  %v11092_v35 = vld [vmem:[#allocation44_spill] sm:$0xff]  ;;  %v6438_v43 = vld [vmem:[%s10161_s5 + $0x90] sm:$0xff]  }
 0x27e   : > { %v2229_v54 = vsel %vm2209_vm0, %v2208_v22, %v6342_v58  ;;  %v2249_v48 = vsel %vm2230_vm1, %v2228_v5, %v6346_v34  ;;  %v6362_v10 = vunpack.i.h.bf16 %v6360_v9  ;;  %v6361_v44 = vunpack.i.l.bf16 %v6360_v9  ;;  %vm11089_vm0 = vmmov %vm11082_vm5  ;;  %v11098_v62 = vld [vmem:[#allocation46_spill] sm:$0xff]  ;;  %v11100_v58 = vld [vmem:[#allocation53_spill] sm:$0xff] }
 0x27f   : > { %v2250_v23 = vsel %vm2230_vm1, %v2229_v54, %v6347_v31  ;;  %v2270_v60 = vsel %vm2251_vm2, %v2249_v48, %v6351_v29  ;;  %v6367_v2 = vunpack.i.h.bf16 %v6365_v61  ;;  %v6366_v8 = vunpack.i.l.bf16 %v6365_v61  ;;  %vm11090_vm1 = vmmov %vm11089_vm0  ;;  %v11099_v20 = vld [vmem:[#allocation54_spill] sm:$0xff]  ;;  %v11101_v55 = vld [vmem:[#allocation51_spill] sm:$0xff] }
 0x280   : > { %v2271_v52 = vsel %vm2251_vm2, %v2250_v23, %v6352_v15  ;;  %v2291_v33 = vsel %vm2272_vm3, %v2270_v60, %v6356_v19  ;;  %v6370_v45 = vpop.permute.xlu0 %6369  ;;  %v6377_v47 = vunpack.i.h.bf16 %v6375_v37  ;;  %v6376_v18 = vunpack.i.l.bf16 %v6375_v37  ;;  %v6439_v12 = vld [vmem:[%s10161_s5 + $0x98] sm:$0xff]   ;;  %v6441_v39 = vld [vmem:[%s10161_s5 + $0xa8] sm:$0xff]   ;;  %v6442_v61 = vld [vmem:[%s10161_s5 + $0xb0] sm:$0xff]  }
 0x281   : > { %v2292_v0 = vsel %vm2272_vm3, %v2271_v52, %v6357_v40  ;;  %v2312_v46 = vsel %vm2293_vm4, %v2291_v33, %v6361_v44  ;;  %v6372_v17 = vunpack.i.h.bf16 %v6370_v45  ;;  %v6371_v7 = vunpack.i.l.bf16 %v6370_v45  ;;  %v11104_v31 = vld [vmem:[#allocation50_spill] sm:$0xff]  ;;  %v3634_v40 = vld [vmem:[%s10160_s4] sm:$0x7] }
 0x282   : > { %v2313_v57 = vsel %vm2293_vm4, %v2292_v0, %v6362_v10  ;;  %v2333_v28 = vsel %vm2314_vm6, %v2312_v46, %v6366_v8  ;;  %vm11083_vm10 = vcmask 490496   ;;  %v3849_v30 = vpack.c.bf16 %v11088_v50, %v11087_v14  ;;  %v11105_v34 = vld [vmem:[#allocation62_spill] sm:$0xff] }
 0x283   : > { %v2334_v11 = vsel %vm2314_vm6, %v2313_v57, %v6367_v2  ;;  %v2354_v13 = vsel %vm11083_vm10, %v2333_v28, %v6371_v7  ;;  %vm11084_vm12 = vmmov %vm11083_vm10  ;;  %vm11091_vm2 = vcmask 31744   ;;  %v3850_v32 = vpack.c.bf16 %v11093_v41, %v11092_v35  ;;  %v6443_v48 = vld [vmem:[%s10161_s5 + $0xb8] sm:$0xff]  }
 0x284   : > { %v2355_v51 = vsel %vm11084_vm12, %v2334_v11, %v6372_v17  ;;  %v3128_v16 = vsel %vm11085_vm14, %v2354_v13, %v6376_v18  ;;  %v3851_v59 = vpack.c.bf16 %v11095_v56, %v11094_v6  ;;  %vm11096_vm3 = vmmov %vm11091_vm2  ;;  %v3852_v38 = vpack.c.bf16 %v11099_v20, %v11098_v62 }
 0x285   : > { %v3129_v42 = vsel %vm11086_vm15, %v2355_v51, %v6377_v47  ;;  %vm11097_vm4 = vmmov %vm11091_vm2  ;;  %v3853_v22 = vpack.c.bf16 %v11101_v55, %v11100_v58  ;;  %v3854_v5 = vpack.c.bf16 %v11105_v34, %v11104_v31  ;;  %v3855_v54 = vpack.c.bf16 %v10871_v24, %v10870_v4  ;;  %v3557_v24 = vld [vmem:[%s10159_s3] sm:$0x7] }
 0x286   : > { %v3139_v49 = vpack.c.bf16 %v3129_v42, %v3128_v16  ;;  %vm11102_vm6 = vmmov %vm11091_vm2  ;;  %v3561_v15 = vsub.s32 0, %v10886_v3  ;;  %v3856_v4 = vpack.c.bf16 %v10901_v21, %v10900_v1  ;;  %v3565_v29 = vsub.s32 1, %v10886_v3 }
 0x287   : > { %vm11103_vm7 = vmmov %vm11091_vm2  ;;  %v3857_v23 = vpack.c.bf16 %v10908_v25, %v10907_v26  ;;  %v3858_v9 = vpack.c.bf16 %v10939_v27, %v10938_v53  ;;  %v3569_v7 = vsub.s32 2, %v10886_v3 }
 0x288   : > { %4676 = vmatmul.mubr.msk.bf16.gmra.mrb[36].mxu0 %vm11089_vm0, %v3139_v49  ;;  %4983 = vmatmul.mubr.msk.bf16.gmra.mrb[16].mxu1 %vm11090_vm1, %v3139_v49  ;;  %vm11106_vm13 = vmmov %vm11091_vm2  ;;  %v9911_v1 = vrot.slane %v3557_v24, %v3561_v15  ;;  %v9914_v21 = vrot.slane %v3557_v24, %v3565_v29  ;;  %v9917_v19 = vrot.slane %v3634_v40, %v3561_v15 }
 0x289   : > { %4988 = vmatprep.mubr.msk.bf16.mxu1 %vm11091_vm2, %v3849_v30  ;;  %vm11107_vm8 = vmmov %vm11091_vm2  ;;  %v9919_v25 = vrot.slane %v3634_v40, %v3565_v29  ;;  %v9933_v28 = vrot.slane %v3557_v24, %v3569_v7  ;;  %v9935_v11 = vrot.slane %v3634_v40, %v3569_v7 }
 0x28a   : > { %vm11108_vm11 = vmmov %vm11091_vm2 }
 0x28b   : > { %vm11109_vm9 = vmmov %vm11091_vm2 }
 0x28c   : > { %vm11110_vm5 = vmmov %vm11091_vm2 }
 0x290   : > { %4989 = vmatmul.mubr.msk.bf16.vlgmr.msra.gmra.mrb[20].mxu1 %vm11096_vm3, %v3850_v32 }
 0x291   : > { %4992 = vmatprep.mubr.msk.bf16.mxu1 %vm11097_vm4, %v3851_v59  ;;  %5009 = vmatpush3.bf16.msra.mxu1 %v9630_v36  ;;  %v6440_v36 = vld [vmem:[%s10161_s5 + $0xa0] sm:$0xff]  }
 0x292   : > { %5010 = vmatprep.subr.bf16.mxu1 %v6437_v63 }
 0x295   : > { %5011 = vmatpush3.bf16.msra.mxu1 %v6437_v63 }
 0x296   : > { %5012 = vmatprep.subr.bf16.mxu1 %v6438_v43 }
 0x298   : > { %4993 = vmatmul.mubr.msk.bf16.gmra.mrb[24].mxu1 %vm11102_vm6, %v3852_v38 }
 0x299   : > { %4996 = vmatprep.mubr.msk.bf16.mxu1 %vm11103_vm7, %v3853_v22  ;;  %5013 = vmatpush3.bf16.msra.mxu1 %v6438_v43 }
 0x29a   : > { %5014 = vmatprep.subr.bf16.mxu1 %v6439_v12 }
 0x29d   : > { %5015 = vmatpush3.bf16.msra.mxu1 %v6439_v12 }
 0x29e   : > { %5016 = vmatprep.subr.bf16.mxu1 %v6440_v36 }
 0x2a0   : > { %4997 = vmatmul.mubr.msk.bf16.gmra.mrb[28].mxu1 %vm11106_vm13, %v3854_v5 }
 0x2a1   : > { %5000 = vmatprep.mubr.msk.bf16.mxu1 %vm11107_vm8, %v3855_v54  ;;  %5017 = vmatpush3.bf16.msra.mxu1 %v6440_v36 }
 0x2a2   : > { %5018 = vmatprep.subr.bf16.mxu1 %v6441_v39 }
 0x2a5   : > { %5019 = vmatpush3.bf16.msra.mxu1 %v6441_v39 }
 0x2a6   : > { %5020 = vmatprep.subr.bf16.mxu1 %v6442_v61 }
 0x2a8   : > { %5001 = vmatmul.mubr.msk.bf16.gmra.mrb[32].mxu1 %vm11108_vm11, %v3856_v4 }
 0x2a9   : > { %5004 = vmatprep.mubr.msk.bf16.mxu1 %vm11109_vm9, %v3857_v23  ;;  %5021 = vmatpush3.bf16.msra.mxu1 %v6442_v61  ;;  %v3345_v26 = vpop.f32.mrb[0].mxu0 }
 0x2aa   : > { %5022 = vmatprep.subr.bf16.mxu1 %v6443_v48  ;;  %v3574_v60 = vmul.f32 %v9911_v1, %v3345_v26  ;;  %v3347_v52 = vpop.f32.mrb[1].mxu0 }
 0x2ab   : > { %v3575_v10 = vmul.f32 %v9914_v21, %v3347_v52  ;;  %v3349_v44 = vpop.f32.mrb[2].mxu0 }
 0x2ac   : > { %v3651_v37 = vadd.f32 %v9917_v19, %v3574_v60  ;;  %v3577_v33 = vmul.f32 %v9911_v1, %v3349_v44  ;;  %v3351_v0 = vpop.f32.mrb[3].mxu0 }
 0x2ad   : > { %5023 = vmatpush3.bf16.msra.mxu1 %v6443_v48  ;;  %v3652_v2 = vadd.f32 %v9919_v25, %v3575_v10  ;;  %v3578_v8 = vmul.f32 %v9914_v21, %v3351_v0 }
 0x2ae   : > { %v3654_v46 = vadd.f32 %v9917_v19, %v3577_v33  ;;  %v3711_v53 = vmax.f32 %v3651_v37, 0.0 }
 0x2af   : > { %v3655_v57 = vadd.f32 %v9919_v25, %v3578_v8  ;;  %v3712_v45 = vmax.f32 %v3652_v2, 0.0 }
 0x2b0   : > { %5005 = vmatmul.mubr.msk.bf16.gmra.mrb[36].mxu1 %vm11110_vm5, %v3858_v9  ;;  %v3714_v27 = vmax.f32 %v3654_v46, 0.0 }
 0x2b1   : > { %v3715_v47 = vmax.f32 %v3655_v57, 0.0 }
 0x2b2   : > { %v3771_v18 = vpack.c.bf16 %v3714_v27, %v3711_v53 }
 0x2b3   : > { %v3772_v17 = vpack.c.bf16 %v3715_v47, %v3712_v45 }
 0x2b5   : > { %4182 = vmatprep.mubr.bf16.mxu0 %v3772_v17 }
 0x2b6   : > { %4183 = vmatmul.mubr.bf16.vlgmr.msra.gmra.mrb[40].mxu0 %v3771_v18 }
 0x2c9   : > { %v3355_v13 = vpop.f32.mrb[4].mxu0  ;;  %v4968_v51 = vpop.f32.mrb[0].mxu1 }
 0x2ca   : > { %v3580_v16 = vmul.f32 %v9911_v1, %v3355_v13  ;;  %v3582_v42 = vmul.f32 %v4968_v51, %v9933_v28  ;;  %v3357_v14 = vpop.f32.mrb[5].mxu0  ;;  %v3478_v50 = vpop.f32.mrb[1].mxu1 }
 0x2cb   : > { %v3581_v30 = vmul.f32 %v9914_v21, %v3357_v14  ;;  %v3576_v49 = vmul.f32 %v9933_v28, %v3478_v50  ;;  %v3359_v35 = vpop.f32.mrb[6].mxu0  ;;  %v4969_v41 = vpop.f32.mrb[2].mxu1 }
 0x2cc   : > { %v3657_v3 = vadd.f32 %v9917_v19, %v3580_v16  ;;  %v3659_v32 = vadd.f32 %v9935_v11, %v3582_v42  ;;  %v3583_v6 = vmul.f32 %v9911_v1, %v3359_v35  ;;  %v3585_v56 = vmul.f32 %v4969_v41, %v9933_v28  ;;  %v3361_v59 = vpop.f32.mrb[7].mxu0  ;;  %v3481_v63 = vpop.f32.mrb[3].mxu1 }
 0x2cd   : > { %v3658_v43 = vadd.f32 %v9919_v25, %v3581_v30  ;;  %v3653_v62 = vadd.f32 %v9935_v11, %v3576_v49  ;;  %v3584_v20 = vmul.f32 %v9914_v21, %v3361_v59  ;;  %v3579_v38 = vmul.f32 %v9933_v28, %v3481_v63 }
 0x2ce   : > { %v3660_v58 = vadd.f32 %v9917_v19, %v3583_v6  ;;  %v3662_v55 = vadd.f32 %v9935_v11, %v3585_v56  ;;  %v3717_v36 = vmax.f32 %v3657_v3, 0.0  ;;  %v3719_v31 = vmax.f32 %v3659_v32, 0.0 }
 0x2cf   : > { %v3661_v22 = vadd.f32 %v9919_v25, %v3584_v20  ;;  %v3656_v12 = vadd.f32 %v9935_v11, %v3579_v38  ;;  %v3718_v54 = vmax.f32 %v3658_v43, 0.0  ;;  %v3713_v39 = vmax.f32 %v3653_v62, 0.0 }
 0x2d0   : > { %v3720_v34 = vmax.f32 %v3660_v58, 0.0  ;;  %v3722_v5 = vmax.f32 %v3662_v55, 0.0 }
 0x2d1   : > { %v3721_v61 = vmax.f32 %v3661_v22, 0.0  ;;  %v3716_v15 = vmax.f32 %v3656_v12, 0.0 }
 0x2d2   : > { %v3776_v4 = vpack.c.bf16 %v3722_v5, %v3719_v31  ;;  %v3774_v24 = vpack.c.bf16 %v3720_v34, %v3717_v36 }
 0x2d3   : > { %v3775_v29 = vpack.c.bf16 %v3721_v61, %v3718_v54  ;;  %v3773_v23 = vpack.c.bf16 %v3716_v15, %v3713_v39 }
 0x2d5   : > { %4190 = vmatprep.mubr.bf16.mxu0 %v3775_v29  ;;  %5024 = vmatprep.mubr.bf16.mxu1 %v3773_v23 }
 0x2d6   : > { %4191 = vmatmul.mubr.bf16.gmra.mrb[44].mxu0 %v3774_v24  ;;  %5025 = vmatmul.mubr.bf16.vlgmr.msra.gmra.mrb[20].mxu1 %v3776_v4 }
 0x2e8   : > { %v3365_v48 = vpop.f32.mrb[8].mxu0 }
 0x2e9   : > { %v3586_v40 = vmul.f32 %v9911_v1, %v3365_v48  ;;  %v3367_v26 = vpop.f32.mrb[9].mxu0 }
 0x2ea   : > { %v3587_v60 = vmul.f32 %v9914_v21, %v3367_v26  ;;  %v3369_v52 = vpop.f32.mrb[10].mxu0 }
 0x2eb   : > { %v3663_v9 = vadd.f32 %v9917_v19, %v3586_v40  ;;  %v3589_v10 = vmul.f32 %v9911_v1, %v3369_v52  ;;  %v3371_v44 = vpop.f32.mrb[11].mxu0 }
 0x2ec   : > { %v3664_v37 = vadd.f32 %v9919_v25, %v3587_v60  ;;  %v3590_v33 = vmul.f32 %v9914_v21, %v3371_v44 }
 0x2ed   : > { %v3666_v0 = vadd.f32 %v9917_v19, %v3589_v10  ;;  %v3723_v8 = vmax.f32 %v3663_v9, 0.0 }
 0x2ee   : > { %v3667_v2 = vadd.f32 %v9919_v25, %v3590_v33  ;;  %v3724_v57 = vmax.f32 %v3664_v37, 0.0 }
 0x2ef   : > { %v3726_v46 = vmax.f32 %v3666_v0, 0.0 }
 0x2f0   : > { %v3727_v53 = vmax.f32 %v3667_v2, 0.0 }
 0x2f1   : > { %v3777_v27 = vpack.c.bf16 %v3726_v46, %v3723_v8 }
 0x2f2   : > { %v3778_v45 = vpack.c.bf16 %v3727_v53, %v3724_v57 }
 0x2f4   : > { %4198 = vmatprep.mubr.bf16.mxu0 %v3778_v45 }
 0x2f5   : > { %4199 = vmatmul.mubr.bf16.gmra.mrb[48].mxu0 %v3777_v27 }
 0x2fa   : > { %v3375_v47 = vpop.f32.mrb[12].mxu0 }
 0x2fb   : > { %v4972_v18 = vpop.f32.mrb[4].mxu1  ;;  %v3592_v17 = vmul.f32 %v9911_v1, %v3375_v47  ;;  %v3377_v13 = vpop.f32.mrb[13].mxu0 }
 0x2fc   : > { %v3594_v7 = vmul.f32 %v4972_v18, %v9933_v28  ;;  %v3494_v51 = vpop.f32.mrb[5].mxu1  ;;  %v3593_v16 = vmul.f32 %v9914_v21, %v3377_v13  ;;  %v3379_v14 = vpop.f32.mrb[14].mxu0 }
 0x2fd   : > { %v3588_v42 = vmul.f32 %v9933_v28, %v3494_v51  ;;  %v4973_v50 = vpop.f32.mrb[6].mxu1  ;;  %v3669_v30 = vadd.f32 %v9917_v19, %v3592_v17  ;;  %v3595_v35 = vmul.f32 %v9911_v1, %v3379_v14  ;;  %v3381_v3 = vpop.f32.mrb[15].mxu0 }
 0x2fe   : > { %v3671_v49 = vadd.f32 %v9935_v11, %v3594_v7  ;;  %v3597_v41 = vmul.f32 %v4973_v50, %v9933_v28  ;;  %v3497_v32 = vpop.f32.mrb[7].mxu1  ;;  %v3670_v6 = vadd.f32 %v9919_v25, %v3593_v16  ;;  %v3596_v59 = vmul.f32 %v9914_v21, %v3381_v3 }
 0x2ff   : > { %v3665_v56 = vadd.f32 %v9935_v11, %v3588_v42  ;;  %v3591_v63 = vmul.f32 %v9933_v28, %v3497_v32  ;;  %v3672_v43 = vadd.f32 %v9917_v19, %v3595_v35  ;;  %v3729_v58 = vmax.f32 %v3669_v30, 0.0 }
 0x300   : > { %v3674_v62 = vadd.f32 %v9935_v11, %v3597_v41  ;;  %v3673_v20 = vadd.f32 %v9919_v25, %v3596_v59  ;;  %v3731_v55 = vmax.f32 %v3671_v49, 0.0  ;;  %v3730_v36 = vmax.f32 %v3670_v6, 0.0 }
 0x301   : > { %v3668_v38 = vadd.f32 %v9935_v11, %v3591_v63  ;;  %v3732_v22 = vmax.f32 %v3672_v43, 0.0  ;;  %v3725_v31 = vmax.f32 %v3665_v56, 0.0 }
 0x302   : > { %v3734_v12 = vmax.f32 %v3674_v62, 0.0  ;;  %v3733_v34 = vmax.f32 %v3673_v20, 0.0 }
 0x303   : > { %v3728_v5 = vmax.f32 %v3668_v38, 0.0  ;;  %v3780_v54 = vpack.c.bf16 %v3732_v22, %v3729_v58 }
 0x304   : > { %v3782_v39 = vpack.c.bf16 %v3734_v12, %v3731_v55  ;;  %v3781_v61 = vpack.c.bf16 %v3733_v34, %v3730_v36 }
 0x305   : > { %v3779_v15 = vpack.c.bf16 %v3728_v5, %v3725_v31 }
 0x306   : > { %4206 = vmatprep.mubr.bf16.mxu0 %v3781_v61 }
 0x307   : > { %5028 = vmatprep.mubr.bf16.mxu1 %v3779_v15  ;;  %4207 = vmatmul.mubr.bf16.gmra.mrb[52].mxu0 %v3780_v54 }
 0x308   : > { %5029 = vmatmul.mubr.bf16.gmra.mrb[24].mxu1 %v3782_v39 }
 0x30b   : > { %v3385_v4 = vpop.f32.mrb[16].mxu0 }
 0x30c   : > { %v3598_v24 = vmul.f32 %v9911_v1, %v3385_v4  ;;  %v3387_v29 = vpop.f32.mrb[17].mxu0 }
 0x30d   : > { %v3599_v23 = vmul.f32 %v9914_v21, %v3387_v29  ;;  %v3389_v48 = vpop.f32.mrb[18].mxu0 }
 0x30e   : > { %v3675_v40 = vadd.f32 %v9917_v19, %v3598_v24  ;;  %v3601_v26 = vmul.f32 %v9911_v1, %v3389_v48  ;;  %v3391_v60 = vpop.f32.mrb[19].mxu0 }
 0x30f   : > { %v3676_v52 = vadd.f32 %v9919_v25, %v3599_v23  ;;  %v3602_v9 = vmul.f32 %v9914_v21, %v3391_v60 }
 0x310   : > { %v3678_v10 = vadd.f32 %v9917_v19, %v3601_v26  ;;  %v3735_v37 = vmax.f32 %v3675_v40, 0.0 }
 0x311   : > { %v3679_v44 = vadd.f32 %v9919_v25, %v3602_v9  ;;  %v3736_v0 = vmax.f32 %v3676_v52, 0.0 }
 0x312   : > { %v3738_v33 = vmax.f32 %v3678_v10, 0.0 }
 0x313   : > { %v3739_v2 = vmax.f32 %v3679_v44, 0.0 }
 0x314   : > { %v3783_v8 = vpack.c.bf16 %v3738_v33, %v3735_v37 }
 0x315   : > { %v3784_v46 = vpack.c.bf16 %v3739_v2, %v3736_v0 }
 0x317   : > { %4214 = vmatprep.mubr.bf16.mxu0 %v3784_v46 }
 0x318   : > { %4215 = vmatmul.mubr.bf16.gmra.mrb[56].mxu0 %v3783_v8 }
 0x31d   : > { %v3395_v57 = vpop.f32.mrb[20].mxu0 }
 0x31e   : > { %v4976_v53 = vpop.f32.mrb[8].mxu1  ;;  %v3604_v27 = vmul.f32 %v9911_v1, %v3395_v57  ;;  %v3397_v47 = vpop.f32.mrb[21].mxu0 }
 0x31f   : > { %v3606_v45 = vmul.f32 %v4976_v53, %v9933_v28  ;;  %v3510_v18 = vpop.f32.mrb[9].mxu1  ;;  %v3605_v17 = vmul.f32 %v9914_v21, %v3397_v47  ;;  %v3399_v13 = vpop.f32.mrb[22].mxu0 }
 0x320   : > { %v3600_v7 = vmul.f32 %v9933_v28, %v3510_v18  ;;  %v4977_v51 = vpop.f32.mrb[10].mxu1  ;;  %v3681_v16 = vadd.f32 %v9917_v19, %v3604_v27  ;;  %v3607_v14 = vmul.f32 %v9911_v1, %v3399_v13  ;;  %v3401_v30 = vpop.f32.mrb[23].mxu0 }
 0x321   : > { %v3683_v42 = vadd.f32 %v9935_v11, %v3606_v45  ;;  %v3609_v50 = vmul.f32 %v4977_v51, %v9933_v28  ;;  %v3513_v49 = vpop.f32.mrb[11].mxu1  ;;  %v3682_v35 = vadd.f32 %v9919_v25, %v3605_v17  ;;  %v3608_v3 = vmul.f32 %v9914_v21, %v3401_v30 }
 0x322   : > { %v3677_v41 = vadd.f32 %v9935_v11, %v3600_v7  ;;  %v3603_v32 = vmul.f32 %v9933_v28, %v3513_v49  ;;  %v3684_v6 = vadd.f32 %v9917_v19, %v3607_v14  ;;  %v3741_v43 = vmax.f32 %v3681_v16, 0.0 }
 0x323   : > { %v3686_v56 = vadd.f32 %v9935_v11, %v3609_v50  ;;  %v3685_v59 = vadd.f32 %v9919_v25, %v3608_v3  ;;  %v3743_v62 = vmax.f32 %v3683_v42, 0.0  ;;  %v3742_v58 = vmax.f32 %v3682_v35, 0.0 }
 0x324   : > { %v3680_v63 = vadd.f32 %v9935_v11, %v3603_v32  ;;  %v3744_v20 = vmax.f32 %v3684_v6, 0.0  ;;  %v3737_v55 = vmax.f32 %v3677_v41, 0.0 }
 0x325   : > { %v3746_v38 = vmax.f32 %v3686_v56, 0.0  ;;  %v3745_v22 = vmax.f32 %v3685_v59, 0.0 }
 0x326   : > { %v3740_v12 = vmax.f32 %v3680_v63, 0.0  ;;  %v3786_v36 = vpack.c.bf16 %v3744_v20, %v3741_v43 }
 0x327   : > { %v3788_v31 = vpack.c.bf16 %v3746_v38, %v3743_v62  ;;  %v3787_v34 = vpack.c.bf16 %v3745_v22, %v3742_v58 }
 0x328   : > { %v3785_v5 = vpack.c.bf16 %v3740_v12, %v3737_v55 }
 0x329   : > { %4222 = vmatprep.mubr.bf16.mxu0 %v3787_v34 }
 0x32a   : > { %5032 = vmatprep.mubr.bf16.mxu1 %v3785_v5  ;;  %4223 = vmatmul.mubr.bf16.gmra.mrb[60].mxu0 %v3786_v36 }
 0x32b   : > { %5033 = vmatmul.mubr.bf16.gmra.mrb[28].mxu1 %v3788_v31 }
 0x32e   : > { %v3405_v54 = vpop.f32.mrb[24].mxu0 }
 0x32f   : > { %v3610_v39 = vmul.f32 %v9911_v1, %v3405_v54  ;;  %v3407_v61 = vpop.f32.mrb[25].mxu0 }
 0x330   : > { %v3611_v15 = vmul.f32 %v9914_v21, %v3407_v61  ;;  %v3409_v4 = vpop.f32.mrb[26].mxu0 }
 0x331   : > { %v3687_v24 = vadd.f32 %v9917_v19, %v3610_v39  ;;  %v3613_v29 = vmul.f32 %v9911_v1, %v3409_v4  ;;  %v3411_v23 = vpop.f32.mrb[27].mxu0 }
 0x332   : > { %v3688_v48 = vadd.f32 %v9919_v25, %v3611_v15  ;;  %v3614_v40 = vmul.f32 %v9914_v21, %v3411_v23 }
 0x333   : > { %v3690_v26 = vadd.f32 %v9917_v19, %v3613_v29  ;;  %v3747_v52 = vmax.f32 %v3687_v24, 0.0 }
 0x334   : > { %v3691_v60 = vadd.f32 %v9919_v25, %v3614_v40  ;;  %v3748_v10 = vmax.f32 %v3688_v48, 0.0 }
 0x335   : > { %v3750_v9 = vmax.f32 %v3690_v26, 0.0 }
 0x336   : > { %v3751_v44 = vmax.f32 %v3691_v60, 0.0 }
 0x337   : > { %v3789_v37 = vpack.c.bf16 %v3750_v9, %v3747_v52 }
 0x338   : > { %v3790_v33 = vpack.c.bf16 %v3751_v44, %v3748_v10 }
 0x33a   : > { %4230 = vmatprep.mubr.bf16.mxu0 %v3790_v33 }
 0x33b   : > { %4231 = vmatmul.mubr.bf16.gmra.mrb[64].mxu0 %v3789_v37 }
 0x340   : > { %v3415_v0 = vpop.f32.mrb[28].mxu0 }
 0x341   : > { %v4980_v2 = vpop.f32.mrb[12].mxu1  ;;  %v3616_v8 = vmul.f32 %v9911_v1, %v3415_v0  ;;  %v3417_v57 = vpop.f32.mrb[29].mxu0 }
 0x342   : > { %v3618_v46 = vmul.f32 %v4980_v2, %v9933_v28  ;;  %v3526_v53 = vpop.f32.mrb[13].mxu1  ;;  %v3617_v27 = vmul.f32 %v9914_v21, %v3417_v57  ;;  %v3419_v47 = vpop.f32.mrb[30].mxu0 }
 0x343   : > { %v3612_v45 = vmul.f32 %v9933_v28, %v3526_v53  ;;  %v4981_v18 = vpop.f32.mrb[14].mxu1  ;;  %v3693_v17 = vadd.f32 %v9917_v19, %v3616_v8  ;;  %v3619_v13 = vmul.f32 %v9911_v1, %v3419_v47  ;;  %v3421_v16 = vpop.f32.mrb[31].mxu0 }
 0x344   : > { %v3695_v7 = vadd.f32 %v9935_v11, %v3618_v46  ;;  %v3621_v51 = vmul.f32 %v4981_v18, %v9933_v28  ;;  %v3529_v42 = vpop.f32.mrb[15].mxu1  ;;  %v3694_v14 = vadd.f32 %v9919_v25, %v3617_v27  ;;  %v3620_v30 = vmul.f32 %v9914_v21, %v3421_v16 }
 0x345   : > { %v3689_v50 = vadd.f32 %v9935_v11, %v3612_v45  ;;  %v3615_v49 = vmul.f32 %v9933_v28, %v3529_v42  ;;  %v3696_v35 = vadd.f32 %v9917_v19, %v3619_v13  ;;  %v3753_v6 = vmax.f32 %v3693_v17, 0.0 }
 0x346   : > { %v3698_v41 = vadd.f32 %v9935_v11, %v3621_v51  ;;  %v3697_v3 = vadd.f32 %v9919_v25, %v3620_v30  ;;  %v3755_v56 = vmax.f32 %v3695_v7, 0.0  ;;  %v3754_v43 = vmax.f32 %v3694_v14, 0.0 }
 0x347   : > { %v3692_v32 = vadd.f32 %v9935_v11, %v3615_v49  ;;  %v3756_v59 = vmax.f32 %v3696_v35, 0.0  ;;  %v3749_v62 = vmax.f32 %v3689_v50, 0.0 }
 0x348   : > { %v3758_v63 = vmax.f32 %v3698_v41, 0.0  ;;  %v3757_v20 = vmax.f32 %v3697_v3, 0.0 }
 0x349   : > { %v3752_v38 = vmax.f32 %v3692_v32, 0.0  ;;  %v3792_v58 = vpack.c.bf16 %v3756_v59, %v3753_v6 }
 0x34a   : > { %v3794_v55 = vpack.c.bf16 %v3758_v63, %v3755_v56  ;;  %v3793_v22 = vpack.c.bf16 %v3757_v20, %v3754_v43 }
 0x34b   : > { %v3791_v12 = vpack.c.bf16 %v3752_v38, %v3749_v62 }
 0x34c   : > { %4238 = vmatprep.mubr.bf16.mxu0 %v3793_v22 }
 0x34d   : > { %5036 = vmatprep.mubr.bf16.mxu1 %v3791_v12  ;;  %4239 = vmatmul.mubr.bf16.gmra.mrb[68].mxu0 %v3792_v58 }
 0x34e   : > { %5037 = vmatmul.mubr.bf16.gmra.mrb[32].mxu1 %v3794_v55 }
 0x34f   : > { %v3425_v36 = vpop.f32.mrb[32].mxu0 }
 0x350   : > { %v3622_v31 = vmul.f32 %v9911_v1, %v3425_v36  ;;  %v3427_v34 = vpop.f32.mrb[33].mxu0 }
 0x351   : > { %v3623_v5 = vmul.f32 %v9914_v21, %v3427_v34  ;;  %v3429_v54 = vpop.f32.mrb[34].mxu0 }
 0x352   : > { %v3699_v39 = vadd.f32 %v9917_v19, %v3622_v31  ;;  %v3625_v61 = vmul.f32 %v9911_v1, %v3429_v54  ;;  %v3431_v15 = vpop.f32.mrb[35].mxu0  ;;  %v10053_v54 = vld [vmem:[%s10163_s7] ss:$0 sm:$0xff] }
 0x353   : > { %v3700_v4 = vadd.f32 %v9919_v25, %v3623_v5  ;;  %v3626_v24 = vmul.f32 %v9914_v21, %v3431_v15 }
 0x354   : > { %v3702_v29 = vadd.f32 %v9917_v19, %v3625_v61  ;;  %v3759_v48 = vmax.f32 %v3699_v39, 0.0 }
 0x355   : > { %v3703_v23 = vadd.f32 %v9919_v25, %v3626_v24  ;;  %v3760_v26 = vmax.f32 %v3700_v4, 0.0 }
 0x356   : > { %v3762_v40 = vmax.f32 %v3702_v29, 0.0 }
 0x357   : > { %v3763_v60 = vmax.f32 %v3703_v23, 0.0 }
 0x358   : > { %v3795_v52 = vpack.c.bf16 %v3762_v40, %v3759_v48 }
 0x359   : > { %v3796_v9 = vpack.c.bf16 %v3763_v60, %v3760_v26 }
 0x35b   : > { %4246 = vmatprep.mubr.bf16.mxu0 %v3796_v9  ;;  %v3435_v10 = vpop.f32.mrb[36].mxu0  ;;  %v4984_v44 = vpop.f32.mrb[16].mxu1 }
 0x35c   : > { %4247 = vmatmul.mubr.bf16.gmra.mrb[72].mxu0 %v3795_v52  ;;  %v3628_v37 = vmul.f32 %v9911_v1, %v3435_v10  ;;  %v3630_v33 = vmul.f32 %v4984_v44, %v9933_v28  ;;  %v3437_v0 = vpop.f32.mrb[37].mxu0  ;;  %v3542_v2 = vpop.f32.mrb[17].mxu1 }
 0x35d   : > { %v3629_v8 = vmul.f32 %v9914_v21, %v3437_v0  ;;  %v3624_v46 = vmul.f32 %v9933_v28, %v3542_v2  ;;  %v3439_v57 = vpop.f32.mrb[38].mxu0  ;;  %v4985_v53 = vpop.f32.mrb[18].mxu1 }
 0x35e   : > { %v3705_v27 = vadd.f32 %v9917_v19, %v3628_v37  ;;  %v3707_v45 = vadd.f32 %v9935_v11, %v3630_v33  ;;  %v3631_v47 = vmul.f32 %v9911_v1, %v3439_v57  ;;  %v3633_v18 = vmul.f32 %v4985_v53, %v9933_v28  ;;  %v3441_v17 = vpop.f32.mrb[39].mxu0  ;;  %v3545_v7 = vpop.f32.mrb[19].mxu1 }
 0x35f   : > { %v3706_v13 = vadd.f32 %v9919_v25, %v3629_v8  ;;  %v3701_v51 = vadd.f32 %v9935_v11, %v3624_v46  ;;  %v3632_v16 = vmul.f32 %v9914_v21, %v3441_v17  ;;  %v3627_v42 = vmul.f32 %v9933_v28, %v3545_v7 }
 0x360   : > { %v3708_v14 = vadd.f32 %v9917_v19, %v3631_v47  ;;  %v3710_v50 = vadd.f32 %v9935_v11, %v3633_v18  ;;  %v3765_v49 = vmax.f32 %v3705_v27, 0.0  ;;  %v3767_v35 = vmax.f32 %v3707_v45, 0.0 }
 0x361   : > { %v3709_v30 = vadd.f32 %v9919_v25, %v3632_v16  ;;  %v3704_v1 = vadd.f32 %v9935_v11, %v3627_v42  ;;  %v3766_v32 = vmax.f32 %v3706_v13, 0.0  ;;  %v3761_v6 = vmax.f32 %v3701_v51, 0.0 }
 0x362   : > { %v3768_v41 = vmax.f32 %v3708_v14, 0.0  ;;  %v3770_v3 = vmax.f32 %v3710_v50, 0.0 }
 0x363   : > { %v3769_v56 = vmax.f32 %v3709_v30, 0.0  ;;  %v3764_v59 = vmax.f32 %v3704_v1, 0.0 }
 0x364   : > { %v3798_v63 = vpack.c.bf16 %v3768_v41, %v3765_v49  ;;  %v3800_v21 = vpack.c.bf16 %v3770_v3, %v3767_v35 }
 0x365   : > { %v3799_v28 = vpack.c.bf16 %v3769_v56, %v3766_v32  ;;  %v3797_v43 = vpack.c.bf16 %v3764_v59, %v3761_v6 }
 0x367   : > { %4254 = vmatprep.mubr.bf16.mxu0 %v3799_v28  ;;  %5040 = vmatprep.mubr.bf16.mxu1 %v3797_v43 }
 0x368   : > { %4255 = vmatmul.mubr.bf16.gmra.mrb[76].mxu0 %v3798_v63  ;;  %5041 = vmatmul.mubr.bf16.gmra.mrb[36].mxu1 %v3800_v21 }
 0x389   : > { %v4874_v19 = vpop.f32.mrb[40].mxu0 }
 0x38a   : > { %v4875_v25 = vpop.f32.mrb[41].mxu0 }
 0x38b   : > { %v4876_v11 = vadd.f32 %v4875_v25, %v4874_v19  ;;  %v4877_v62 = vpop.f32.mrb[42].mxu0 }
 0x38c   : > { %v4878_v20 = vpop.f32.mrb[43].mxu0 }
 0x38d   : > { %v4879_v38 = vadd.f32 %v4878_v20, %v4877_v62 }
 0x3a9   : > { %v4880_v58 = vpop.f32.mrb[44].mxu0  ;;  %v5026_v55 = vpop.f32.mrb[20].mxu1 }
 0x3aa   : > { %v4881_v22 = vpop.f32.mrb[45].mxu0  ;;  %v4297_v12 = vpop.f32.mrb[21].mxu1 }
 0x3ab   : > { %v4882_v36 = vadd.f32 %v4881_v22, %v4880_v58  ;;  %v5045_v31 = vadd.f32 %v4876_v11, %v4297_v12  ;;  %v4883_v34 = vpop.f32.mrb[46].mxu0  ;;  %v5027_v5 = vpop.f32.mrb[22].mxu1 }
 0x3ac   : > { %v4884_v39 = vpop.f32.mrb[47].mxu0  ;;  %v4300_v61 = vpop.f32.mrb[23].mxu1 }
 0x3ad   : > { %v5044_v15 = vadd.f32 %v5026_v55, %v4882_v36  ;;  %v4885_v4 = vadd.f32 %v4884_v39, %v4883_v34  ;;  %v5047_v24 = vadd.f32 %v4879_v38, %v4300_v61  ;;  %v4383_v29 = vadd.f32 %v5045_v31, %v10053_v54 }
 0x3af   : > { %v5046_v23 = vadd.f32 %v5027_v5, %v4885_v4  ;;  %v4384_v48 = vadd.f32 %v5047_v24, %v10053_v54  ;;  %v4385_v40 = vadd.f32 %v5044_v15, %v10053_v54 }
 0x3b1   : > { %v4386_v26 = vadd.f32 %v5046_v23, %v10053_v54  ;;  %v4774_v60 = vpack.c.bf16 %v4384_v48, %v4383_v29 }
 0x3b3   : > { %v4779_v52 = vpack.c.bf16 %v4386_v26, %v4385_v40  ;;  %4775 = vst [vmem:[%s10061_s16] sm:$0xff] %v4774_v60  }
 0x3b5   : > { %4821 = vst [vmem:[%s10061_s16 + $0x8] sm:$0xff] %v4779_v52  }
 0x3c8   : > { %v4886_v9 = vpop.f32.mrb[48].mxu0 }
 0x3c9   : > { %v4887_v10 = vpop.f32.mrb[49].mxu0 }
 0x3ca   : > { %v4888_v44 = vadd.f32 %v4887_v10, %v4886_v9  ;;  %v4889_v37 = vpop.f32.mrb[50].mxu0 }
 0x3cb   : > { %v4890_v33 = vpop.f32.mrb[51].mxu0 }
 0x3cc   : > { %v4891_v0 = vadd.f32 %v4890_v33, %v4889_v37 }
 0x3da   : > { %v4892_v2 = vpop.f32.mrb[52].mxu0 }
 0x3db   : > { %v5030_v8 = vpop.f32.mrb[24].mxu1  ;;  %v4893_v46 = vpop.f32.mrb[53].mxu0 }
 0x3dc   : > { %v4313_v57 = vpop.f32.mrb[25].mxu1  ;;  %v4894_v53 = vadd.f32 %v4893_v46, %v4892_v2  ;;  %v4895_v45 = vpop.f32.mrb[54].mxu0 }
 0x3dd   : > { %v5049_v27 = vadd.f32 %v4888_v44, %v4313_v57  ;;  %v5031_v47 = vpop.f32.mrb[26].mxu1  ;;  %v4896_v18 = vpop.f32.mrb[55].mxu0 }
 0x3de   : > { %v4316_v17 = vpop.f32.mrb[27].mxu1  ;;  %v5048_v7 = vadd.f32 %v5030_v8, %v4894_v53  ;;  %v4897_v13 = vadd.f32 %v4896_v18, %v4895_v45 }
 0x3df   : > { %v5051_v51 = vadd.f32 %v4891_v0, %v4316_v17  ;;  %v4387_v16 = vadd.f32 %v5049_v27, %v10053_v54 }
 0x3e0   : > { %v5050_v42 = vadd.f32 %v5031_v47, %v4897_v13  ;;  %v4389_v50 = vadd.f32 %v5048_v7, %v10053_v54 }
 0x3e1   : > { %v4388_v14 = vadd.f32 %v5051_v51, %v10053_v54 }
 0x3e2   : > { %v4390_v30 = vadd.f32 %v5050_v42, %v10053_v54 }
 0x3e3   : > { %v4784_v1 = vpack.c.bf16 %v4388_v14, %v4387_v16 }
 0x3e4   : > { %v4789_v49 = vpack.c.bf16 %v4390_v30, %v4389_v50 }
 0x3e5   : > { %4822 = vst [vmem:[%s10061_s16 + $0x10] sm:$0xff] %v4784_v1  }
 0x3e6   : > { %4823 = vst [vmem:[%s10061_s16 + $0x18] sm:$0xff] %v4789_v49  }
 0x3eb   : > { %v4898_v35 = vpop.f32.mrb[56].mxu0 }
 0x3ec   : > { %v4899_v41 = vpop.f32.mrb[57].mxu0 }
 0x3ed   : > { %v4900_v3 = vadd.f32 %v4899_v41, %v4898_v35  ;;  %v4901_v32 = vpop.f32.mrb[58].mxu0 }
 0x3ee   : > { %v4902_v6 = vpop.f32.mrb[59].mxu0 }
 0x3ef   : > { %v4903_v56 = vadd.f32 %v4902_v6, %v4901_v32 }
 0x3fd   : > { %v4904_v59 = vpop.f32.mrb[60].mxu0 }
 0x3fe   : > { %v5034_v63 = vpop.f32.mrb[28].mxu1  ;;  %v4905_v21 = vpop.f32.mrb[61].mxu0 }
 0x3ff   : > { %v4329_v28 = vpop.f32.mrb[29].mxu1  ;;  %v4906_v43 = vadd.f32 %v4905_v21, %v4904_v59  ;;  %v4907_v25 = vpop.f32.mrb[62].mxu0 }
 0x400   : > { %v5053_v19 = vadd.f32 %v4900_v3, %v4329_v28  ;;  %v5035_v11 = vpop.f32.mrb[30].mxu1  ;;  %v4908_v62 = vpop.f32.mrb[63].mxu0 }
 0x401   : > { %v4332_v20 = vpop.f32.mrb[31].mxu1  ;;  %v5052_v38 = vadd.f32 %v5034_v63, %v4906_v43  ;;  %v4909_v58 = vadd.f32 %v4908_v62, %v4907_v25 }
 0x402   : > { %v5055_v55 = vadd.f32 %v4903_v56, %v4332_v20  ;;  %v4391_v22 = vadd.f32 %v5053_v19, %v10053_v54 }
 0x403   : > { %v5054_v12 = vadd.f32 %v5035_v11, %v4909_v58  ;;  %v4393_v31 = vadd.f32 %v5052_v38, %v10053_v54 }
 0x404   : > { %v4392_v36 = vadd.f32 %v5055_v55, %v10053_v54 }
 0x405   : > { %v4394_v34 = vadd.f32 %v5054_v12, %v10053_v54 }
 0x406   : > { %v4794_v5 = vpack.c.bf16 %v4392_v36, %v4391_v22 }
 0x407   : > { %v4799_v39 = vpack.c.bf16 %v4394_v34, %v4393_v31 }
 0x408   : > { %4824 = vst [vmem:[%s10061_s16 + $0x20] sm:$0xff] %v4794_v5  }
 0x409   : > { %4825 = vst [vmem:[%s10061_s16 + $0x28] sm:$0xff] %v4799_v39  }
 0x40e   : > { %v4910_v61 = vpop.f32.mrb[64].mxu0 }
 0x40f   : > { %v4911_v15 = vpop.f32.mrb[65].mxu0 }
 0x410   : > { %v4912_v4 = vadd.f32 %v4911_v15, %v4910_v61  ;;  %v4913_v24 = vpop.f32.mrb[66].mxu0 }
 0x411   : > { %v4914_v29 = vpop.f32.mrb[67].mxu0 }
 0x412   : > { %v4915_v23 = vadd.f32 %v4914_v29, %v4913_v24 }
 0x420   : > { %v4916_v48 = vpop.f32.mrb[68].mxu0 }
 0x421   : > { %v5038_v40 = vpop.f32.mrb[32].mxu1  ;;  %v4917_v26 = vpop.f32.mrb[69].mxu0 }
 0x422   : > { %v4345_v60 = vpop.f32.mrb[33].mxu1  ;;  %v4918_v52 = vadd.f32 %v4917_v26, %v4916_v48  ;;  %v4919_v10 = vpop.f32.mrb[70].mxu0 }
 0x423   : > { %v5057_v9 = vadd.f32 %v4912_v4, %v4345_v60  ;;  %v5039_v44 = vpop.f32.mrb[34].mxu1  ;;  %v4920_v37 = vpop.f32.mrb[71].mxu0 }
 0x424   : > { %v4348_v33 = vpop.f32.mrb[35].mxu1  ;;  %v5056_v0 = vadd.f32 %v5038_v40, %v4918_v52  ;;  %v4921_v2 = vadd.f32 %v4920_v37, %v4919_v10 }
 0x425   : > { %v5059_v8 = vadd.f32 %v4915_v23, %v4348_v33  ;;  %v4395_v46 = vadd.f32 %v5057_v9, %v10053_v54 }
 0x426   : > { %v5058_v57 = vadd.f32 %v5039_v44, %v4921_v2  ;;  %v4397_v27 = vadd.f32 %v5056_v0, %v10053_v54 }
 0x427   : > { %v4396_v53 = vadd.f32 %v5059_v8, %v10053_v54 }
 0x428   : > { %v4398_v45 = vadd.f32 %v5058_v57, %v10053_v54 }
 0x429   : > { %v4804_v47 = vpack.c.bf16 %v4396_v53, %v4395_v46 }
 0x42a   : > { %v4809_v18 = vpack.c.bf16 %v4398_v45, %v4397_v27 }
 0x42b   : > { %4826 = vst [vmem:[%s10061_s16 + $0x30] sm:$0xff] %v4804_v47  }
 0x42c   : > { %4827 = vst [vmem:[%s10061_s16 + $0x38] sm:$0xff] %v4809_v18  }
 0x42f   : > { %v4922_v17 = vpop.f32.mrb[72].mxu0 }
 0x430   : > { %v4923_v7 = vpop.f32.mrb[73].mxu0 }
 0x431   : > { %v4924_v13 = vadd.f32 %v4923_v7, %v4922_v17  ;;  %v4925_v51 = vpop.f32.mrb[74].mxu0 }
 0x432   : > { %v4926_v16 = vpop.f32.mrb[75].mxu0 }
 0x433   : > { %v4927_v42 = vadd.f32 %v4926_v16, %v4925_v51 }
 0x43b   : > { %v4928_v14 = vpop.f32.mrb[76].mxu0  ;;  %v5042_v50 = vpop.f32.mrb[36].mxu1 }
 0x43c   : > { %v4929_v30 = vpop.f32.mrb[77].mxu0  ;;  %v4361_v1 = vpop.f32.mrb[37].mxu1 }
 0x43d   : > { %v4930_v49 = vadd.f32 %v4929_v30, %v4928_v14  ;;  %v5061_v35 = vadd.f32 %v4924_v13, %v4361_v1  ;;  %v4931_v41 = vpop.f32.mrb[78].mxu0  ;;  %v5043_v3 = vpop.f32.mrb[38].mxu1 }
 0x43e   : > { %v4932_v32 = vpop.f32.mrb[79].mxu0  ;;  %v4364_v6 = vpop.f32.mrb[39].mxu1 }
 0x43f   : > { %v5060_v56 = vadd.f32 %v5042_v50, %v4930_v49  ;;  %v4933_v59 = vadd.f32 %v4932_v32, %v4931_v41  ;;  %v5063_v63 = vadd.f32 %v4927_v42, %v4364_v6  ;;  %v4399_v21 = vadd.f32 %v5061_v35, %v10053_v54 }
 0x441   : > { %v5062_v28 = vadd.f32 %v5043_v3, %v4933_v59  ;;  %v4400_v43 = vadd.f32 %v5063_v63, %v10053_v54  ;;  %v4401_v19 = vadd.f32 %v5060_v56, %v10053_v54 }
 0x443   : > { %v4402_v25 = vadd.f32 %v5062_v28, %v10053_v54  ;;  %v4814_v11 = vpack.c.bf16 %v4400_v43, %v4399_v21 }
 0x445   : > { %v4819_v62 = vpack.c.bf16 %v4402_v25, %v4401_v19  ;;  %4828 = vst [vmem:[%s10061_s16 + $0x40] sm:$0xff] %v4814_v11  }
 0x447   : > { %4829 = vst [vmem:[%s10061_s16 + $0x48] sm:$0xff] %v4819_v62  }
 0x448   : > { %6457 = shalt.err (!%p6454_p9)
}
 0x449   : > { %s6458_s25 = scalar_lea.hbm %s10094_s20, 1280  ;;  %s6462_s21 = scalar_lea.hbm %s10164_s8, 5120 }
 0x44a   : > { %p6459_p10 = scmp.ne.s32.totalorder %s10094_s20, %s6458_s25  ;;  %p6463_p13 = scmp.lt.u32.totalorder %s10094_s20, %s10164_s8 }
 0x44b   : > { %p6464_p0 = scmp.lt.u32.totalorder %s6462_s21, %s6458_s25  ;;  %p6466_p2 = scmp.lt.u32.totalorder %s6458_s25, %s10094_s20 }
 0x44c   : > { %p6460_p11 = pnand %p6459_p10, %p6654_p3 }
 0x44d   : > { %p6465_p1 = por %p6464_p0, %p6463_p13 }
 0x44e   : > { %p6461_p12 = pneg %p6460_p11 }
 0x44f   : > { %p6467_p4 = por %p6466_p2, %p6465_p1 }
 0x451   : > { %p6468_p5 = pnand %p6467_p4, %p6461_p12 }
 0x453   : > { %6471 = shalt.err (!%p6468_p5)
}
 0x454   : > { %5090 = dma.vmem_to_hbm [thread:$0]  (%p6654_p3), %s10096_s22, 1280, %s10094_s20, %s10101_s24, %s10792_s0, %s10792_s0, %s10760_s30  }
 0x455 PF: > { %p5096_p6 = scmp.ge.s32.totalorder %s6538_s12, 2  ;;  %s4534_s15 = sand.u32 1, %s6510_s27  }
 0x456   : > { %s4535_s26 = scalar_lea.sflag [#allocation3], %s4534_s15 }
 0x457   : > { %p5093_p7 = pnand %p5096_p6, %p6663_p8 }
 0x459   : > { %6505 = dma.done.wait (!%p5093_p7), %s4535_s26, 1280  }
 0x45a   : > { %6507 = vsyncadd (!%p5093_p7), %s4535_s26, 4294966016  ;;  %s21_s12 = sadd.s32 1, %s6538_s12   ;;  %s11111_s0 = sld [smem:[#allocation5_spill]] }
 0x45b   : > { %p18_p9 = scmp.ge.s32.totalorder %s21_s12, 6   ;;  %s11112_s18 = sld [smem:[#allocation6_spill]] }
 0x45c   : > { %s11113_s27 = smov %s6514_s28  ;;  %s11114_s28 = smov %s6518_s29 }
 0x45d   : > { %s11115_s29 = smov %s6672_s23  ;;  %s11116_s30 = smov %s6530_s10 }
 0x45e   : > { %s11117_s9 = smov %s6534_s11  ;;  %20 = sbr.rel (!%p18_p9) target bundleno = 7 (0x7), region = 90 }
 0x460   : > { %s11118_s10 = smov %s11111_s0 }
 0x461   : > { %s11119_s11 = smov %s11112_s18 }
 0x465   :  { %4540 = vsyncpa [#allocation3], 1 }
 0x466   :  { %4542 = vsyncpa [#allocation3 + $0x1], 1 }

</bundles_post_ra>
